<compile_context>
chip_gen: v6e
topology: v6e:2x2x1
jax: 0.10.0
libtpu: 0.0.40
codegen_flags: <defaults>
</compile_context>

<pallas_src>
import jax
import jax.numpy as jnp
from jax.experimental import pallas as pl
from jax.experimental.pallas import tpu as pltpu

# ---- Alphabet constants (stand-in for the PyTorch `Alphabet` class) ----
START_INT = 1   # Alphabet.start_integer
STOP_INT = 0    # Alphabet.stop_integer (padding_idx of both embeddings)

# ---- model configuration (small, consistent with the torch module) ----
A = 32            # alphabet_size
T = 8             # tag_vector_dim
E = 16            # embed_dim
SH = 16           # src_hid_size
TH = 16           # trg_hid_size
AD = 16           # attention_dim
SRC_LAYERS = 1    # src_nb_layers
TRG_LAYERS = 2    # trg_nb_layers
OUT_LEN = 8       # output_length
L = 8             # lemma length
B = 2             # batch size
OD = TH + TH + T  # out_dim = trg_hid + trg_hid + tag_vector_dim
# dropout_p = 0.0 and teacher_force = 0.0  -> forward is deterministic (eval semantics)

# ---- single weight-slab row layout (packed host-side, sliced once in-kernel) ----
R_ENC_WIH = 0                    # (2E, 8SH)  fused bidir encoder input weights
R_ENC_WHH = R_ENC_WIH + 2 * E    # (2SH, 8SH) fused bidir encoder recurrent weights
R_DEC_W0 = R_ENC_WHH + 2 * SH    # (A+TH, 4TH) [trg_emb @ W_ih0 ; W_hh0]
R_DEC_W1 = R_DEC_W0 + A + TH     # (2TH, 4TH)  [W_ih1 ; W_hh1]
R_HT_PROJ = R_DEC_W1 + 2 * TH    # (TH, AD+OD) [W_dec_att | W1_h]
R_W1_CTX = R_HT_PROJ + TH        # (TH, OD)    fc_out layer-1, context rows
R_W1_TAG = R_W1_CTX + TH         # (T, OD)     fc_out layer-1, tag rows
R_W2 = R_W1_TAG + T              # (OD, A)     fc_out layer-2
R_W_SCALE = R_W2 + OD            # (2SH, TH)   scale_enc_hs
R_W_EA = R_W_SCALE + 2 * SH      # (TH, AD)    enc_attention
R_BIAS = R_W_EA + TH             # 8 bias rows (layout below)
RB_ENC = R_BIAS + 0              # fused encoder bias,     lanes [0:8*SH]
RB_SCALE = R_BIAS + 1            # scale_enc_hs bias,      lanes [0:TH]
RB_DEC0 = R_BIAS + 2             # decoder layer-0 bias,   lanes [0:4*TH]
RB_DEC1 = R_BIAS + 3             # decoder layer-1 bias,   lanes [0:4*TH]
RB_ATT = R_BIAS + 4              # enc_att bias [0:AD], dec_att bias [AD:2*AD]
RB_B1 = R_BIAS + 5               # fc_out layer-1 bias,    lanes [0:OD]
RB_B2 = R_BIAS + 6               # fc_out layer-2 bias,    lanes [0:A]
W_ROWS = R_BIAS + 8              # 288 rows total, 128 lanes wide


def babytransducer_kernel(src_ref, tag_ref, w_ref, out_ref):
    f32 = jnp.float32

    # -------- one-time parameter unpack (static slices of the single slab) --------
    wih_f = w_ref[R_ENC_WIH:R_ENC_WIH + E, :]                 # (E, 8SH) fwd-input rows
    wih_b = w_ref[R_ENC_WIH + E:R_ENC_WIH + 2 * E, :]         # (E, 8SH) bwd-input rows
    enc_whh = w_ref[R_ENC_WHH:R_ENC_WHH + 2 * SH, :]          # (2SH, 8SH)
    dec_w0 = w_ref[R_DEC_W0:R_DEC_W0 + A + TH, 0:4 * TH]      # (A+TH, 4TH)
    dec_w1 = w_ref[R_DEC_W1:R_DEC_W1 + 2 * TH, 0:4 * TH]      # (2TH, 4TH)
    w_ht = w_ref[R_HT_PROJ:R_HT_PROJ + TH, 0:AD + OD]         # (TH, AD+OD)
    w1_ctx = w_ref[R_W1_CTX:R_W1_CTX + TH, 0:OD]              # (TH, OD)
    w1_tag = w_ref[R_W1_TAG:R_W1_TAG + T, 0:OD]               # (T, OD)
    w2 = w_ref[R_W2:R_W2 + OD, 0:A]                           # (OD, A)
    w_sc_f = w_ref[R_W_SCALE:R_W_SCALE + SH, 0:TH]            # (SH, TH)
    w_sc_b = w_ref[R_W_SCALE + SH:R_W_SCALE + 2 * SH, 0:TH]   # (SH, TH)
    w_ea = w_ref[R_W_EA:R_W_EA + TH, 0:AD]                    # (TH, AD)
    enc_b = w_ref[RB_ENC:RB_ENC + 1, :]                       # (1, 8SH)
    b_scale = w_ref[RB_SCALE:RB_SCALE + 1, 0:TH]
    dec_b0 = w_ref[RB_DEC0:RB_DEC0 + 1, 0:4 * TH]
    dec_b1 = w_ref[RB_DEC1:RB_DEC1 + 1, 0:4 * TH]
    b_ea = w_ref[RB_ATT:RB_ATT + 1, 0:AD]
    b_da = w_ref[RB_ATT:RB_ATT + 1, AD:2 * AD]
    b1 = w_ref[RB_B1:RB_B1 + 1, 0:OD]
    b2 = w_ref[RB_B2:RB_B2 + 1, 0:A]

    tag = tag_ref[...]          # (B, T)
    src2 = src_ref[...]         # (L*B, E), time-major rows (t, b)

    # -------- encoder: input projections hoisted out of the recurrence --------
    gf_all = jnp.dot(src2, wih_f, preferred_element_type=f32)   # (L*B, 8SH) fwd gate cols
    gb_all = jnp.dot(src2, wih_b, preferred_element_type=f32)   # (L*B, 8SH) bwd gate cols
    # gx[t] is independent of the recurrence -> off the serial chain (free filler).
    gx = [gf_all[t * B:(t + 1) * B, :]
          + gb_all[(L - 1 - t) * B:(L - t) * B, :]
          + enc_b
          for t in range(L)]                                    # L x (B, 8SH)

    # -------- fused bidirectional encoder LSTM recurrence (one matmul / step) --------
    # Gate columns (8*SH = 128): [i_f i_b f_f f_b g_f g_b o_f o_b];
    # h/c state layout (2*SH):   [:, :SH] = forward, [:, SH:] = backward.
    h = jnp.zeros((B, 2 * SH), f32)
    c = jnp.zeros((B, 2 * SH), f32)
    hf_list = [None] * L
    hb_list = [None] * L
    for t in range(L):
        gates = gx[t] + jnp.dot(h, enc_whh, preferred_element_type=f32)  # (B, 128)
        sg = jax.nn.sigmoid(gates)          # one 128-lane EUP push
        tg = jnp.tanh(gates)                # one 128-lane EUP push
        c = sg[:, 2 * SH:4 * SH] * c + sg[:, 0:2 * SH] * tg[:, 4 * SH:6 * SH]
        h = sg[:, 6 * SH:8 * SH] * jnp.tanh(c)
        hf_list[t] = h[:, 0:SH]             # forward state belongs to position t
        hb_list[L - 1 - t] = h[:, SH:2 * SH]  # backward state belongs to position L-1-t

    # -------- hoisted: scale_enc_hs, enc_attention, attention pre-contraction --------
    hf2 = jnp.concatenate(hf_list, axis=0)                      # (L*B, SH), rows (t, b)
    hb2 = jnp.concatenate(hb_list, axis=0)                      # (L*B, SH)
    senc2 = (jnp.dot(hf2, w_sc_f, preferred_element_type=f32)
             + jnp.dot(hb2, w_sc_b, preferred_element_type=f32)
             + b_scale)                                         # (L*B, TH)
    enc_att2 = jnp.dot(senc2, w_ea, preferred_element_type=f32) + b_ea  # (L*B, AD)
    # No softmax between the two attention products in the reference module, so
    # context = dec_att @ (enc_att^T @ senc) exactly.  Pre-contract over positions:
    P = jnp.zeros((B, AD, TH), f32)
    for t in range(L):
        a_t = enc_att2[t * B:(t + 1) * B, :]                    # (B, AD)
        s_t = senc2[t * B:(t + 1) * B, :]                       # (B, TH)
        P = P + a_t[:, :, None] * s_t[:, None, :]               # (B, AD, TH)

    # tag (+ fc_out layer-1 bias) contribution is constant across decode steps.
    tag_w1 = jnp.dot(tag, w1_tag, preferred_element_type=f32) + b1      # (B, OD)

    # -------- decoder: greedy argmax feedback, 2 stacked (fused) LSTM cells --------
    lane_ids = jax.lax.broadcasted_iota(jnp.int32, (B, A), 1)
    start_row = (lane_ids == START_INT).astype(f32)             # get_one_hot_vec(A, start)

    hs = [jnp.zeros((B, TH), f32) for _ in range(TRG_LAYERS)]
    cs = [jnp.zeros((B, TH), f32) for _ in range(TRG_LAYERS)]

    rows = [start_row]
    prev = start_row   # feedback carries pre-activation logits from step 1 onward
    for step in range(OUT_LEN):
        # greedy feedback: first maximal index (torch.max semantics).
        # argmax(prev) == argmax(log_softmax(tanh(prev))) since both maps are monotone.
        m = jnp.max(prev, axis=1, keepdims=True)
        idx = jnp.min(jnp.where(prev == m, lane_ids, jnp.int32(A)),
                      axis=1, keepdims=True)                    # (B, 1) int32
        onehot = (lane_ids == idx).astype(f32)                  # (B, A)

        # layer-0 LSTM cell: one fused push; trg_embed folded into the gate table.
        g0 = (jnp.dot(jnp.concatenate([onehot, hs[0]], axis=1), dec_w0,
                      preferred_element_type=f32) + dec_b0)     # (B, 4TH)
        s0 = jax.nn.sigmoid(g0)
        t0 = jnp.tanh(g0)
        cs[0] = s0[:, TH:2 * TH] * cs[0] + s0[:, 0:TH] * t0[:, 2 * TH:3 * TH]
        hs[0] = s0[:, 3 * TH:4 * TH] * jnp.tanh(cs[0])

        # layer-1 LSTM cell (dropout_p = 0 -> identity between layers).
        g1 = (jnp.dot(jnp.concatenate([hs[0], hs[1]], axis=1), dec_w1,
                      preferred_element_type=f32) + dec_b1)     # (B, 4TH)
        s1 = jax.nn.sigmoid(g1)
        t1 = jnp.tanh(g1)
        cs[1] = s1[:, TH:2 * TH] * cs[1] + s1[:, 0:TH] * t1[:, 2 * TH:3 * TH]
        hs[1] = s1[:, 3 * TH:4 * TH] * jnp.tanh(cs[1])
        h_t = hs[1]                                             # (B, TH)

        # fused same-LHS projection: dec_attention | fc_out-layer-1(h_t) in one push.
        hp = jnp.dot(h_t, w_ht, preferred_element_type=f32)     # (B, AD+OD)
        dec_att = hp[:, 0:AD] + b_da                            # (B, AD)

        # attention via the hoisted pre-contraction P (raw dot weights, no softmax).
        context = jnp.einsum('bqa,bah->bqh', dec_att[:, None, :], P,
                             preferred_element_type=f32)[:, 0, :]        # (B, TH)

        # fc_out = Linear(OD, OD) -> Linear(OD, A); concat(context, h_t, tag) folded
        # into the row-split matmuls of the first layer.
        z1 = (jnp.dot(context, w1_ctx, preferred_element_type=f32)
              + hp[:, AD:AD + OD] + tag_w1)                              # (B, OD)
        u = jnp.dot(z1, w2, preferred_element_type=f32) + b2             # (B, A) logits

        prev = u   # recurrence only needs u; tanh/log_softmax drop off the chain

        # output transform (overlapped with the next step by the scheduler)
        y = jnp.tanh(u)
        s = y - jnp.max(y, axis=1, keepdims=True)
        rows.append(s - jnp.log(jnp.sum(jnp.exp(s), axis=1, keepdims=True)))

    # single lane-dense store of all 9 rows (host reshapes to (B, OUT_LEN+1, A)).
    out_ref[...] = jnp.concatenate(rows, axis=1)                # (B, (OUT_LEN+1)*A)


def babytransducer_forward(src_emb, tag, w_slab):
    # time-major, flattened source embeddings: row index = t*B + b
    src2 = jnp.transpose(src_emb, (1, 0, 2)).reshape(L * B, E)
    out_flat = pl.pallas_call(
        babytransducer_kernel,
        out_shape=jax.ShapeDtypeStruct((B, (OUT_LEN + 1) * A), jnp.float32),
    )(src2, tag, w_slab)
    return out_flat.reshape(B, OUT_LEN + 1, A)


# ---------------- host-side parameter construction / packing ----------------

def _interleave(w_f, w_b, hid):
    """Interleave per-gate column blocks [i|f|g|o] -> [i_f i_b f_f f_b g_f g_b o_f o_b]."""
    parts = []
    for k in range(4):
        parts.append(w_f[:, k * hid:(k + 1) * hid])
        parts.append(w_b[:, k * hid:(k + 1) * hid])
    return jnp.concatenate(parts, axis=1)


def _fuse_block_diag(w_f, w_b, hid):
    """Block-diagonal fused weight: fwd-input rows feed fwd gate cols, bwd rows feed bwd cols."""
    z_f = jnp.zeros_like(w_f)
    z_b = jnp.zeros_like(w_b)
    top = _interleave(w_f, z_f, hid)   # (Din, 8*hid) fwd columns filled
    bot = _interleave(z_b, w_b, hid)   # (Din, 8*hid) bwd columns filled
    return jnp.concatenate([top, bot], axis=0)


def init_params(key):
    ks = iter(jax.random.split(key, 32))

    def u(shape, scale=0.2):
        return jax.random.uniform(next(ks), shape, jnp.float32, -scale, scale)

    p = {}
    # encoder bidirectional LSTM (layer 0); weights stored input-major (in, 4*hid),
    # bias = b_ih + b_hh combined.
    p["enc_wih_f"] = u((E, 4 * SH)); p["enc_whh_f"] = u((SH, 4 * SH)); p["enc_b_f"] = u((1, 4 * SH))
    p["enc_wih_b"] = u((E, 4 * SH)); p["enc_whh_b"] = u((SH, 4 * SH)); p["enc_b_b"] = u((1, 4 * SH))
    # scale_enc_hs Linear(2*SH -> TH) acting on concat(fwd, bwd)
    p["w_scale"] = u((2 * SH, TH)); p["b_scale"] = u((1, TH))
    # stacked decoder LSTM cells (E == TH so layer 0 / 1 weights share a shape)
    p["dec_wih"] = u((TRG_LAYERS, TH, 4 * TH))
    p["dec_whh"] = u((TRG_LAYERS, TH, 4 * TH))
    p["dec_b"] = u((TRG_LAYERS, 4 * TH))
    # target embedding with padding row zeroed (padding_idx = stop_integer)
    p["trg_emb"] = u((A, E)).at[STOP_INT].set(0.0)
    # attention linears
    p["w_ea"] = u((TH, AD)); p["b_ea"] = u((1, AD))
    p["w_da"] = u((TH, AD)); p["b_da"] = u((1, AD))
    # fc_out: Linear(OD, OD) acting on concat(context, h_t, tag), then Linear(OD, A)
    p["w1"] = u((OD, OD)); p["b1"] = u((1, OD))
    p["w2"] = u((OD, A)); p["b2"] = u((1, A))
    # source embedding table (used by glue gather of the static lemma ids)
    p["src_emb_table"] = u((A, E)).at[STOP_INT].set(0.0)
    return p


def pack_params(p):
    """Pack every parameter into ONE (W_ROWS, 128) f32 slab (3 kernel inputs total)."""
    W = jnp.zeros((W_ROWS, 128), jnp.float32)

    # fused bidirectional encoder weights (gate columns interleaved fwd/bwd)
    enc_wih = _fuse_block_diag(p["enc_wih_f"], p["enc_wih_b"], SH)          # (2E, 8SH)
    enc_whh = _fuse_block_diag(p["enc_whh_f"], p["enc_whh_b"], SH)          # (2SH, 8SH)
    W = W.at[R_ENC_WIH:R_ENC_WIH + 2 * E, 0:8 * SH].set(enc_wih)
    W = W.at[R_ENC_WHH:R_ENC_WHH + 2 * SH, 0:8 * SH].set(enc_whh)

    # decoder layer 0: fold trg_embed into the input-gate weights, stack with W_hh
    emb_gate = jnp.dot(p["trg_emb"], p["dec_wih"][0])                       # (A, 4TH)
    dec_w0 = jnp.concatenate([emb_gate, p["dec_whh"][0]], axis=0)           # (A+TH, 4TH)
    dec_w1 = jnp.concatenate([p["dec_wih"][1], p["dec_whh"][1]], axis=0)    # (2TH, 4TH)
    W = W.at[R_DEC_W0:R_DEC_W0 + A + TH, 0:4 * TH].set(dec_w0)
    W = W.at[R_DEC_W1:R_DEC_W1 + 2 * TH, 0:4 * TH].set(dec_w1)

    # fused h_t projection: [dec_attention | fc_out-layer-1 h_t rows]
    w_ht = jnp.concatenate([p["w_da"], p["w1"][TH:2 * TH, :]], axis=1)      # (TH, AD+OD)
    W = W.at[R_HT_PROJ:R_HT_PROJ + TH, 0:AD + OD].set(w_ht)
    W = W.at[R_W1_CTX:R_W1_CTX + TH, 0:OD].set(p["w1"][0:TH, :])
    W = W.at[R_W1_TAG:R_W1_TAG + T, 0:OD].set(p["w1"][2 * TH:2 * TH + T, :])
    W = W.at[R_W2:R_W2 + OD, 0:A].set(p["w2"])
    W = W.at[R_W_SCALE:R_W_SCALE + 2 * SH, 0:TH].set(p["w_scale"])
    W = W.at[R_W_EA:R_W_EA + TH, 0:AD].set(p["w_ea"])

    # bias rows
    W = W.at[RB_ENC, 0:8 * SH].set(_interleave(p["enc_b_f"], p["enc_b_b"], SH)[0])
    W = W.at[RB_SCALE, 0:TH].set(p["b_scale"][0])
    W = W.at[RB_DEC0, 0:4 * TH].set(p["dec_b"][0])
    W = W.at[RB_DEC1, 0:4 * TH].set(p["dec_b"][1])
    W = W.at[RB_ATT, 0:AD].set(p["b_ea"][0])
    W = W.at[RB_ATT, AD:2 * AD].set(p["b_da"][0])
    W = W.at[RB_B1, 0:OD].set(p["b1"][0])
    W = W.at[RB_B2, 0:A].set(p["b2"][0])
    return W


if __name__ == "__main__":
    key = jax.random.PRNGKey(0)
    k_params, k_lemma, k_tag = jax.random.split(key, 3)
    params = init_params(k_params)
    w_slab = pack_params(params)

    lemmata = jax.random.randint(k_lemma, (B, L), 0, A)        # integer lemma ids, (B, L)
    tags = jax.random.uniform(k_tag, (B, T), jnp.float32)      # tag feature vectors, (B, T)

    # glue: source embedding lookup (static-index gather) stays in plain JAX
    src_emb = params["src_emb_table"][lemmata]                 # (B, L, E)

    out = babytransducer_forward(src_emb, tags, w_slab)
    out = jax.block_until_ready(out)
    assert out.shape == (B, OUT_LEN + 1, A)
    assert bool(jnp.all(jnp.isfinite(out)))
    print("KERNEL_OK")
</pallas_src>

<mosaic_0001>
module attributes {stable_mosaic.version = 11 : i64} {
  func.func @babytransducer_kernel(%arg0: memref<16x16xf32, #tpu.memory_space<vmem>>, %arg1: memref<2x8xf32, #tpu.memory_space<vmem>>, %arg2: memref<280x128xf32, #tpu.memory_space<vmem>>, %arg3: memref<2x288xf32, #tpu.memory_space<vmem>>) attributes {dimension_semantics = [], scalar_prefetch = 0 : i64, scratch_operands = 0 : i64, tpu.core_type = #tpu.core_type<tc>} {
    %c0 = arith.constant 0 : index
    %c0_0 = arith.constant 0 : index
    %0 = vector.load %arg2[%c0, %c0_0] : memref<280x128xf32, #tpu.memory_space<vmem>>, vector<16x128xf32>
    %c16 = arith.constant 16 : index
    %c0_1 = arith.constant 0 : index
    %1 = vector.load %arg2[%c16, %c0_1] : memref<280x128xf32, #tpu.memory_space<vmem>>, vector<16x128xf32>
    %c32 = arith.constant 32 : index
    %c0_2 = arith.constant 0 : index
    %2 = vector.load %arg2[%c32, %c0_2] : memref<280x128xf32, #tpu.memory_space<vmem>>, vector<32x128xf32>
    %c64 = arith.constant 64 : index
    %c0_3 = arith.constant 0 : index
    %3 = vector.load %arg2[%c64, %c0_3] : memref<280x128xf32, #tpu.memory_space<vmem>>, vector<48x64xf32>
    %c112 = arith.constant 112 : index
    %c0_4 = arith.constant 0 : index
    %4 = vector.load %arg2[%c112, %c0_4] : memref<280x128xf32, #tpu.memory_space<vmem>>, vector<32x64xf32>
    %c144 = arith.constant 144 : index
    %c0_5 = arith.constant 0 : index
    %5 = vector.load %arg2[%c144, %c0_5] : memref<280x128xf32, #tpu.memory_space<vmem>>, vector<16x56xf32>
    %c160 = arith.constant 160 : index
    %c0_6 = arith.constant 0 : index
    %6 = vector.load %arg2[%c160, %c0_6] : memref<280x128xf32, #tpu.memory_space<vmem>>, vector<16x40xf32>
    %c176 = arith.constant 176 : index
    %c0_7 = arith.constant 0 : index
    %7 = vector.load %arg2[%c176, %c0_7] : memref<280x128xf32, #tpu.memory_space<vmem>>, vector<8x40xf32>
    %c184 = arith.constant 184 : index
    %c0_8 = arith.constant 0 : index
    %8 = vector.load %arg2[%c184, %c0_8] : memref<280x128xf32, #tpu.memory_space<vmem>>, vector<40x32xf32>
    %c224 = arith.constant 224 : index
    %c0_9 = arith.constant 0 : index
    %9 = vector.load %arg2[%c224, %c0_9] : memref<280x128xf32, #tpu.memory_space<vmem>>, vector<16x16xf32>
    %c240 = arith.constant 240 : index
    %c0_10 = arith.constant 0 : index
    %10 = vector.load %arg2[%c240, %c0_10] : memref<280x128xf32, #tpu.memory_space<vmem>>, vector<16x16xf32>
    %c256 = arith.constant 256 : index
    %c0_11 = arith.constant 0 : index
    %11 = vector.load %arg2[%c256, %c0_11] : memref<280x128xf32, #tpu.memory_space<vmem>>, vector<16x16xf32>
    %c272 = arith.constant 272 : index
    %c0_12 = arith.constant 0 : index
    %12 = vector.load %arg2[%c272, %c0_12] : memref<280x128xf32, #tpu.memory_space<vmem>>, vector<1x128xf32>
    %c273 = arith.constant 273 : index
    %c0_13 = arith.constant 0 : index
    %13 = vector.load %arg2[%c273, %c0_13] : memref<280x128xf32, #tpu.memory_space<vmem>>, vector<1x16xf32>
    %c274 = arith.constant 274 : index
    %c0_14 = arith.constant 0 : index
    %14 = vector.load %arg2[%c274, %c0_14] : memref<280x128xf32, #tpu.memory_space<vmem>>, vector<1x64xf32>
    %c275 = arith.constant 275 : index
    %c0_15 = arith.constant 0 : index
    %15 = vector.load %arg2[%c275, %c0_15] : memref<280x128xf32, #tpu.memory_space<vmem>>, vector<1x64xf32>
    %c276 = arith.constant 276 : index
    %c0_16 = arith.constant 0 : index
    %16 = vector.load %arg2[%c276, %c0_16] : memref<280x128xf32, #tpu.memory_space<vmem>>, vector<1x16xf32>
    %c276_17 = arith.constant 276 : index
    %c16_18 = arith.constant 16 : index
    %17 = vector.load %arg2[%c276_17, %c16_18] : memref<280x128xf32, #tpu.memory_space<vmem>>, vector<1x16xf32>
    %c277 = arith.constant 277 : index
    %c0_19 = arith.constant 0 : index
    %18 = vector.load %arg2[%c277, %c0_19] : memref<280x128xf32, #tpu.memory_space<vmem>>, vector<1x40xf32>
    %c278 = arith.constant 278 : index
    %c0_20 = arith.constant 0 : index
    %19 = vector.load %arg2[%c278, %c0_20] : memref<280x128xf32, #tpu.memory_space<vmem>>, vector<1x32xf32>
    %c0_21 = arith.constant 0 : index
    %c0_22 = arith.constant 0 : index
    %20 = vector.load %arg1[%c0_21, %c0_22] : memref<2x8xf32, #tpu.memory_space<vmem>>, vector<2x8xf32>
    %c0_23 = arith.constant 0 : index
    %c0_24 = arith.constant 0 : index
    %21 = vector.load %arg0[%c0_23, %c0_24] : memref<16x16xf32, #tpu.memory_space<vmem>>, vector<16x16xf32>
    %cst = arith.constant dense<0.000000e+00> : vector<16x128xf32>
    %22 = tpu.matmul %21, %0, %cst {dimension_numbers = #tpu.dot_dimension_numbers<[1], [0], [0], [1], [0, 0, 1, 1], [], []>} : vector<16x16xf32>, vector<16x128xf32>, vector<16x128xf32> -> vector<16x128xf32>
    %cst_25 = arith.constant dense<0.000000e+00> : vector<16x128xf32>
    %23 = tpu.matmul %21, %1, %cst_25 {dimension_numbers = #tpu.dot_dimension_numbers<[1], [0], [0], [1], [0, 0, 1, 1], [], []>} : vector<16x16xf32>, vector<16x128xf32>, vector<16x128xf32> -> vector<16x128xf32>
    %24 = vector.extract_strided_slice %22 {offsets = [0, 0], sizes = [2, 128], strides = [1, 1]} : vector<16x128xf32> to vector<2x128xf32>
    %25 = vector.extract_strided_slice %23 {offsets = [14, 0], sizes = [2, 128], strides = [1, 1]} : vector<16x128xf32> to vector<2x128xf32>
    %26 = arith.addf %24, %25 : vector<2x128xf32>
    %27 = vector.broadcast %12 : vector<1x128xf32> to vector<2x128xf32>
    %28 = arith.addf %26, %27 : vector<2x128xf32>
    %29 = vector.extract_strided_slice %22 {offsets = [2, 0], sizes = [2, 128], strides = [1, 1]} : vector<16x128xf32> to vector<2x128xf32>
    %30 = vector.extract_strided_slice %23 {offsets = [12, 0], sizes = [2, 128], strides = [1, 1]} : vector<16x128xf32> to vector<2x128xf32>
    %31 = arith.addf %29, %30 : vector<2x128xf32>
    %32 = vector.broadcast %12 : vector<1x128xf32> to vector<2x128xf32>
    %33 = arith.addf %31, %32 : vector<2x128xf32>
    %34 = vector.extract_strided_slice %22 {offsets = [4, 0], sizes = [2, 128], strides = [1, 1]} : vector<16x128xf32> to vector<2x128xf32>
    %35 = vector.extract_strided_slice %23 {offsets = [10, 0], sizes = [2, 128], strides = [1, 1]} : vector<16x128xf32> to vector<2x128xf32>
    %36 = arith.addf %34, %35 : vector<2x128xf32>
    %37 = vector.broadcast %12 : vector<1x128xf32> to vector<2x128xf32>
    %38 = arith.addf %36, %37 : vector<2x128xf32>
    %39 = vector.extract_strided_slice %22 {offsets = [6, 0], sizes = [2, 128], strides = [1, 1]} : vector<16x128xf32> to vector<2x128xf32>
    %40 = vector.extract_strided_slice %23 {offsets = [8, 0], sizes = [2, 128], strides = [1, 1]} : vector<16x128xf32> to vector<2x128xf32>
    %41 = arith.addf %39, %40 : vector<2x128xf32>
    %42 = vector.broadcast %12 : vector<1x128xf32> to vector<2x128xf32>
    %43 = arith.addf %41, %42 : vector<2x128xf32>
    %44 = vector.extract_strided_slice %22 {offsets = [8, 0], sizes = [2, 128], strides = [1, 1]} : vector<16x128xf32> to vector<2x128xf32>
    %45 = vector.extract_strided_slice %23 {offsets = [6, 0], sizes = [2, 128], strides = [1, 1]} : vector<16x128xf32> to vector<2x128xf32>
    %46 = arith.addf %44, %45 : vector<2x128xf32>
    %47 = vector.broadcast %12 : vector<1x128xf32> to vector<2x128xf32>
    %48 = arith.addf %46, %47 : vector<2x128xf32>
    %49 = vector.extract_strided_slice %22 {offsets = [10, 0], sizes = [2, 128], strides = [1, 1]} : vector<16x128xf32> to vector<2x128xf32>
    %50 = vector.extract_strided_slice %23 {offsets = [4, 0], sizes = [2, 128], strides = [1, 1]} : vector<16x128xf32> to vector<2x128xf32>
    %51 = arith.addf %49, %50 : vector<2x128xf32>
    %52 = vector.broadcast %12 : vector<1x128xf32> to vector<2x128xf32>
    %53 = arith.addf %51, %52 : vector<2x128xf32>
    %54 = vector.extract_strided_slice %22 {offsets = [12, 0], sizes = [2, 128], strides = [1, 1]} : vector<16x128xf32> to vector<2x128xf32>
    %55 = vector.extract_strided_slice %23 {offsets = [2, 0], sizes = [2, 128], strides = [1, 1]} : vector<16x128xf32> to vector<2x128xf32>
    %56 = arith.addf %54, %55 : vector<2x128xf32>
    %57 = vector.broadcast %12 : vector<1x128xf32> to vector<2x128xf32>
    %58 = arith.addf %56, %57 : vector<2x128xf32>
    %59 = vector.extract_strided_slice %22 {offsets = [14, 0], sizes = [2, 128], strides = [1, 1]} : vector<16x128xf32> to vector<2x128xf32>
    %60 = vector.extract_strided_slice %23 {offsets = [0, 0], sizes = [2, 128], strides = [1, 1]} : vector<16x128xf32> to vector<2x128xf32>
    %61 = arith.addf %59, %60 : vector<2x128xf32>
    %62 = vector.broadcast %12 : vector<1x128xf32> to vector<2x128xf32>
    %63 = arith.addf %61, %62 : vector<2x128xf32>
    %cst_26 = arith.constant 0.000000e+00 : f32
    %64 = vector.broadcast %cst_26 : f32 to vector<2x32xf32>
    %cst_27 = arith.constant 0.000000e+00 : f32
    %65 = vector.broadcast %cst_27 : f32 to vector<2x32xf32>
    %cst_28 = arith.constant dense<0.000000e+00> : vector<2x128xf32>
    %66 = tpu.matmul %64, %2, %cst_28 {dimension_numbers = #tpu.dot_dimension_numbers<[1], [0], [0], [1], [0, 0, 1, 1], [], []>} : vector<2x32xf32>, vector<32x128xf32>, vector<2x128xf32> -> vector<2x128xf32>
    %67 = arith.addf %28, %66 : vector<2x128xf32>
    %68 = arith.negf %67 : vector<2x128xf32>
    %69 = math.exp %68 : vector<2x128xf32>
    %cst_29 = arith.constant 1.000000e+00 : f32
    %70 = vector.broadcast %cst_29 : f32 to vector<2x128xf32>
    %71 = arith.addf %70, %69 : vector<2x128xf32>
    %72 = arith.divf %70, %71 : vector<2x128xf32>
    %73 = math.tanh %67 : vector<2x128xf32>
    %74 = vector.extract_strided_slice %72 {offsets = [0, 32], sizes = [2, 32], strides = [1, 1]} : vector<2x128xf32> to vector<2x32xf32>
    %75 = arith.mulf %74, %65 : vector<2x32xf32>
    %76 = vector.extract_strided_slice %72 {offsets = [0, 0], sizes = [2, 32], strides = [1, 1]} : vector<2x128xf32> to vector<2x32xf32>
    %77 = vector.extract_strided_slice %73 {offsets = [0, 64], sizes = [2, 32], strides = [1, 1]} : vector<2x128xf32> to vector<2x32xf32>
    %78 = arith.mulf %76, %77 : vector<2x32xf32>
    %79 = arith.addf %75, %78 : vector<2x32xf32>
    %80 = vector.extract_strided_slice %72 {offsets = [0, 96], sizes = [2, 32], strides = [1, 1]} : vector<2x128xf32> to vector<2x32xf32>
    %81 = math.tanh %79 : vector<2x32xf32>
    %82 = arith.mulf %80, %81 : vector<2x32xf32>
    %83 = vector.extract_strided_slice %82 {offsets = [0, 0], sizes = [2, 16], strides = [1, 1]} : vector<2x32xf32> to vector<2x16xf32>
    %84 = vector.extract_strided_slice %82 {offsets = [0, 16], sizes = [2, 16], strides = [1, 1]} : vector<2x32xf32> to vector<2x16xf32>
    %cst_30 = arith.constant dense<0.000000e+00> : vector<2x128xf32>
    %85 = tpu.matmul %82, %2, %cst_30 {dimension_numbers = #tpu.dot_dimension_numbers<[1], [0], [0], [1], [0, 0, 1, 1], [], []>} : vector<2x32xf32>, vector<32x128xf32>, vector<2x128xf32> -> vector<2x128xf32>
    %86 = arith.addf %33, %85 : vector<2x128xf32>
    %87 = arith.negf %86 : vector<2x128xf32>
    %88 = math.exp %87 : vector<2x128xf32>
    %cst_31 = arith.constant 1.000000e+00 : f32
    %89 = vector.broadcast %cst_31 : f32 to vector<2x128xf32>
    %90 = arith.addf %89, %88 : vector<2x128xf32>
    %91 = arith.divf %89, %90 : vector<2x128xf32>
    %92 = math.tanh %86 : vector<2x128xf32>
    %93 = vector.extract_strided_slice %91 {offsets = [0, 32], sizes = [2, 32], strides = [1, 1]} : vector<2x128xf32> to vector<2x32xf32>
    %94 = arith.mulf %93, %79 : vector<2x32xf32>
    %95 = vector.extract_strided_slice %91 {offsets = [0, 0], sizes = [2, 32], strides = [1, 1]} : vector<2x128xf32> to vector<2x32xf32>
    %96 = vector.extract_strided_slice %92 {offsets = [0, 64], sizes = [2, 32], strides = [1, 1]} : vector<2x128xf32> to vector<2x32xf32>
    %97 = arith.mulf %95, %96 : vector<2x32xf32>
    %98 = arith.addf %94, %97 : vector<2x32xf32>
    %99 = vector.extract_strided_slice %91 {offsets = [0, 96], sizes = [2, 32], strides = [1, 1]} : vector<2x128xf32> to vector<2x32xf32>
    %100 = math.tanh %98 : vector<2x32xf32>
    %101 = arith.mulf %99, %100 : vector<2x32xf32>
    %102 = vector.extract_strided_slice %101 {offsets = [0, 0], sizes = [2, 16], strides = [1, 1]} : vector<2x32xf32> to vector<2x16xf32>
    %103 = vector.extract_strided_slice %101 {offsets = [0, 16], sizes = [2, 16], strides = [1, 1]} : vector<2x32xf32> to vector<2x16xf32>
    %cst_32 = arith.constant dense<0.000000e+00> : vector<2x128xf32>
    %104 = tpu.matmul %101, %2, %cst_32 {dimension_numbers = #tpu.dot_dimension_numbers<[1], [0], [0], [1], [0, 0, 1, 1], [], []>} : vector<2x32xf32>, vector<32x128xf32>, vector<2x128xf32> -> vector<2x128xf32>
    %105 = arith.addf %38, %104 : vector<2x128xf32>
    %106 = arith.negf %105 : vector<2x128xf32>
    %107 = math.exp %106 : vector<2x128xf32>
    %cst_33 = arith.constant 1.000000e+00 : f32
    %108 = vector.broadcast %cst_33 : f32 to vector<2x128xf32>
    %109 = arith.addf %108, %107 : vector<2x128xf32>
    %110 = arith.divf %108, %109 : vector<2x128xf32>
    %111 = math.tanh %105 : vector<2x128xf32>
    %112 = vector.extract_strided_slice %110 {offsets = [0, 32], sizes = [2, 32], strides = [1, 1]} : vector<2x128xf32> to vector<2x32xf32>
    %113 = arith.mulf %112, %98 : vector<2x32xf32>
    %114 = vector.extract_strided_slice %110 {offsets = [0, 0], sizes = [2, 32], strides = [1, 1]} : vector<2x128xf32> to vector<2x32xf32>
    %115 = vector.extract_strided_slice %111 {offsets = [0, 64], sizes = [2, 32], strides = [1, 1]} : vector<2x128xf32> to vector<2x32xf32>
    %116 = arith.mulf %114, %115 : vector<2x32xf32>
    %117 = arith.addf %113, %116 : vector<2x32xf32>
    %118 = vector.extract_strided_slice %110 {offsets = [0, 96], sizes = [2, 32], strides = [1, 1]} : vector<2x128xf32> to vector<2x32xf32>
    %119 = math.tanh %117 : vector<2x32xf32>
    %120 = arith.mulf %118, %119 : vector<2x32xf32>
    %121 = vector.extract_strided_slice %120 {offsets = [0, 0], sizes = [2, 16], strides = [1, 1]} : vector<2x32xf32> to vector<2x16xf32>
    %122 = vector.extract_strided_slice %120 {offsets = [0, 16], sizes = [2, 16], strides = [1, 1]} : vector<2x32xf32> to vector<2x16xf32>
    %cst_34 = arith.constant dense<0.000000e+00> : vector<2x128xf32>
    %123 = tpu.matmul %120, %2, %cst_34 {dimension_numbers = #tpu.dot_dimension_numbers<[1], [0], [0], [1], [0, 0, 1, 1], [], []>} : vector<2x32xf32>, vector<32x128xf32>, vector<2x128xf32> -> vector<2x128xf32>
    %124 = arith.addf %43, %123 : vector<2x128xf32>
    %125 = arith.negf %124 : vector<2x128xf32>
    %126 = math.exp %125 : vector<2x128xf32>
    %cst_35 = arith.constant 1.000000e+00 : f32
    %127 = vector.broadcast %cst_35 : f32 to vector<2x128xf32>
    %128 = arith.addf %127, %126 : vector<2x128xf32>
    %129 = arith.divf %127, %128 : vector<2x128xf32>
    %130 = math.tanh %124 : vector<2x128xf32>
    %131 = vector.extract_strided_slice %129 {offsets = [0, 32], sizes = [2, 32], strides = [1, 1]} : vector<2x128xf32> to vector<2x32xf32>
    %132 = arith.mulf %131, %117 : vector<2x32xf32>
    %133 = vector.extract_strided_slice %129 {offsets = [0, 0], sizes = [2, 32], strides = [1, 1]} : vector<2x128xf32> to vector<2x32xf32>
    %134 = vector.extract_strided_slice %130 {offsets = [0, 64], sizes = [2, 32], strides = [1, 1]} : vector<2x128xf32> to vector<2x32xf32>
    %135 = arith.mulf %133, %134 : vector<2x32xf32>
    %136 = arith.addf %132, %135 : vector<2x32xf32>
    %137 = vector.extract_strided_slice %129 {offsets = [0, 96], sizes = [2, 32], strides = [1, 1]} : vector<2x128xf32> to vector<2x32xf32>
    %138 = math.tanh %136 : vector<2x32xf32>
    %139 = arith.mulf %137, %138 : vector<2x32xf32>
    %140 = vector.extract_strided_slice %139 {offsets = [0, 0], sizes = [2, 16], strides = [1, 1]} : vector<2x32xf32> to vector<2x16xf32>
    %141 = vector.extract_strided_slice %139 {offsets = [0, 16], sizes = [2, 16], strides = [1, 1]} : vector<2x32xf32> to vector<2x16xf32>
    %cst_36 = arith.constant dense<0.000000e+00> : vector<2x128xf32>
    %142 = tpu.matmul %139, %2, %cst_36 {dimension_numbers = #tpu.dot_dimension_numbers<[1], [0], [0], [1], [0, 0, 1, 1], [], []>} : vector<2x32xf32>, vector<32x128xf32>, vector<2x128xf32> -> vector<2x128xf32>
    %143 = arith.addf %48, %142 : vector<2x128xf32>
    %144 = arith.negf %143 : vector<2x128xf32>
    %145 = math.exp %144 : vector<2x128xf32>
    %cst_37 = arith.constant 1.000000e+00 : f32
    %146 = vector.broadcast %cst_37 : f32 to vector<2x128xf32>
    %147 = arith.addf %146, %145 : vector<2x128xf32>
    %148 = arith.divf %146, %147 : vector<2x128xf32>
    %149 = math.tanh %143 : vector<2x128xf32>
    %150 = vector.extract_strided_slice %148 {offsets = [0, 32], sizes = [2, 32], strides = [1, 1]} : vector<2x128xf32> to vector<2x32xf32>
    %151 = arith.mulf %150, %136 : vector<2x32xf32>
    %152 = vector.extract_strided_slice %148 {offsets = [0, 0], sizes = [2, 32], strides = [1, 1]} : vector<2x128xf32> to vector<2x32xf32>
    %153 = vector.extract_strided_slice %149 {offsets = [0, 64], sizes = [2, 32], strides = [1, 1]} : vector<2x128xf32> to vector<2x32xf32>
    %154 = arith.mulf %152, %153 : vector<2x32xf32>
    %155 = arith.addf %151, %154 : vector<2x32xf32>
    %156 = vector.extract_strided_slice %148 {offsets = [0, 96], sizes = [2, 32], strides = [1, 1]} : vector<2x128xf32> to vector<2x32xf32>
    %157 = math.tanh %155 : vector<2x32xf32>
    %158 = arith.mulf %156, %157 : vector<2x32xf32>
    %159 = vector.extract_strided_slice %158 {offsets = [0, 0], sizes = [2, 16], strides = [1, 1]} : vector<2x32xf32> to vector<2x16xf32>
    %160 = vector.extract_strided_slice %158 {offsets = [0, 16], sizes = [2, 16], strides = [1, 1]} : vector<2x32xf32> to vector<2x16xf32>
    %cst_38 = arith.constant dense<0.000000e+00> : vector<2x128xf32>
    %161 = tpu.matmul %158, %2, %cst_38 {dimension_numbers = #tpu.dot_dimension_numbers<[1], [0], [0], [1], [0, 0, 1, 1], [], []>} : vector<2x32xf32>, vector<32x128xf32>, vector<2x128xf32> -> vector<2x128xf32>
    %162 = arith.addf %53, %161 : vector<2x128xf32>
    %163 = arith.negf %162 : vector<2x128xf32>
    %164 = math.exp %163 : vector<2x128xf32>
    %cst_39 = arith.constant 1.000000e+00 : f32
    %165 = vector.broadcast %cst_39 : f32 to vector<2x128xf32>
    %166 = arith.addf %165, %164 : vector<2x128xf32>
    %167 = arith.divf %165, %166 : vector<2x128xf32>
    %168 = math.tanh %162 : vector<2x128xf32>
    %169 = vector.extract_strided_slice %167 {offsets = [0, 32], sizes = [2, 32], strides = [1, 1]} : vector<2x128xf32> to vector<2x32xf32>
    %170 = arith.mulf %169, %155 : vector<2x32xf32>
    %171 = vector.extract_strided_slice %167 {offsets = [0, 0], sizes = [2, 32], strides = [1, 1]} : vector<2x128xf32> to vector<2x32xf32>
    %172 = vector.extract_strided_slice %168 {offsets = [0, 64], sizes = [2, 32], strides = [1, 1]} : vector<2x128xf32> to vector<2x32xf32>
    %173 = arith.mulf %171, %172 : vector<2x32xf32>
    %174 = arith.addf %170, %173 : vector<2x32xf32>
    %175 = vector.extract_strided_slice %167 {offsets = [0, 96], sizes = [2, 32], strides = [1, 1]} : vector<2x128xf32> to vector<2x32xf32>
    %176 = math.tanh %174 : vector<2x32xf32>
    %177 = arith.mulf %175, %176 : vector<2x32xf32>
    %178 = vector.extract_strided_slice %177 {offsets = [0, 0], sizes = [2, 16], strides = [1, 1]} : vector<2x32xf32> to vector<2x16xf32>
    %179 = vector.extract_strided_slice %177 {offsets = [0, 16], sizes = [2, 16], strides = [1, 1]} : vector<2x32xf32> to vector<2x16xf32>
    %cst_40 = arith.constant dense<0.000000e+00> : vector<2x128xf32>
    %180 = tpu.matmul %177, %2, %cst_40 {dimension_numbers = #tpu.dot_dimension_numbers<[1], [0], [0], [1], [0, 0, 1, 1], [], []>} : vector<2x32xf32>, vector<32x128xf32>, vector<2x128xf32> -> vector<2x128xf32>
    %181 = arith.addf %58, %180 : vector<2x128xf32>
    %182 = arith.negf %181 : vector<2x128xf32>
    %183 = math.exp %182 : vector<2x128xf32>
    %cst_41 = arith.constant 1.000000e+00 : f32
    %184 = vector.broadcast %cst_41 : f32 to vector<2x128xf32>
    %185 = arith.addf %184, %183 : vector<2x128xf32>
    %186 = arith.divf %184, %185 : vector<2x128xf32>
    %187 = math.tanh %181 : vector<2x128xf32>
    %188 = vector.extract_strided_slice %186 {offsets = [0, 32], sizes = [2, 32], strides = [1, 1]} : vector<2x128xf32> to vector<2x32xf32>
    %189 = arith.mulf %188, %174 : vector<2x32xf32>
    %190 = vector.extract_strided_slice %186 {offsets = [0, 0], sizes = [2, 32], strides = [1, 1]} : vector<2x128xf32> to vector<2x32xf32>
    %191 = vector.extract_strided_slice %187 {offsets = [0, 64], sizes = [2, 32], strides = [1, 1]} : vector<2x128xf32> to vector<2x32xf32>
    %192 = arith.mulf %190, %191 : vector<2x32xf32>
    %193 = arith.addf %189, %192 : vector<2x32xf32>
    %194 = vector.extract_strided_slice %186 {offsets = [0, 96], sizes = [2, 32], strides = [1, 1]} : vector<2x128xf32> to vector<2x32xf32>
    %195 = math.tanh %193 : vector<2x32xf32>
    %196 = arith.mulf %194, %195 : vector<2x32xf32>
    %197 = vector.extract_strided_slice %196 {offsets = [0, 0], sizes = [2, 16], strides = [1, 1]} : vector<2x32xf32> to vector<2x16xf32>
    %198 = vector.extract_strided_slice %196 {offsets = [0, 16], sizes = [2, 16], strides = [1, 1]} : vector<2x32xf32> to vector<2x16xf32>
    %cst_42 = arith.constant dense<0.000000e+00> : vector<2x128xf32>
    %199 = tpu.matmul %196, %2, %cst_42 {dimension_numbers = #tpu.dot_dimension_numbers<[1], [0], [0], [1], [0, 0, 1, 1], [], []>} : vector<2x32xf32>, vector<32x128xf32>, vector<2x128xf32> -> vector<2x128xf32>
    %200 = arith.addf %63, %199 : vector<2x128xf32>
    %201 = arith.negf %200 : vector<2x128xf32>
    %202 = math.exp %201 : vector<2x128xf32>
    %cst_43 = arith.constant 1.000000e+00 : f32
    %203 = vector.broadcast %cst_43 : f32 to vector<2x128xf32>
    %204 = arith.addf %203, %202 : vector<2x128xf32>
    %205 = arith.divf %203, %204 : vector<2x128xf32>
    %206 = math.tanh %200 : vector<2x128xf32>
    %207 = vector.extract_strided_slice %205 {offsets = [0, 32], sizes = [2, 32], strides = [1, 1]} : vector<2x128xf32> to vector<2x32xf32>
    %208 = arith.mulf %207, %193 : vector<2x32xf32>
    %209 = vector.extract_strided_slice %205 {offsets = [0, 0], sizes = [2, 32], strides = [1, 1]} : vector<2x128xf32> to vector<2x32xf32>
    %210 = vector.extract_strided_slice %206 {offsets = [0, 64], sizes = [2, 32], strides = [1, 1]} : vector<2x128xf32> to vector<2x32xf32>
    %211 = arith.mulf %209, %210 : vector<2x32xf32>
    %212 = arith.addf %208, %211 : vector<2x32xf32>
    %213 = vector.extract_strided_slice %205 {offsets = [0, 96], sizes = [2, 32], strides = [1, 1]} : vector<2x128xf32> to vector<2x32xf32>
    %214 = math.tanh %212 : vector<2x32xf32>
    %215 = arith.mulf %213, %214 : vector<2x32xf32>
    %216 = vector.extract_strided_slice %215 {offsets = [0, 0], sizes = [2, 16], strides = [1, 1]} : vector<2x32xf32> to vector<2x16xf32>
    %217 = vector.extract_strided_slice %215 {offsets = [0, 16], sizes = [2, 16], strides = [1, 1]} : vector<2x32xf32> to vector<2x16xf32>
    %218 = tpu.concatenate %83, %102, %121, %140, %159, %178, %197, %216 in 0 : vector<2x16xf32>, vector<2x16xf32>, vector<2x16xf32>, vector<2x16xf32>, vector<2x16xf32>, vector<2x16xf32>, vector<2x16xf32>, vector<2x16xf32> -> vector<16x16xf32>
    %219 = tpu.concatenate %217, %198, %179, %160, %141, %122, %103, %84 in 0 : vector<2x16xf32>, vector<2x16xf32>, vector<2x16xf32>, vector<2x16xf32>, vector<2x16xf32>, vector<2x16xf32>, vector<2x16xf32>, vector<2x16xf32> -> vector<16x16xf32>
    %cst_44 = arith.constant dense<0.000000e+00> : vector<16x16xf32>
    %220 = tpu.matmul %218, %9, %cst_44 {dimension_numbers = #tpu.dot_dimension_numbers<[1], [0], [0], [1], [0, 0, 1, 1], [], []>} : vector<16x16xf32>, vector<16x16xf32>, vector<16x16xf32> -> vector<16x16xf32>
    %cst_45 = arith.constant dense<0.000000e+00> : vector<16x16xf32>
    %221 = tpu.matmul %219, %10, %cst_45 {dimension_numbers = #tpu.dot_dimension_numbers<[1], [0], [0], [1], [0, 0, 1, 1], [], []>} : vector<16x16xf32>, vector<16x16xf32>, vector<16x16xf32> -> vector<16x16xf32>
    %222 = arith.addf %220, %221 : vector<16x16xf32>
    %223 = vector.broadcast %13 : vector<1x16xf32> to vector<16x16xf32>
    %224 = arith.addf %222, %223 : vector<16x16xf32>
    %cst_46 = arith.constant dense<0.000000e+00> : vector<16x16xf32>
    %225 = tpu.matmul %224, %11, %cst_46 {dimension_numbers = #tpu.dot_dimension_numbers<[1], [0], [0], [1], [0, 0, 1, 1], [], []>} : vector<16x16xf32>, vector<16x16xf32>, vector<16x16xf32> -> vector<16x16xf32>
    %226 = vector.broadcast %16 : vector<1x16xf32> to vector<16x16xf32>
    %227 = arith.addf %225, %226 : vector<16x16xf32>
    %cst_47 = arith.constant 0.000000e+00 : f32
    %228 = vector.broadcast %cst_47 : f32 to vector<2x16x16xf32>
    %229 = vector.extract_strided_slice %227 {offsets = [0, 0], sizes = [2, 16], strides = [1, 1]} : vector<16x16xf32> to vector<2x16xf32>
    %230 = vector.extract_strided_slice %224 {offsets = [0, 0], sizes = [2, 16], strides = [1, 1]} : vector<16x16xf32> to vector<2x16xf32>
    %231 = vector.shape_cast %229 : vector<2x16xf32> to vector<2x16x1xf32>
    %232 = vector.shape_cast %230 : vector<2x16xf32> to vector<2x1x16xf32>
    %233 = vector.broadcast %231 : vector<2x16x1xf32> to vector<2x16x16xf32>
    %234 = vector.broadcast %232 : vector<2x1x16xf32> to vector<2x16x16xf32>
    %235 = arith.mulf %233, %234 : vector<2x16x16xf32>
    %236 = arith.addf %228, %235 : vector<2x16x16xf32>
    %237 = vector.extract_strided_slice %227 {offsets = [2, 0], sizes = [2, 16], strides = [1, 1]} : vector<16x16xf32> to vector<2x16xf32>
    %238 = vector.extract_strided_slice %224 {offsets = [2, 0], sizes = [2, 16], strides = [1, 1]} : vector<16x16xf32> to vector<2x16xf32>
    %239 = vector.shape_cast %237 : vector<2x16xf32> to vector<2x16x1xf32>
    %240 = vector.shape_cast %238 : vector<2x16xf32> to vector<2x1x16xf32>
    %241 = vector.broadcast %239 : vector<2x16x1xf32> to vector<2x16x16xf32>
    %242 = vector.broadcast %240 : vector<2x1x16xf32> to vector<2x16x16xf32>
    %243 = arith.mulf %241, %242 : vector<2x16x16xf32>
    %244 = arith.addf %236, %243 : vector<2x16x16xf32>
    %245 = vector.extract_strided_slice %227 {offsets = [4, 0], sizes = [2, 16], strides = [1, 1]} : vector<16x16xf32> to vector<2x16xf32>
    %246 = vector.extract_strided_slice %224 {offsets = [4, 0], sizes = [2, 16], strides = [1, 1]} : vector<16x16xf32> to vector<2x16xf32>
    %247 = vector.shape_cast %245 : vector<2x16xf32> to vector<2x16x1xf32>
    %248 = vector.shape_cast %246 : vector<2x16xf32> to vector<2x1x16xf32>
    %249 = vector.broadcast %247 : vector<2x16x1xf32> to vector<2x16x16xf32>
    %250 = vector.broadcast %248 : vector<2x1x16xf32> to vector<2x16x16xf32>
    %251 = arith.mulf %249, %250 : vector<2x16x16xf32>
    %252 = arith.addf %244, %251 : vector<2x16x16xf32>
    %253 = vector.extract_strided_slice %227 {offsets = [6, 0], sizes = [2, 16], strides = [1, 1]} : vector<16x16xf32> to vector<2x16xf32>
    %254 = vector.extract_strided_slice %224 {offsets = [6, 0], sizes = [2, 16], strides = [1, 1]} : vector<16x16xf32> to vector<2x16xf32>
    %255 = vector.shape_cast %253 : vector<2x16xf32> to vector<2x16x1xf32>
    %256 = vector.shape_cast %254 : vector<2x16xf32> to vector<2x1x16xf32>
    %257 = vector.broadcast %255 : vector<2x16x1xf32> to vector<2x16x16xf32>
    %258 = vector.broadcast %256 : vector<2x1x16xf32> to vector<2x16x16xf32>
    %259 = arith.mulf %257, %258 : vector<2x16x16xf32>
    %260 = arith.addf %252, %259 : vector<2x16x16xf32>
    %261 = vector.extract_strided_slice %227 {offsets = [8, 0], sizes = [2, 16], strides = [1, 1]} : vector<16x16xf32> to vector<2x16xf32>
    %262 = vector.extract_strided_slice %224 {offsets = [8, 0], sizes = [2, 16], strides = [1, 1]} : vector<16x16xf32> to vector<2x16xf32>
    %263 = vector.shape_cast %261 : vector<2x16xf32> to vector<2x16x1xf32>
    %264 = vector.shape_cast %262 : vector<2x16xf32> to vector<2x1x16xf32>
    %265 = vector.broadcast %263 : vector<2x16x1xf32> to vector<2x16x16xf32>
    %266 = vector.broadcast %264 : vector<2x1x16xf32> to vector<2x16x16xf32>
    %267 = arith.mulf %265, %266 : vector<2x16x16xf32>
    %268 = arith.addf %260, %267 : vector<2x16x16xf32>
    %269 = vector.extract_strided_slice %227 {offsets = [10, 0], sizes = [2, 16], strides = [1, 1]} : vector<16x16xf32> to vector<2x16xf32>
    %270 = vector.extract_strided_slice %224 {offsets = [10, 0], sizes = [2, 16], strides = [1, 1]} : vector<16x16xf32> to vector<2x16xf32>
    %271 = vector.shape_cast %269 : vector<2x16xf32> to vector<2x16x1xf32>
    %272 = vector.shape_cast %270 : vector<2x16xf32> to vector<2x1x16xf32>
    %273 = vector.broadcast %271 : vector<2x16x1xf32> to vector<2x16x16xf32>
    %274 = vector.broadcast %272 : vector<2x1x16xf32> to vector<2x16x16xf32>
    %275 = arith.mulf %273, %274 : vector<2x16x16xf32>
    %276 = arith.addf %268, %275 : vector<2x16x16xf32>
    %277 = vector.extract_strided_slice %227 {offsets = [12, 0], sizes = [2, 16], strides = [1, 1]} : vector<16x16xf32> to vector<2x16xf32>
    %278 = vector.extract_strided_slice %224 {offsets = [12, 0], sizes = [2, 16], strides = [1, 1]} : vector<16x16xf32> to vector<2x16xf32>
    %279 = vector.shape_cast %277 : vector<2x16xf32> to vector<2x16x1xf32>
    %280 = vector.shape_cast %278 : vector<2x16xf32> to vector<2x1x16xf32>
    %281 = vector.broadcast %279 : vector<2x16x1xf32> to vector<2x16x16xf32>
    %282 = vector.broadcast %280 : vector<2x1x16xf32> to vector<2x16x16xf32>
    %283 = arith.mulf %281, %282 : vector<2x16x16xf32>
    %284 = arith.addf %276, %283 : vector<2x16x16xf32>
    %285 = vector.extract_strided_slice %227 {offsets = [14, 0], sizes = [2, 16], strides = [1, 1]} : vector<16x16xf32> to vector<2x16xf32>
    %286 = vector.extract_strided_slice %224 {offsets = [14, 0], sizes = [2, 16], strides = [1, 1]} : vector<16x16xf32> to vector<2x16xf32>
    %287 = vector.shape_cast %285 : vector<2x16xf32> to vector<2x16x1xf32>
    %288 = vector.shape_cast %286 : vector<2x16xf32> to vector<2x1x16xf32>
    %289 = vector.broadcast %287 : vector<2x16x1xf32> to vector<2x16x16xf32>
    %290 = vector.broadcast %288 : vector<2x1x16xf32> to vector<2x16x16xf32>
    %291 = arith.mulf %289, %290 : vector<2x16x16xf32>
    %292 = arith.addf %284, %291 : vector<2x16x16xf32>
    %cst_48 = arith.constant dense<0.000000e+00> : vector<2x40xf32>
    %293 = tpu.matmul %20, %7, %cst_48 {dimension_numbers = #tpu.dot_dimension_numbers<[1], [0], [0], [1], [0, 0, 1, 1], [], []>} : vector<2x8xf32>, vector<8x40xf32>, vector<2x40xf32> -> vector<2x40xf32>
    %294 = vector.broadcast %18 : vector<1x40xf32> to vector<2x40xf32>
    %295 = arith.addf %293, %294 : vector<2x40xf32>
    %296 = tpu.iota {dimensions = array<i32: 1>} : vector<2x32xi32>
    %c1_i32 = arith.constant 1 : i32
    %297 = vector.broadcast %c1_i32 : i32 to vector<2x32xi32>
    %298 = arith.cmpi eq, %296, %297 : vector<2x32xi32>
    %299 = arith.extui %298 : vector<2x32xi1> to vector<2x32xi32>
    %300 = arith.sitofp %299 : vector<2x32xi32> to vector<2x32xf32>
    %cst_49 = arith.constant 0.000000e+00 : f32
    %301 = vector.broadcast %cst_49 : f32 to vector<2x16xf32>
    %cst_50 = arith.constant 0.000000e+00 : f32
    %302 = vector.broadcast %cst_50 : f32 to vector<2x16xf32>
    %cst_51 = arith.constant 0.000000e+00 : f32
    %303 = vector.broadcast %cst_51 : f32 to vector<2x16xf32>
    %cst_52 = arith.constant 0.000000e+00 : f32
    %304 = vector.broadcast %cst_52 : f32 to vector<2x16xf32>
    %cst_53 = arith.constant dense<0xFF800000> : vector<2xf32>
    %305 = vector.multi_reduction <maximumf>, %300, %cst_53 [1] : vector<2x32xf32> to vector<2xf32>
    %306 = vector.shape_cast %305 : vector<2xf32> to vector<2x1xf32>
    %307 = vector.broadcast %306 : vector<2x1xf32> to vector<2x32xf32>
    %308 = arith.cmpf oeq, %300, %307 : vector<2x32xf32>
    %c32_i32 = arith.constant 32 : i32
    %309 = vector.broadcast %c32_i32 : i32 to vector<2x32xi32>
    %310 = arith.select %308, %296, %309 : vector<2x32xi1>, vector<2x32xi32>
    %cst_54 = arith.constant dense<2147483647> : vector<2xi32>
    %311 = vector.multi_reduction <minsi>, %310, %cst_54 [1] : vector<2x32xi32> to vector<2xi32>
    %312 = vector.shape_cast %311 : vector<2xi32> to vector<2x1xi32>
    %313 = vector.broadcast %312 : vector<2x1xi32> to vector<2x32xi32>
    %314 = arith.cmpi eq, %296, %313 : vector<2x32xi32>
    %315 = arith.extui %314 : vector<2x32xi1> to vector<2x32xi32>
    %316 = arith.sitofp %315 : vector<2x32xi32> to vector<2x32xf32>
    %317 = tpu.concatenate %316, %301 in 1 : vector<2x32xf32>, vector<2x16xf32> -> vector<2x48xf32>
    %cst_55 = arith.constant dense<0.000000e+00> : vector<2x64xf32>
    %318 = tpu.matmul %317, %3, %cst_55 {dimension_numbers = #tpu.dot_dimension_numbers<[1], [0], [0], [1], [0, 0, 1, 1], [], []>} : vector<2x48xf32>, vector<48x64xf32>, vector<2x64xf32> -> vector<2x64xf32>
    %319 = vector.broadcast %14 : vector<1x64xf32> to vector<2x64xf32>
    %320 = arith.addf %318, %319 : vector<2x64xf32>
    %321 = arith.negf %320 : vector<2x64xf32>
    %322 = math.exp %321 : vector<2x64xf32>
    %cst_56 = arith.constant 1.000000e+00 : f32
    %323 = vector.broadcast %cst_56 : f32 to vector<2x64xf32>
    %324 = arith.addf %323, %322 : vector<2x64xf32>
    %325 = arith.divf %323, %324 : vector<2x64xf32>
    %326 = math.tanh %320 : vector<2x64xf32>
    %327 = vector.extract_strided_slice %325 {offsets = [0, 16], sizes = [2, 16], strides = [1, 1]} : vector<2x64xf32> to vector<2x16xf32>
    %328 = arith.mulf %327, %303 : vector<2x16xf32>
    %329 = vector.extract_strided_slice %325 {offsets = [0, 0], sizes = [2, 16], strides = [1, 1]} : vector<2x64xf32> to vector<2x16xf32>
    %330 = vector.extract_strided_slice %326 {offsets = [0, 32], sizes = [2, 16], strides = [1, 1]} : vector<2x64xf32> to vector<2x16xf32>
    %331 = arith.mulf %329, %330 : vector<2x16xf32>
    %332 = arith.addf %328, %331 : vector<2x16xf32>
    %333 = vector.extract_strided_slice %325 {offsets = [0, 48], sizes = [2, 16], strides = [1, 1]} : vector<2x64xf32> to vector<2x16xf32>
    %334 = math.tanh %332 : vector<2x16xf32>
    %335 = arith.mulf %333, %334 : vector<2x16xf32>
    %336 = tpu.concatenate %335, %302 in 1 : vector<2x16xf32>, vector<2x16xf32> -> vector<2x32xf32>
    %cst_57 = arith.constant dense<0.000000e+00> : vector<2x64xf32>
    %337 = tpu.matmul %336, %4, %cst_57 {dimension_numbers = #tpu.dot_dimension_numbers<[1], [0], [0], [1], [0, 0, 1, 1], [], []>} : vector<2x32xf32>, vector<32x64xf32>, vector<2x64xf32> -> vector<2x64xf32>
    %338 = vector.broadcast %15 : vector<1x64xf32> to vector<2x64xf32>
    %339 = arith.addf %337, %338 : vector<2x64xf32>
    %340 = arith.negf %339 : vector<2x64xf32>
    %341 = math.exp %340 : vector<2x64xf32>
    %cst_58 = arith.constant 1.000000e+00 : f32
    %342 = vector.broadcast %cst_58 : f32 to vector<2x64xf32>
    %343 = arith.addf %342, %341 : vector<2x64xf32>
    %344 = arith.divf %342, %343 : vector<2x64xf32>
    %345 = math.tanh %339 : vector<2x64xf32>
    %346 = vector.extract_strided_slice %344 {offsets = [0, 16], sizes = [2, 16], strides = [1, 1]} : vector<2x64xf32> to vector<2x16xf32>
    %347 = arith.mulf %346, %304 : vector<2x16xf32>
    %348 = vector.extract_strided_slice %344 {offsets = [0, 0], sizes = [2, 16], strides = [1, 1]} : vector<2x64xf32> to vector<2x16xf32>
    %349 = vector.extract_strided_slice %345 {offsets = [0, 32], sizes = [2, 16], strides = [1, 1]} : vector<2x64xf32> to vector<2x16xf32>
    %350 = arith.mulf %348, %349 : vector<2x16xf32>
    %351 = arith.addf %347, %350 : vector<2x16xf32>
    %352 = vector.extract_strided_slice %344 {offsets = [0, 48], sizes = [2, 16], strides = [1, 1]} : vector<2x64xf32> to vector<2x16xf32>
    %353 = math.tanh %351 : vector<2x16xf32>
    %354 = arith.mulf %352, %353 : vector<2x16xf32>
    %cst_59 = arith.constant dense<0.000000e+00> : vector<2x56xf32>
    %355 = tpu.matmul %354, %5, %cst_59 {dimension_numbers = #tpu.dot_dimension_numbers<[1], [0], [0], [1], [0, 0, 1, 1], [], []>} : vector<2x16xf32>, vector<16x56xf32>, vector<2x56xf32> -> vector<2x56xf32>
    %356 = vector.extract_strided_slice %355 {offsets = [0, 0], sizes = [2, 16], strides = [1, 1]} : vector<2x56xf32> to vector<2x16xf32>
    %357 = vector.broadcast %17 : vector<1x16xf32> to vector<2x16xf32>
    %358 = arith.addf %356, %357 : vector<2x16xf32>
    %359 = vector.shape_cast %358 : vector<2x16xf32> to vector<2x1x16xf32>
    "tpu.trace_start"() <{level = 10 : i32, message = "bqa,bah->bqh"}> : () -> ()
    %cst_60 = arith.constant dense<0.000000e+00> : vector<2x1x16xf32>
    %360 = tpu.matmul %359, %292, %cst_60 {dimension_numbers = #tpu.dot_dimension_numbers<[2], [1], [1], [2], [0, 0, 0, 1, 1, 2], [0], [0]>} : vector<2x1x16xf32>, vector<2x16x16xf32>, vector<2x1x16xf32> -> vector<2x1x16xf32>
    "tpu.trace_stop"() : () -> ()
    %361 = vector.shape_cast %360 : vector<2x1x16xf32> to vector<2x16xf32>
    %cst_61 = arith.constant dense<0.000000e+00> : vector<2x40xf32>
    %362 = tpu.matmul %361, %6, %cst_61 {dimension_numbers = #tpu.dot_dimension_numbers<[1], [0], [0], [1], [0, 0, 1, 1], [], []>} : vector<2x16xf32>, vector<16x40xf32>, vector<2x40xf32> -> vector<2x40xf32>
    %363 = vector.extract_strided_slice %355 {offsets = [0, 16], sizes = [2, 40], strides = [1, 1]} : vector<2x56xf32> to vector<2x40xf32>
    %364 = arith.addf %362, %363 : vector<2x40xf32>
    %365 = arith.addf %364, %295 : vector<2x40xf32>
    %cst_62 = arith.constant dense<0.000000e+00> : vector<2x32xf32>
    %366 = tpu.matmul %365, %8, %cst_62 {dimension_numbers = #tpu.dot_dimension_numbers<[1], [0], [0], [1], [0, 0, 1, 1], [], []>} : vector<2x40xf32>, vector<40x32xf32>, vector<2x32xf32> -> vector<2x32xf32>
    %367 = vector.broadcast %19 : vector<1x32xf32> to vector<2x32xf32>
    %368 = arith.addf %366, %367 : vector<2x32xf32>
    %369 = math.tanh %368 : vector<2x32xf32>
    %cst_63 = arith.constant dense<0xFF800000> : vector<2xf32>
    %370 = vector.multi_reduction <maximumf>, %369, %cst_63 [1] : vector<2x32xf32> to vector<2xf32>
    %371 = vector.shape_cast %370 : vector<2xf32> to vector<2x1xf32>
    %372 = vector.broadcast %371 : vector<2x1xf32> to vector<2x32xf32>
    %373 = arith.subf %369, %372 : vector<2x32xf32>
    %374 = math.exp %373 : vector<2x32xf32>
    %cst_64 = arith.constant dense<0.000000e+00> : vector<2xf32>
    %375 = vector.multi_reduction <add>, %374, %cst_64 [1] : vector<2x32xf32> to vector<2xf32>
    %376 = vector.shape_cast %375 : vector<2xf32> to vector<2x1xf32>
    %377 = math.log %376 : vector<2x1xf32>
    %378 = vector.broadcast %377 : vector<2x1xf32> to vector<2x32xf32>
    %379 = arith.subf %373, %378 : vector<2x32xf32>
    %cst_65 = arith.constant dense<0xFF800000> : vector<2xf32>
    %380 = vector.multi_reduction <maximumf>, %368, %cst_65 [1] : vector<2x32xf32> to vector<2xf32>
    %381 = vector.shape_cast %380 : vector<2xf32> to vector<2x1xf32>
    %382 = vector.broadcast %381 : vector<2x1xf32> to vector<2x32xf32>
    %383 = arith.cmpf oeq, %368, %382 : vector<2x32xf32>
    %c32_i32_66 = arith.constant 32 : i32
    %384 = vector.broadcast %c32_i32_66 : i32 to vector<2x32xi32>
    %385 = arith.select %383, %296, %384 : vector<2x32xi1>, vector<2x32xi32>
    %cst_67 = arith.constant dense<2147483647> : vector<2xi32>
    %386 = vector.multi_reduction <minsi>, %385, %cst_67 [1] : vector<2x32xi32> to vector<2xi32>
    %387 = vector.shape_cast %386 : vector<2xi32> to vector<2x1xi32>
    %388 = vector.broadcast %387 : vector<2x1xi32> to vector<2x32xi32>
    %389 = arith.cmpi eq, %296, %388 : vector<2x32xi32>
    %390 = arith.extui %389 : vector<2x32xi1> to vector<2x32xi32>
    %391 = arith.sitofp %390 : vector<2x32xi32> to vector<2x32xf32>
    %392 = tpu.concatenate %391, %335 in 1 : vector<2x32xf32>, vector<2x16xf32> -> vector<2x48xf32>
    %cst_68 = arith.constant dense<0.000000e+00> : vector<2x64xf32>
    %393 = tpu.matmul %392, %3, %cst_68 {dimension_numbers = #tpu.dot_dimension_numbers<[1], [0], [0], [1], [0, 0, 1, 1], [], []>} : vector<2x48xf32>, vector<48x64xf32>, vector<2x64xf32> -> vector<2x64xf32>
    %394 = vector.broadcast %14 : vector<1x64xf32> to vector<2x64xf32>
    %395 = arith.addf %393, %394 : vector<2x64xf32>
    %396 = arith.negf %395 : vector<2x64xf32>
    %397 = math.exp %396 : vector<2x64xf32>
    %cst_69 = arith.constant 1.000000e+00 : f32
    %398 = vector.broadcast %cst_69 : f32 to vector<2x64xf32>
    %399 = arith.addf %398, %397 : vector<2x64xf32>
    %400 = arith.divf %398, %399 : vector<2x64xf32>
    %401 = math.tanh %395 : vector<2x64xf32>
    %402 = vector.extract_strided_slice %400 {offsets = [0, 16], sizes = [2, 16], strides = [1, 1]} : vector<2x64xf32> to vector<2x16xf32>
    %403 = arith.mulf %402, %332 : vector<2x16xf32>
    %404 = vector.extract_strided_slice %400 {offsets = [0, 0], sizes = [2, 16], strides = [1, 1]} : vector<2x64xf32> to vector<2x16xf32>
    %405 = vector.extract_strided_slice %401 {offsets = [0, 32], sizes = [2, 16], strides = [1, 1]} : vector<2x64xf32> to vector<2x16xf32>
    %406 = arith.mulf %404, %405 : vector<2x16xf32>
    %407 = arith.addf %403, %406 : vector<2x16xf32>
    %408 = vector.extract_strided_slice %400 {offsets = [0, 48], sizes = [2, 16], strides = [1, 1]} : vector<2x64xf32> to vector<2x16xf32>
    %409 = math.tanh %407 : vector<2x16xf32>
    %410 = arith.mulf %408, %409 : vector<2x16xf32>
    %411 = tpu.concatenate %410, %354 in 1 : vector<2x16xf32>, vector<2x16xf32> -> vector<2x32xf32>
    %cst_70 = arith.constant dense<0.000000e+00> : vector<2x64xf32>
    %412 = tpu.matmul %411, %4, %cst_70 {dimension_numbers = #tpu.dot_dimension_numbers<[1], [0], [0], [1], [0, 0, 1, 1], [], []>} : vector<2x32xf32>, vector<32x64xf32>, vector<2x64xf32> -> vector<2x64xf32>
    %413 = vector.broadcast %15 : vector<1x64xf32> to vector<2x64xf32>
    %414 = arith.addf %412, %413 : vector<2x64xf32>
    %415 = arith.negf %414 : vector<2x64xf32>
    %416 = math.exp %415 : vector<2x64xf32>
    %cst_71 = arith.constant 1.000000e+00 : f32
    %417 = vector.broadcast %cst_71 : f32 to vector<2x64xf32>
    %418 = arith.addf %417, %416 : vector<2x64xf32>
    %419 = arith.divf %417, %418 : vector<2x64xf32>
    %420 = math.tanh %414 : vector<2x64xf32>
    %421 = vector.extract_strided_slice %419 {offsets = [0, 16], sizes = [2, 16], strides = [1, 1]} : vector<2x64xf32> to vector<2x16xf32>
    %422 = arith.mulf %421, %351 : vector<2x16xf32>
    %423 = vector.extract_strided_slice %419 {offsets = [0, 0], sizes = [2, 16], strides = [1, 1]} : vector<2x64xf32> to vector<2x16xf32>
    %424 = vector.extract_strided_slice %420 {offsets = [0, 32], sizes = [2, 16], strides = [1, 1]} : vector<2x64xf32> to vector<2x16xf32>
    %425 = arith.mulf %423, %424 : vector<2x16xf32>
    %426 = arith.addf %422, %425 : vector<2x16xf32>
    %427 = vector.extract_strided_slice %419 {offsets = [0, 48], sizes = [2, 16], strides = [1, 1]} : vector<2x64xf32> to vector<2x16xf32>
    %428 = math.tanh %426 : vector<2x16xf32>
    %429 = arith.mulf %427, %428 : vector<2x16xf32>
    %cst_72 = arith.constant dense<0.000000e+00> : vector<2x56xf32>
    %430 = tpu.matmul %429, %5, %cst_72 {dimension_numbers = #tpu.dot_dimension_numbers<[1], [0], [0], [1], [0, 0, 1, 1], [], []>} : vector<2x16xf32>, vector<16x56xf32>, vector<2x56xf32> -> vector<2x56xf32>
    %431 = vector.extract_strided_slice %430 {offsets = [0, 0], sizes = [2, 16], strides = [1, 1]} : vector<2x56xf32> to vector<2x16xf32>
    %432 = vector.broadcast %17 : vector<1x16xf32> to vector<2x16xf32>
    %433 = arith.addf %431, %432 : vector<2x16xf32>
    %434 = vector.shape_cast %433 : vector<2x16xf32> to vector<2x1x16xf32>
    "tpu.trace_start"() <{level = 10 : i32, message = "bqa,bah->bqh"}> : () -> ()
    %cst_73 = arith.constant dense<0.000000e+00> : vector<2x1x16xf32>
    %435 = tpu.matmul %434, %292, %cst_73 {dimension_numbers = #tpu.dot_dimension_numbers<[2], [1], [1], [2], [0, 0, 0, 1, 1, 2], [0], [0]>} : vector<2x1x16xf32>, vector<2x16x16xf32>, vector<2x1x16xf32> -> vector<2x1x16xf32>
    "tpu.trace_stop"() : () -> ()
    %436 = vector.shape_cast %435 : vector<2x1x16xf32> to vector<2x16xf32>
    %cst_74 = arith.constant dense<0.000000e+00> : vector<2x40xf32>
    %437 = tpu.matmul %436, %6, %cst_74 {dimension_numbers = #tpu.dot_dimension_numbers<[1], [0], [0], [1], [0, 0, 1, 1], [], []>} : vector<2x16xf32>, vector<16x40xf32>, vector<2x40xf32> -> vector<2x40xf32>
    %438 = vector.extract_strided_slice %430 {offsets = [0, 16], sizes = [2, 40], strides = [1, 1]} : vector<2x56xf32> to vector<2x40xf32>
    %439 = arith.addf %437, %438 : vector<2x40xf32>
    %440 = arith.addf %439, %295 : vector<2x40xf32>
    %cst_75 = arith.constant dense<0.000000e+00> : vector<2x32xf32>
    %441 = tpu.matmul %440, %8, %cst_75 {dimension_numbers = #tpu.dot_dimension_numbers<[1], [0], [0], [1], [0, 0, 1, 1], [], []>} : vector<2x40xf32>, vector<40x32xf32>, vector<2x32xf32> -> vector<2x32xf32>
    %442 = vector.broadcast %19 : vector<1x32xf32> to vector<2x32xf32>
    %443 = arith.addf %441, %442 : vector<2x32xf32>
    %444 = math.tanh %443 : vector<2x32xf32>
    %cst_76 = arith.constant dense<0xFF800000> : vector<2xf32>
    %445 = vector.multi_reduction <maximumf>, %444, %cst_76 [1] : vector<2x32xf32> to vector<2xf32>
    %446 = vector.shape_cast %445 : vector<2xf32> to vector<2x1xf32>
    %447 = vector.broadcast %446 : vector<2x1xf32> to vector<2x32xf32>
    %448 = arith.subf %444, %447 : vector<2x32xf32>
    %449 = math.exp %448 : vector<2x32xf32>
    %cst_77 = arith.constant dense<0.000000e+00> : vector<2xf32>
    %450 = vector.multi_reduction <add>, %449, %cst_77 [1] : vector<2x32xf32> to vector<2xf32>
    %451 = vector.shape_cast %450 : vector<2xf32> to vector<2x1xf32>
    %452 = math.log %451 : vector<2x1xf32>
    %453 = vector.broadcast %452 : vector<2x1xf32> to vector<2x32xf32>
    %454 = arith.subf %448, %453 : vector<2x32xf32>
    %cst_78 = arith.constant dense<0xFF800000> : vector<2xf32>
    %455 = vector.multi_reduction <maximumf>, %443, %cst_78 [1] : vector<2x32xf32> to vector<2xf32>
    %456 = vector.shape_cast %455 : vector<2xf32> to vector<2x1xf32>
    %457 = vector.broadcast %456 : vector<2x1xf32> to vector<2x32xf32>
    %458 = arith.cmpf oeq, %443, %457 : vector<2x32xf32>
    %c32_i32_79 = arith.constant 32 : i32
    %459 = vector.broadcast %c32_i32_79 : i32 to vector<2x32xi32>
    %460 = arith.select %458, %296, %459 : vector<2x32xi1>, vector<2x32xi32>
    %cst_80 = arith.constant dense<2147483647> : vector<2xi32>
    %461 = vector.multi_reduction <minsi>, %460, %cst_80 [1] : vector<2x32xi32> to vector<2xi32>
    %462 = vector.shape_cast %461 : vector<2xi32> to vector<2x1xi32>
    %463 = vector.broadcast %462 : vector<2x1xi32> to vector<2x32xi32>
    %464 = arith.cmpi eq, %296, %463 : vector<2x32xi32>
    %465 = arith.extui %464 : vector<2x32xi1> to vector<2x32xi32>
    %466 = arith.sitofp %465 : vector<2x32xi32> to vector<2x32xf32>
    %467 = tpu.concatenate %466, %410 in 1 : vector<2x32xf32>, vector<2x16xf32> -> vector<2x48xf32>
    %cst_81 = arith.constant dense<0.000000e+00> : vector<2x64xf32>
    %468 = tpu.matmul %467, %3, %cst_81 {dimension_numbers = #tpu.dot_dimension_numbers<[1], [0], [0], [1], [0, 0, 1, 1], [], []>} : vector<2x48xf32>, vector<48x64xf32>, vector<2x64xf32> -> vector<2x64xf32>
    %469 = vector.broadcast %14 : vector<1x64xf32> to vector<2x64xf32>
    %470 = arith.addf %468, %469 : vector<2x64xf32>
    %471 = arith.negf %470 : vector<2x64xf32>
    %472 = math.exp %471 : vector<2x64xf32>
    %cst_82 = arith.constant 1.000000e+00 : f32
    %473 = vector.broadcast %cst_82 : f32 to vector<2x64xf32>
    %474 = arith.addf %473, %472 : vector<2x64xf32>
    %475 = arith.divf %473, %474 : vector<2x64xf32>
    %476 = math.tanh %470 : vector<2x64xf32>
    %477 = vector.extract_strided_slice %475 {offsets = [0, 16], sizes = [2, 16], strides = [1, 1]} : vector<2x64xf32> to vector<2x16xf32>
    %478 = arith.mulf %477, %407 : vector<2x16xf32>
    %479 = vector.extract_strided_slice %475 {offsets = [0, 0], sizes = [2, 16], strides = [1, 1]} : vector<2x64xf32> to vector<2x16xf32>
    %480 = vector.extract_strided_slice %476 {offsets = [0, 32], sizes = [2, 16], strides = [1, 1]} : vector<2x64xf32> to vector<2x16xf32>
    %481 = arith.mulf %479, %480 : vector<2x16xf32>
    %482 = arith.addf %478, %481 : vector<2x16xf32>
    %483 = vector.extract_strided_slice %475 {offsets = [0, 48], sizes = [2, 16], strides = [1, 1]} : vector<2x64xf32> to vector<2x16xf32>
    %484 = math.tanh %482 : vector<2x16xf32>
    %485 = arith.mulf %483, %484 : vector<2x16xf32>
    %486 = tpu.concatenate %485, %429 in 1 : vector<2x16xf32>, vector<2x16xf32> -> vector<2x32xf32>
    %cst_83 = arith.constant dense<0.000000e+00> : vector<2x64xf32>
    %487 = tpu.matmul %486, %4, %cst_83 {dimension_numbers = #tpu.dot_dimension_numbers<[1], [0], [0], [1], [0, 0, 1, 1], [], []>} : vector<2x32xf32>, vector<32x64xf32>, vector<2x64xf32> -> vector<2x64xf32>
    %488 = vector.broadcast %15 : vector<1x64xf32> to vector<2x64xf32>
    %489 = arith.addf %487, %488 : vector<2x64xf32>
    %490 = arith.negf %489 : vector<2x64xf32>
    %491 = math.exp %490 : vector<2x64xf32>
    %cst_84 = arith.constant 1.000000e+00 : f32
    %492 = vector.broadcast %cst_84 : f32 to vector<2x64xf32>
    %493 = arith.addf %492, %491 : vector<2x64xf32>
    %494 = arith.divf %492, %493 : vector<2x64xf32>
    %495 = math.tanh %489 : vector<2x64xf32>
    %496 = vector.extract_strided_slice %494 {offsets = [0, 16], sizes = [2, 16], strides = [1, 1]} : vector<2x64xf32> to vector<2x16xf32>
    %497 = arith.mulf %496, %426 : vector<2x16xf32>
    %498 = vector.extract_strided_slice %494 {offsets = [0, 0], sizes = [2, 16], strides = [1, 1]} : vector<2x64xf32> to vector<2x16xf32>
    %499 = vector.extract_strided_slice %495 {offsets = [0, 32], sizes = [2, 16], strides = [1, 1]} : vector<2x64xf32> to vector<2x16xf32>
    %500 = arith.mulf %498, %499 : vector<2x16xf32>
    %501 = arith.addf %497, %500 : vector<2x16xf32>
    %502 = vector.extract_strided_slice %494 {offsets = [0, 48], sizes = [2, 16], strides = [1, 1]} : vector<2x64xf32> to vector<2x16xf32>
    %503 = math.tanh %501 : vector<2x16xf32>
    %504 = arith.mulf %502, %503 : vector<2x16xf32>
    %cst_85 = arith.constant dense<0.000000e+00> : vector<2x56xf32>
    %505 = tpu.matmul %504, %5, %cst_85 {dimension_numbers = #tpu.dot_dimension_numbers<[1], [0], [0], [1], [0, 0, 1, 1], [], []>} : vector<2x16xf32>, vector<16x56xf32>, vector<2x56xf32> -> vector<2x56xf32>
    %506 = vector.extract_strided_slice %505 {offsets = [0, 0], sizes = [2, 16], strides = [1, 1]} : vector<2x56xf32> to vector<2x16xf32>
    %507 = vector.broadcast %17 : vector<1x16xf32> to vector<2x16xf32>
    %508 = arith.addf %506, %507 : vector<2x16xf32>
    %509 = vector.shape_cast %508 : vector<2x16xf32> to vector<2x1x16xf32>
    "tpu.trace_start"() <{level = 10 : i32, message = "bqa,bah->bqh"}> : () -> ()
    %cst_86 = arith.constant dense<0.000000e+00> : vector<2x1x16xf32>
    %510 = tpu.matmul %509, %292, %cst_86 {dimension_numbers = #tpu.dot_dimension_numbers<[2], [1], [1], [2], [0, 0, 0, 1, 1, 2], [0], [0]>} : vector<2x1x16xf32>, vector<2x16x16xf32>, vector<2x1x16xf32> -> vector<2x1x16xf32>
    "tpu.trace_stop"() : () -> ()
    %511 = vector.shape_cast %510 : vector<2x1x16xf32> to vector<2x16xf32>
    %cst_87 = arith.constant dense<0.000000e+00> : vector<2x40xf32>
    %512 = tpu.matmul %511, %6, %cst_87 {dimension_numbers = #tpu.dot_dimension_numbers<[1], [0], [0], [1], [0, 0, 1, 1], [], []>} : vector<2x16xf32>, vector<16x40xf32>, vector<2x40xf32> -> vector<2x40xf32>
    %513 = vector.extract_strided_slice %505 {offsets = [0, 16], sizes = [2, 40], strides = [1, 1]} : vector<2x56xf32> to vector<2x40xf32>
    %514 = arith.addf %512, %513 : vector<2x40xf32>
    %515 = arith.addf %514, %295 : vector<2x40xf32>
    %cst_88 = arith.constant dense<0.000000e+00> : vector<2x32xf32>
    %516 = tpu.matmul %515, %8, %cst_88 {dimension_numbers = #tpu.dot_dimension_numbers<[1], [0], [0], [1], [0, 0, 1, 1], [], []>} : vector<2x40xf32>, vector<40x32xf32>, vector<2x32xf32> -> vector<2x32xf32>
    %517 = vector.broadcast %19 : vector<1x32xf32> to vector<2x32xf32>
    %518 = arith.addf %516, %517 : vector<2x32xf32>
    %519 = math.tanh %518 : vector<2x32xf32>
    %cst_89 = arith.constant dense<0xFF800000> : vector<2xf32>
    %520 = vector.multi_reduction <maximumf>, %519, %cst_89 [1] : vector<2x32xf32> to vector<2xf32>
    %521 = vector.shape_cast %520 : vector<2xf32> to vector<2x1xf32>
    %522 = vector.broadcast %521 : vector<2x1xf32> to vector<2x32xf32>
    %523 = arith.subf %519, %522 : vector<2x32xf32>
    %524 = math.exp %523 : vector<2x32xf32>
    %cst_90 = arith.constant dense<0.000000e+00> : vector<2xf32>
    %525 = vector.multi_reduction <add>, %524, %cst_90 [1] : vector<2x32xf32> to vector<2xf32>
    %526 = vector.shape_cast %525 : vector<2xf32> to vector<2x1xf32>
    %527 = math.log %526 : vector<2x1xf32>
    %528 = vector.broadcast %527 : vector<2x1xf32> to vector<2x32xf32>
    %529 = arith.subf %523, %528 : vector<2x32xf32>
    %cst_91 = arith.constant dense<0xFF800000> : vector<2xf32>
    %530 = vector.multi_reduction <maximumf>, %518, %cst_91 [1] : vector<2x32xf32> to vector<2xf32>
    %531 = vector.shape_cast %530 : vector<2xf32> to vector<2x1xf32>
    %532 = vector.broadcast %531 : vector<2x1xf32> to vector<2x32xf32>
    %533 = arith.cmpf oeq, %518, %532 : vector<2x32xf32>
    %c32_i32_92 = arith.constant 32 : i32
    %534 = vector.broadcast %c32_i32_92 : i32 to vector<2x32xi32>
    %535 = arith.select %533, %296, %534 : vector<2x32xi1>, vector<2x32xi32>
    %cst_93 = arith.constant dense<2147483647> : vector<2xi32>
    %536 = vector.multi_reduction <minsi>, %535, %cst_93 [1] : vector<2x32xi32> to vector<2xi32>
    %537 = vector.shape_cast %536 : vector<2xi32> to vector<2x1xi32>
    %538 = vector.broadcast %537 : vector<2x1xi32> to vector<2x32xi32>
    %539 = arith.cmpi eq, %296, %538 : vector<2x32xi32>
    %540 = arith.extui %539 : vector<2x32xi1> to vector<2x32xi32>
    %541 = arith.sitofp %540 : vector<2x32xi32> to vector<2x32xf32>
    %542 = tpu.concatenate %541, %485 in 1 : vector<2x32xf32>, vector<2x16xf32> -> vector<2x48xf32>
    %cst_94 = arith.constant dense<0.000000e+00> : vector<2x64xf32>
    %543 = tpu.matmul %542, %3, %cst_94 {dimension_numbers = #tpu.dot_dimension_numbers<[1], [0], [0], [1], [0, 0, 1, 1], [], []>} : vector<2x48xf32>, vector<48x64xf32>, vector<2x64xf32> -> vector<2x64xf32>
    %544 = vector.broadcast %14 : vector<1x64xf32> to vector<2x64xf32>
    %545 = arith.addf %543, %544 : vector<2x64xf32>
    %546 = arith.negf %545 : vector<2x64xf32>
    %547 = math.exp %546 : vector<2x64xf32>
    %cst_95 = arith.constant 1.000000e+00 : f32
    %548 = vector.broadcast %cst_95 : f32 to vector<2x64xf32>
    %549 = arith.addf %548, %547 : vector<2x64xf32>
    %550 = arith.divf %548, %549 : vector<2x64xf32>
    %551 = math.tanh %545 : vector<2x64xf32>
    %552 = vector.extract_strided_slice %550 {offsets = [0, 16], sizes = [2, 16], strides = [1, 1]} : vector<2x64xf32> to vector<2x16xf32>
    %553 = arith.mulf %552, %482 : vector<2x16xf32>
    %554 = vector.extract_strided_slice %550 {offsets = [0, 0], sizes = [2, 16], strides = [1, 1]} : vector<2x64xf32> to vector<2x16xf32>
    %555 = vector.extract_strided_slice %551 {offsets = [0, 32], sizes = [2, 16], strides = [1, 1]} : vector<2x64xf32> to vector<2x16xf32>
    %556 = arith.mulf %554, %555 : vector<2x16xf32>
    %557 = arith.addf %553, %556 : vector<2x16xf32>
    %558 = vector.extract_strided_slice %550 {offsets = [0, 48], sizes = [2, 16], strides = [1, 1]} : vector<2x64xf32> to vector<2x16xf32>
    %559 = math.tanh %557 : vector<2x16xf32>
    %560 = arith.mulf %558, %559 : vector<2x16xf32>
    %561 = tpu.concatenate %560, %504 in 1 : vector<2x16xf32>, vector<2x16xf32> -> vector<2x32xf32>
    %cst_96 = arith.constant dense<0.000000e+00> : vector<2x64xf32>
    %562 = tpu.matmul %561, %4, %cst_96 {dimension_numbers = #tpu.dot_dimension_numbers<[1], [0], [0], [1], [0, 0, 1, 1], [], []>} : vector<2x32xf32>, vector<32x64xf32>, vector<2x64xf32> -> vector<2x64xf32>
    %563 = vector.broadcast %15 : vector<1x64xf32> to vector<2x64xf32>
    %564 = arith.addf %562, %563 : vector<2x64xf32>
    %565 = arith.negf %564 : vector<2x64xf32>
    %566 = math.exp %565 : vector<2x64xf32>
    %cst_97 = arith.constant 1.000000e+00 : f32
    %567 = vector.broadcast %cst_97 : f32 to vector<2x64xf32>
    %568 = arith.addf %567, %566 : vector<2x64xf32>
    %569 = arith.divf %567, %568 : vector<2x64xf32>
    %570 = math.tanh %564 : vector<2x64xf32>
    %571 = vector.extract_strided_slice %569 {offsets = [0, 16], sizes = [2, 16], strides = [1, 1]} : vector<2x64xf32> to vector<2x16xf32>
    %572 = arith.mulf %571, %501 : vector<2x16xf32>
    %573 = vector.extract_strided_slice %569 {offsets = [0, 0], sizes = [2, 16], strides = [1, 1]} : vector<2x64xf32> to vector<2x16xf32>
    %574 = vector.extract_strided_slice %570 {offsets = [0, 32], sizes = [2, 16], strides = [1, 1]} : vector<2x64xf32> to vector<2x16xf32>
    %575 = arith.mulf %573, %574 : vector<2x16xf32>
    %576 = arith.addf %572, %575 : vector<2x16xf32>
    %577 = vector.extract_strided_slice %569 {offsets = [0, 48], sizes = [2, 16], strides = [1, 1]} : vector<2x64xf32> to vector<2x16xf32>
    %578 = math.tanh %576 : vector<2x16xf32>
    %579 = arith.mulf %577, %578 : vector<2x16xf32>
    %cst_98 = arith.constant dense<0.000000e+00> : vector<2x56xf32>
    %580 = tpu.matmul %579, %5, %cst_98 {dimension_numbers = #tpu.dot_dimension_numbers<[1], [0], [0], [1], [0, 0, 1, 1], [], []>} : vector<2x16xf32>, vector<16x56xf32>, vector<2x56xf32> -> vector<2x56xf32>
    %581 = vector.extract_strided_slice %580 {offsets = [0, 0], sizes = [2, 16], strides = [1, 1]} : vector<2x56xf32> to vector<2x16xf32>
    %582 = vector.broadcast %17 : vector<1x16xf32> to vector<2x16xf32>
    %583 = arith.addf %581, %582 : vector<2x16xf32>
    %584 = vector.shape_cast %583 : vector<2x16xf32> to vector<2x1x16xf32>
    "tpu.trace_start"() <{level = 10 : i32, message = "bqa,bah->bqh"}> : () -> ()
    %cst_99 = arith.constant dense<0.000000e+00> : vector<2x1x16xf32>
    %585 = tpu.matmul %584, %292, %cst_99 {dimension_numbers = #tpu.dot_dimension_numbers<[2], [1], [1], [2], [0, 0, 0, 1, 1, 2], [0], [0]>} : vector<2x1x16xf32>, vector<2x16x16xf32>, vector<2x1x16xf32> -> vector<2x1x16xf32>
    "tpu.trace_stop"() : () -> ()
    %586 = vector.shape_cast %585 : vector<2x1x16xf32> to vector<2x16xf32>
    %cst_100 = arith.constant dense<0.000000e+00> : vector<2x40xf32>
    %587 = tpu.matmul %586, %6, %cst_100 {dimension_numbers = #tpu.dot_dimension_numbers<[1], [0], [0], [1], [0, 0, 1, 1], [], []>} : vector<2x16xf32>, vector<16x40xf32>, vector<2x40xf32> -> vector<2x40xf32>
    %588 = vector.extract_strided_slice %580 {offsets = [0, 16], sizes = [2, 40], strides = [1, 1]} : vector<2x56xf32> to vector<2x40xf32>
    %589 = arith.addf %587, %588 : vector<2x40xf32>
    %590 = arith.addf %589, %295 : vector<2x40xf32>
    %cst_101 = arith.constant dense<0.000000e+00> : vector<2x32xf32>
    %591 = tpu.matmul %590, %8, %cst_101 {dimension_numbers = #tpu.dot_dimension_numbers<[1], [0], [0], [1], [0, 0, 1, 1], [], []>} : vector<2x40xf32>, vector<40x32xf32>, vector<2x32xf32> -> vector<2x32xf32>
    %592 = vector.broadcast %19 : vector<1x32xf32> to vector<2x32xf32>
    %593 = arith.addf %591, %592 : vector<2x32xf32>
    %594 = math.tanh %593 : vector<2x32xf32>
    %cst_102 = arith.constant dense<0xFF800000> : vector<2xf32>
    %595 = vector.multi_reduction <maximumf>, %594, %cst_102 [1] : vector<2x32xf32> to vector<2xf32>
    %596 = vector.shape_cast %595 : vector<2xf32> to vector<2x1xf32>
    %597 = vector.broadcast %596 : vector<2x1xf32> to vector<2x32xf32>
    %598 = arith.subf %594, %597 : vector<2x32xf32>
    %599 = math.exp %598 : vector<2x32xf32>
    %cst_103 = arith.constant dense<0.000000e+00> : vector<2xf32>
    %600 = vector.multi_reduction <add>, %599, %cst_103 [1] : vector<2x32xf32> to vector<2xf32>
    %601 = vector.shape_cast %600 : vector<2xf32> to vector<2x1xf32>
    %602 = math.log %601 : vector<2x1xf32>
    %603 = vector.broadcast %602 : vector<2x1xf32> to vector<2x32xf32>
    %604 = arith.subf %598, %603 : vector<2x32xf32>
    %cst_104 = arith.constant dense<0xFF800000> : vector<2xf32>
    %605 = vector.multi_reduction <maximumf>, %593, %cst_104 [1] : vector<2x32xf32> to vector<2xf32>
    %606 = vector.shape_cast %605 : vector<2xf32> to vector<2x1xf32>
    %607 = vector.broadcast %606 : vector<2x1xf32> to vector<2x32xf32>
    %608 = arith.cmpf oeq, %593, %607 : vector<2x32xf32>
    %c32_i32_105 = arith.constant 32 : i32
    %609 = vector.broadcast %c32_i32_105 : i32 to vector<2x32xi32>
    %610 = arith.select %608, %296, %609 : vector<2x32xi1>, vector<2x32xi32>
    %cst_106 = arith.constant dense<2147483647> : vector<2xi32>
    %611 = vector.multi_reduction <minsi>, %610, %cst_106 [1] : vector<2x32xi32> to vector<2xi32>
    %612 = vector.shape_cast %611 : vector<2xi32> to vector<2x1xi32>
    %613 = vector.broadcast %612 : vector<2x1xi32> to vector<2x32xi32>
    %614 = arith.cmpi eq, %296, %613 : vector<2x32xi32>
    %615 = arith.extui %614 : vector<2x32xi1> to vector<2x32xi32>
    %616 = arith.sitofp %615 : vector<2x32xi32> to vector<2x32xf32>
    %617 = tpu.concatenate %616, %560 in 1 : vector<2x32xf32>, vector<2x16xf32> -> vector<2x48xf32>
    %cst_107 = arith.constant dense<0.000000e+00> : vector<2x64xf32>
    %618 = tpu.matmul %617, %3, %cst_107 {dimension_numbers = #tpu.dot_dimension_numbers<[1], [0], [0], [1], [0, 0, 1, 1], [], []>} : vector<2x48xf32>, vector<48x64xf32>, vector<2x64xf32> -> vector<2x64xf32>
    %619 = vector.broadcast %14 : vector<1x64xf32> to vector<2x64xf32>
    %620 = arith.addf %618, %619 : vector<2x64xf32>
    %621 = arith.negf %620 : vector<2x64xf32>
    %622 = math.exp %621 : vector<2x64xf32>
    %cst_108 = arith.constant 1.000000e+00 : f32
    %623 = vector.broadcast %cst_108 : f32 to vector<2x64xf32>
    %624 = arith.addf %623, %622 : vector<2x64xf32>
    %625 = arith.divf %623, %624 : vector<2x64xf32>
    %626 = math.tanh %620 : vector<2x64xf32>
    %627 = vector.extract_strided_slice %625 {offsets = [0, 16], sizes = [2, 16], strides = [1, 1]} : vector<2x64xf32> to vector<2x16xf32>
    %628 = arith.mulf %627, %557 : vector<2x16xf32>
    %629 = vector.extract_strided_slice %625 {offsets = [0, 0], sizes = [2, 16], strides = [1, 1]} : vector<2x64xf32> to vector<2x16xf32>
    %630 = vector.extract_strided_slice %626 {offsets = [0, 32], sizes = [2, 16], strides = [1, 1]} : vector<2x64xf32> to vector<2x16xf32>
    %631 = arith.mulf %629, %630 : vector<2x16xf32>
    %632 = arith.addf %628, %631 : vector<2x16xf32>
    %633 = vector.extract_strided_slice %625 {offsets = [0, 48], sizes = [2, 16], strides = [1, 1]} : vector<2x64xf32> to vector<2x16xf32>
    %634 = math.tanh %632 : vector<2x16xf32>
    %635 = arith.mulf %633, %634 : vector<2x16xf32>
    %636 = tpu.concatenate %635, %579 in 1 : vector<2x16xf32>, vector<2x16xf32> -> vector<2x32xf32>
    %cst_109 = arith.constant dense<0.000000e+00> : vector<2x64xf32>
    %637 = tpu.matmul %636, %4, %cst_109 {dimension_numbers = #tpu.dot_dimension_numbers<[1], [0], [0], [1], [0, 0, 1, 1], [], []>} : vector<2x32xf32>, vector<32x64xf32>, vector<2x64xf32> -> vector<2x64xf32>
    %638 = vector.broadcast %15 : vector<1x64xf32> to vector<2x64xf32>
    %639 = arith.addf %637, %638 : vector<2x64xf32>
    %640 = arith.negf %639 : vector<2x64xf32>
    %641 = math.exp %640 : vector<2x64xf32>
    %cst_110 = arith.constant 1.000000e+00 : f32
    %642 = vector.broadcast %cst_110 : f32 to vector<2x64xf32>
    %643 = arith.addf %642, %641 : vector<2x64xf32>
    %644 = arith.divf %642, %643 : vector<2x64xf32>
    %645 = math.tanh %639 : vector<2x64xf32>
    %646 = vector.extract_strided_slice %644 {offsets = [0, 16], sizes = [2, 16], strides = [1, 1]} : vector<2x64xf32> to vector<2x16xf32>
    %647 = arith.mulf %646, %576 : vector<2x16xf32>
    %648 = vector.extract_strided_slice %644 {offsets = [0, 0], sizes = [2, 16], strides = [1, 1]} : vector<2x64xf32> to vector<2x16xf32>
    %649 = vector.extract_strided_slice %645 {offsets = [0, 32], sizes = [2, 16], strides = [1, 1]} : vector<2x64xf32> to vector<2x16xf32>
    %650 = arith.mulf %648, %649 : vector<2x16xf32>
    %651 = arith.addf %647, %650 : vector<2x16xf32>
    %652 = vector.extract_strided_slice %644 {offsets = [0, 48], sizes = [2, 16], strides = [1, 1]} : vector<2x64xf32> to vector<2x16xf32>
    %653 = math.tanh %651 : vector<2x16xf32>
    %654 = arith.mulf %652, %653 : vector<2x16xf32>
    %cst_111 = arith.constant dense<0.000000e+00> : vector<2x56xf32>
    %655 = tpu.matmul %654, %5, %cst_111 {dimension_numbers = #tpu.dot_dimension_numbers<[1], [0], [0], [1], [0, 0, 1, 1], [], []>} : vector<2x16xf32>, vector<16x56xf32>, vector<2x56xf32> -> vector<2x56xf32>
    %656 = vector.extract_strided_slice %655 {offsets = [0, 0], sizes = [2, 16], strides = [1, 1]} : vector<2x56xf32> to vector<2x16xf32>
    %657 = vector.broadcast %17 : vector<1x16xf32> to vector<2x16xf32>
    %658 = arith.addf %656, %657 : vector<2x16xf32>
    %659 = vector.shape_cast %658 : vector<2x16xf32> to vector<2x1x16xf32>
    "tpu.trace_start"() <{level = 10 : i32, message = "bqa,bah->bqh"}> : () -> ()
    %cst_112 = arith.constant dense<0.000000e+00> : vector<2x1x16xf32>
    %660 = tpu.matmul %659, %292, %cst_112 {dimension_numbers = #tpu.dot_dimension_numbers<[2], [1], [1], [2], [0, 0, 0, 1, 1, 2], [0], [0]>} : vector<2x1x16xf32>, vector<2x16x16xf32>, vector<2x1x16xf32> -> vector<2x1x16xf32>
    "tpu.trace_stop"() : () -> ()
    %661 = vector.shape_cast %660 : vector<2x1x16xf32> to vector<2x16xf32>
    %cst_113 = arith.constant dense<0.000000e+00> : vector<2x40xf32>
    %662 = tpu.matmul %661, %6, %cst_113 {dimension_numbers = #tpu.dot_dimension_numbers<[1], [0], [0], [1], [0, 0, 1, 1], [], []>} : vector<2x16xf32>, vector<16x40xf32>, vector<2x40xf32> -> vector<2x40xf32>
    %663 = vector.extract_strided_slice %655 {offsets = [0, 16], sizes = [2, 40], strides = [1, 1]} : vector<2x56xf32> to vector<2x40xf32>
    %664 = arith.addf %662, %663 : vector<2x40xf32>
    %665 = arith.addf %664, %295 : vector<2x40xf32>
    %cst_114 = arith.constant dense<0.000000e+00> : vector<2x32xf32>
    %666 = tpu.matmul %665, %8, %cst_114 {dimension_numbers = #tpu.dot_dimension_numbers<[1], [0], [0], [1], [0, 0, 1, 1], [], []>} : vector<2x40xf32>, vector<40x32xf32>, vector<2x32xf32> -> vector<2x32xf32>
    %667 = vector.broadcast %19 : vector<1x32xf32> to vector<2x32xf32>
    %668 = arith.addf %666, %667 : vector<2x32xf32>
    %669 = math.tanh %668 : vector<2x32xf32>
    %cst_115 = arith.constant dense<0xFF800000> : vector<2xf32>
    %670 = vector.multi_reduction <maximumf>, %669, %cst_115 [1] : vector<2x32xf32> to vector<2xf32>
    %671 = vector.shape_cast %670 : vector<2xf32> to vector<2x1xf32>
    %672 = vector.broadcast %671 : vector<2x1xf32> to vector<2x32xf32>
    %673 = arith.subf %669, %672 : vector<2x32xf32>
    %674 = math.exp %673 : vector<2x32xf32>
    %cst_116 = arith.constant dense<0.000000e+00> : vector<2xf32>
    %675 = vector.multi_reduction <add>, %674, %cst_116 [1] : vector<2x32xf32> to vector<2xf32>
    %676 = vector.shape_cast %675 : vector<2xf32> to vector<2x1xf32>
    %677 = math.log %676 : vector<2x1xf32>
    %678 = vector.broadcast %677 : vector<2x1xf32> to vector<2x32xf32>
    %679 = arith.subf %673, %678 : vector<2x32xf32>
    %cst_117 = arith.constant dense<0xFF800000> : vector<2xf32>
    %680 = vector.multi_reduction <maximumf>, %668, %cst_117 [1] : vector<2x32xf32> to vector<2xf32>
    %681 = vector.shape_cast %680 : vector<2xf32> to vector<2x1xf32>
    %682 = vector.broadcast %681 : vector<2x1xf32> to vector<2x32xf32>
    %683 = arith.cmpf oeq, %668, %682 : vector<2x32xf32>
    %c32_i32_118 = arith.constant 32 : i32
    %684 = vector.broadcast %c32_i32_118 : i32 to vector<2x32xi32>
    %685 = arith.select %683, %296, %684 : vector<2x32xi1>, vector<2x32xi32>
    %cst_119 = arith.constant dense<2147483647> : vector<2xi32>
    %686 = vector.multi_reduction <minsi>, %685, %cst_119 [1] : vector<2x32xi32> to vector<2xi32>
    %687 = vector.shape_cast %686 : vector<2xi32> to vector<2x1xi32>
    %688 = vector.broadcast %687 : vector<2x1xi32> to vector<2x32xi32>
    %689 = arith.cmpi eq, %296, %688 : vector<2x32xi32>
    %690 = arith.extui %689 : vector<2x32xi1> to vector<2x32xi32>
    %691 = arith.sitofp %690 : vector<2x32xi32> to vector<2x32xf32>
    %692 = tpu.concatenate %691, %635 in 1 : vector<2x32xf32>, vector<2x16xf32> -> vector<2x48xf32>
    %cst_120 = arith.constant dense<0.000000e+00> : vector<2x64xf32>
    %693 = tpu.matmul %692, %3, %cst_120 {dimension_numbers = #tpu.dot_dimension_numbers<[1], [0], [0], [1], [0, 0, 1, 1], [], []>} : vector<2x48xf32>, vector<48x64xf32>, vector<2x64xf32> -> vector<2x64xf32>
    %694 = vector.broadcast %14 : vector<1x64xf32> to vector<2x64xf32>
    %695 = arith.addf %693, %694 : vector<2x64xf32>
    %696 = arith.negf %695 : vector<2x64xf32>
    %697 = math.exp %696 : vector<2x64xf32>
    %cst_121 = arith.constant 1.000000e+00 : f32
    %698 = vector.broadcast %cst_121 : f32 to vector<2x64xf32>
    %699 = arith.addf %698, %697 : vector<2x64xf32>
    %700 = arith.divf %698, %699 : vector<2x64xf32>
    %701 = math.tanh %695 : vector<2x64xf32>
    %702 = vector.extract_strided_slice %700 {offsets = [0, 16], sizes = [2, 16], strides = [1, 1]} : vector<2x64xf32> to vector<2x16xf32>
    %703 = arith.mulf %702, %632 : vector<2x16xf32>
    %704 = vector.extract_strided_slice %700 {offsets = [0, 0], sizes = [2, 16], strides = [1, 1]} : vector<2x64xf32> to vector<2x16xf32>
    %705 = vector.extract_strided_slice %701 {offsets = [0, 32], sizes = [2, 16], strides = [1, 1]} : vector<2x64xf32> to vector<2x16xf32>
    %706 = arith.mulf %704, %705 : vector<2x16xf32>
    %707 = arith.addf %703, %706 : vector<2x16xf32>
    %708 = vector.extract_strided_slice %700 {offsets = [0, 48], sizes = [2, 16], strides = [1, 1]} : vector<2x64xf32> to vector<2x16xf32>
    %709 = math.tanh %707 : vector<2x16xf32>
    %710 = arith.mulf %708, %709 : vector<2x16xf32>
    %711 = tpu.concatenate %710, %654 in 1 : vector<2x16xf32>, vector<2x16xf32> -> vector<2x32xf32>
    %cst_122 = arith.constant dense<0.000000e+00> : vector<2x64xf32>
    %712 = tpu.matmul %711, %4, %cst_122 {dimension_numbers = #tpu.dot_dimension_numbers<[1], [0], [0], [1], [0, 0, 1, 1], [], []>} : vector<2x32xf32>, vector<32x64xf32>, vector<2x64xf32> -> vector<2x64xf32>
    %713 = vector.broadcast %15 : vector<1x64xf32> to vector<2x64xf32>
    %714 = arith.addf %712, %713 : vector<2x64xf32>
    %715 = arith.negf %714 : vector<2x64xf32>
    %716 = math.exp %715 : vector<2x64xf32>
    %cst_123 = arith.constant 1.000000e+00 : f32
    %717 = vector.broadcast %cst_123 : f32 to vector<2x64xf32>
    %718 = arith.addf %717, %716 : vector<2x64xf32>
    %719 = arith.divf %717, %718 : vector<2x64xf32>
    %720 = math.tanh %714 : vector<2x64xf32>
    %721 = vector.extract_strided_slice %719 {offsets = [0, 16], sizes = [2, 16], strides = [1, 1]} : vector<2x64xf32> to vector<2x16xf32>
    %722 = arith.mulf %721, %651 : vector<2x16xf32>
    %723 = vector.extract_strided_slice %719 {offsets = [0, 0], sizes = [2, 16], strides = [1, 1]} : vector<2x64xf32> to vector<2x16xf32>
    %724 = vector.extract_strided_slice %720 {offsets = [0, 32], sizes = [2, 16], strides = [1, 1]} : vector<2x64xf32> to vector<2x16xf32>
    %725 = arith.mulf %723, %724 : vector<2x16xf32>
    %726 = arith.addf %722, %725 : vector<2x16xf32>
    %727 = vector.extract_strided_slice %719 {offsets = [0, 48], sizes = [2, 16], strides = [1, 1]} : vector<2x64xf32> to vector<2x16xf32>
    %728 = math.tanh %726 : vector<2x16xf32>
    %729 = arith.mulf %727, %728 : vector<2x16xf32>
    %cst_124 = arith.constant dense<0.000000e+00> : vector<2x56xf32>
    %730 = tpu.matmul %729, %5, %cst_124 {dimension_numbers = #tpu.dot_dimension_numbers<[1], [0], [0], [1], [0, 0, 1, 1], [], []>} : vector<2x16xf32>, vector<16x56xf32>, vector<2x56xf32> -> vector<2x56xf32>
    %731 = vector.extract_strided_slice %730 {offsets = [0, 0], sizes = [2, 16], strides = [1, 1]} : vector<2x56xf32> to vector<2x16xf32>
    %732 = vector.broadcast %17 : vector<1x16xf32> to vector<2x16xf32>
    %733 = arith.addf %731, %732 : vector<2x16xf32>
    %734 = vector.shape_cast %733 : vector<2x16xf32> to vector<2x1x16xf32>
    "tpu.trace_start"() <{level = 10 : i32, message = "bqa,bah->bqh"}> : () -> ()
    %cst_125 = arith.constant dense<0.000000e+00> : vector<2x1x16xf32>
    %735 = tpu.matmul %734, %292, %cst_125 {dimension_numbers = #tpu.dot_dimension_numbers<[2], [1], [1], [2], [0, 0, 0, 1, 1, 2], [0], [0]>} : vector<2x1x16xf32>, vector<2x16x16xf32>, vector<2x1x16xf32> -> vector<2x1x16xf32>
    "tpu.trace_stop"() : () -> ()
    %736 = vector.shape_cast %735 : vector<2x1x16xf32> to vector<2x16xf32>
    %cst_126 = arith.constant dense<0.000000e+00> : vector<2x40xf32>
    %737 = tpu.matmul %736, %6, %cst_126 {dimension_numbers = #tpu.dot_dimension_numbers<[1], [0], [0], [1], [0, 0, 1, 1], [], []>} : vector<2x16xf32>, vector<16x40xf32>, vector<2x40xf32> -> vector<2x40xf32>
    %738 = vector.extract_strided_slice %730 {offsets = [0, 16], sizes = [2, 40], strides = [1, 1]} : vector<2x56xf32> to vector<2x40xf32>
    %739 = arith.addf %737, %738 : vector<2x40xf32>
    %740 = arith.addf %739, %295 : vector<2x40xf32>
    %cst_127 = arith.constant dense<0.000000e+00> : vector<2x32xf32>
    %741 = tpu.matmul %740, %8, %cst_127 {dimension_numbers = #tpu.dot_dimension_numbers<[1], [0], [0], [1], [0, 0, 1, 1], [], []>} : vector<2x40xf32>, vector<40x32xf32>, vector<2x32xf32> -> vector<2x32xf32>
    %742 = vector.broadcast %19 : vector<1x32xf32> to vector<2x32xf32>
    %743 = arith.addf %741, %742 : vector<2x32xf32>
    %744 = math.tanh %743 : vector<2x32xf32>
    %cst_128 = arith.constant dense<0xFF800000> : vector<2xf32>
    %745 = vector.multi_reduction <maximumf>, %744, %cst_128 [1] : vector<2x32xf32> to vector<2xf32>
    %746 = vector.shape_cast %745 : vector<2xf32> to vector<2x1xf32>
    %747 = vector.broadcast %746 : vector<2x1xf32> to vector<2x32xf32>
    %748 = arith.subf %744, %747 : vector<2x32xf32>
    %749 = math.exp %748 : vector<2x32xf32>
    %cst_129 = arith.constant dense<0.000000e+00> : vector<2xf32>
    %750 = vector.multi_reduction <add>, %749, %cst_129 [1] : vector<2x32xf32> to vector<2xf32>
    %751 = vector.shape_cast %750 : vector<2xf32> to vector<2x1xf32>
    %752 = math.log %751 : vector<2x1xf32>
    %753 = vector.broadcast %752 : vector<2x1xf32> to vector<2x32xf32>
    %754 = arith.subf %748, %753 : vector<2x32xf32>
    %cst_130 = arith.constant dense<0xFF800000> : vector<2xf32>
    %755 = vector.multi_reduction <maximumf>, %743, %cst_130 [1] : vector<2x32xf32> to vector<2xf32>
    %756 = vector.shape_cast %755 : vector<2xf32> to vector<2x1xf32>
    %757 = vector.broadcast %756 : vector<2x1xf32> to vector<2x32xf32>
    %758 = arith.cmpf oeq, %743, %757 : vector<2x32xf32>
    %c32_i32_131 = arith.constant 32 : i32
    %759 = vector.broadcast %c32_i32_131 : i32 to vector<2x32xi32>
    %760 = arith.select %758, %296, %759 : vector<2x32xi1>, vector<2x32xi32>
    %cst_132 = arith.constant dense<2147483647> : vector<2xi32>
    %761 = vector.multi_reduction <minsi>, %760, %cst_132 [1] : vector<2x32xi32> to vector<2xi32>
    %762 = vector.shape_cast %761 : vector<2xi32> to vector<2x1xi32>
    %763 = vector.broadcast %762 : vector<2x1xi32> to vector<2x32xi32>
    %764 = arith.cmpi eq, %296, %763 : vector<2x32xi32>
    %765 = arith.extui %764 : vector<2x32xi1> to vector<2x32xi32>
    %766 = arith.sitofp %765 : vector<2x32xi32> to vector<2x32xf32>
    %767 = tpu.concatenate %766, %710 in 1 : vector<2x32xf32>, vector<2x16xf32> -> vector<2x48xf32>
    %cst_133 = arith.constant dense<0.000000e+00> : vector<2x64xf32>
    %768 = tpu.matmul %767, %3, %cst_133 {dimension_numbers = #tpu.dot_dimension_numbers<[1], [0], [0], [1], [0, 0, 1, 1], [], []>} : vector<2x48xf32>, vector<48x64xf32>, vector<2x64xf32> -> vector<2x64xf32>
    %769 = vector.broadcast %14 : vector<1x64xf32> to vector<2x64xf32>
    %770 = arith.addf %768, %769 : vector<2x64xf32>
    %771 = arith.negf %770 : vector<2x64xf32>
    %772 = math.exp %771 : vector<2x64xf32>
    %cst_134 = arith.constant 1.000000e+00 : f32
    %773 = vector.broadcast %cst_134 : f32 to vector<2x64xf32>
    %774 = arith.addf %773, %772 : vector<2x64xf32>
    %775 = arith.divf %773, %774 : vector<2x64xf32>
    %776 = math.tanh %770 : vector<2x64xf32>
    %777 = vector.extract_strided_slice %775 {offsets = [0, 16], sizes = [2, 16], strides = [1, 1]} : vector<2x64xf32> to vector<2x16xf32>
    %778 = arith.mulf %777, %707 : vector<2x16xf32>
    %779 = vector.extract_strided_slice %775 {offsets = [0, 0], sizes = [2, 16], strides = [1, 1]} : vector<2x64xf32> to vector<2x16xf32>
    %780 = vector.extract_strided_slice %776 {offsets = [0, 32], sizes = [2, 16], strides = [1, 1]} : vector<2x64xf32> to vector<2x16xf32>
    %781 = arith.mulf %779, %780 : vector<2x16xf32>
    %782 = arith.addf %778, %781 : vector<2x16xf32>
    %783 = vector.extract_strided_slice %775 {offsets = [0, 48], sizes = [2, 16], strides = [1, 1]} : vector<2x64xf32> to vector<2x16xf32>
    %784 = math.tanh %782 : vector<2x16xf32>
    %785 = arith.mulf %783, %784 : vector<2x16xf32>
    %786 = tpu.concatenate %785, %729 in 1 : vector<2x16xf32>, vector<2x16xf32> -> vector<2x32xf32>
    %cst_135 = arith.constant dense<0.000000e+00> : vector<2x64xf32>
    %787 = tpu.matmul %786, %4, %cst_135 {dimension_numbers = #tpu.dot_dimension_numbers<[1], [0], [0], [1], [0, 0, 1, 1], [], []>} : vector<2x32xf32>, vector<32x64xf32>, vector<2x64xf32> -> vector<2x64xf32>
    %788 = vector.broadcast %15 : vector<1x64xf32> to vector<2x64xf32>
    %789 = arith.addf %787, %788 : vector<2x64xf32>
    %790 = arith.negf %789 : vector<2x64xf32>
    %791 = math.exp %790 : vector<2x64xf32>
    %cst_136 = arith.constant 1.000000e+00 : f32
    %792 = vector.broadcast %cst_136 : f32 to vector<2x64xf32>
    %793 = arith.addf %792, %791 : vector<2x64xf32>
    %794 = arith.divf %792, %793 : vector<2x64xf32>
    %795 = math.tanh %789 : vector<2x64xf32>
    %796 = vector.extract_strided_slice %794 {offsets = [0, 16], sizes = [2, 16], strides = [1, 1]} : vector<2x64xf32> to vector<2x16xf32>
    %797 = arith.mulf %796, %726 : vector<2x16xf32>
    %798 = vector.extract_strided_slice %794 {offsets = [0, 0], sizes = [2, 16], strides = [1, 1]} : vector<2x64xf32> to vector<2x16xf32>
    %799 = vector.extract_strided_slice %795 {offsets = [0, 32], sizes = [2, 16], strides = [1, 1]} : vector<2x64xf32> to vector<2x16xf32>
    %800 = arith.mulf %798, %799 : vector<2x16xf32>
    %801 = arith.addf %797, %800 : vector<2x16xf32>
    %802 = vector.extract_strided_slice %794 {offsets = [0, 48], sizes = [2, 16], strides = [1, 1]} : vector<2x64xf32> to vector<2x16xf32>
    %803 = math.tanh %801 : vector<2x16xf32>
    %804 = arith.mulf %802, %803 : vector<2x16xf32>
    %cst_137 = arith.constant dense<0.000000e+00> : vector<2x56xf32>
    %805 = tpu.matmul %804, %5, %cst_137 {dimension_numbers = #tpu.dot_dimension_numbers<[1], [0], [0], [1], [0, 0, 1, 1], [], []>} : vector<2x16xf32>, vector<16x56xf32>, vector<2x56xf32> -> vector<2x56xf32>
    %806 = vector.extract_strided_slice %805 {offsets = [0, 0], sizes = [2, 16], strides = [1, 1]} : vector<2x56xf32> to vector<2x16xf32>
    %807 = vector.broadcast %17 : vector<1x16xf32> to vector<2x16xf32>
    %808 = arith.addf %806, %807 : vector<2x16xf32>
    %809 = vector.shape_cast %808 : vector<2x16xf32> to vector<2x1x16xf32>
    "tpu.trace_start"() <{level = 10 : i32, message = "bqa,bah->bqh"}> : () -> ()
    %cst_138 = arith.constant dense<0.000000e+00> : vector<2x1x16xf32>
    %810 = tpu.matmul %809, %292, %cst_138 {dimension_numbers = #tpu.dot_dimension_numbers<[2], [1], [1], [2], [0, 0, 0, 1, 1, 2], [0], [0]>} : vector<2x1x16xf32>, vector<2x16x16xf32>, vector<2x1x16xf32> -> vector<2x1x16xf32>
    "tpu.trace_stop"() : () -> ()
    %811 = vector.shape_cast %810 : vector<2x1x16xf32> to vector<2x16xf32>
    %cst_139 = arith.constant dense<0.000000e+00> : vector<2x40xf32>
    %812 = tpu.matmul %811, %6, %cst_139 {dimension_numbers = #tpu.dot_dimension_numbers<[1], [0], [0], [1], [0, 0, 1, 1], [], []>} : vector<2x16xf32>, vector<16x40xf32>, vector<2x40xf32> -> vector<2x40xf32>
    %813 = vector.extract_strided_slice %805 {offsets = [0, 16], sizes = [2, 40], strides = [1, 1]} : vector<2x56xf32> to vector<2x40xf32>
    %814 = arith.addf %812, %813 : vector<2x40xf32>
    %815 = arith.addf %814, %295 : vector<2x40xf32>
    %cst_140 = arith.constant dense<0.000000e+00> : vector<2x32xf32>
    %816 = tpu.matmul %815, %8, %cst_140 {dimension_numbers = #tpu.dot_dimension_numbers<[1], [0], [0], [1], [0, 0, 1, 1], [], []>} : vector<2x40xf32>, vector<40x32xf32>, vector<2x32xf32> -> vector<2x32xf32>
    %817 = vector.broadcast %19 : vector<1x32xf32> to vector<2x32xf32>
    %818 = arith.addf %816, %817 : vector<2x32xf32>
    %819 = math.tanh %818 : vector<2x32xf32>
    %cst_141 = arith.constant dense<0xFF800000> : vector<2xf32>
    %820 = vector.multi_reduction <maximumf>, %819, %cst_141 [1] : vector<2x32xf32> to vector<2xf32>
    %821 = vector.shape_cast %820 : vector<2xf32> to vector<2x1xf32>
    %822 = vector.broadcast %821 : vector<2x1xf32> to vector<2x32xf32>
    %823 = arith.subf %819, %822 : vector<2x32xf32>
    %824 = math.exp %823 : vector<2x32xf32>
    %cst_142 = arith.constant dense<0.000000e+00> : vector<2xf32>
    %825 = vector.multi_reduction <add>, %824, %cst_142 [1] : vector<2x32xf32> to vector<2xf32>
    %826 = vector.shape_cast %825 : vector<2xf32> to vector<2x1xf32>
    %827 = math.log %826 : vector<2x1xf32>
    %828 = vector.broadcast %827 : vector<2x1xf32> to vector<2x32xf32>
    %829 = arith.subf %823, %828 : vector<2x32xf32>
    %cst_143 = arith.constant dense<0xFF800000> : vector<2xf32>
    %830 = vector.multi_reduction <maximumf>, %818, %cst_143 [1] : vector<2x32xf32> to vector<2xf32>
    %831 = vector.shape_cast %830 : vector<2xf32> to vector<2x1xf32>
    %832 = vector.broadcast %831 : vector<2x1xf32> to vector<2x32xf32>
    %833 = arith.cmpf oeq, %818, %832 : vector<2x32xf32>
    %c32_i32_144 = arith.constant 32 : i32
    %834 = vector.broadcast %c32_i32_144 : i32 to vector<2x32xi32>
    %835 = arith.select %833, %296, %834 : vector<2x32xi1>, vector<2x32xi32>
    %cst_145 = arith.constant dense<2147483647> : vector<2xi32>
    %836 = vector.multi_reduction <minsi>, %835, %cst_145 [1] : vector<2x32xi32> to vector<2xi32>
    %837 = vector.shape_cast %836 : vector<2xi32> to vector<2x1xi32>
    %838 = vector.broadcast %837 : vector<2x1xi32> to vector<2x32xi32>
    %839 = arith.cmpi eq, %296, %838 : vector<2x32xi32>
    %840 = arith.extui %839 : vector<2x32xi1> to vector<2x32xi32>
    %841 = arith.sitofp %840 : vector<2x32xi32> to vector<2x32xf32>
    %842 = tpu.concatenate %841, %785 in 1 : vector<2x32xf32>, vector<2x16xf32> -> vector<2x48xf32>
    %cst_146 = arith.constant dense<0.000000e+00> : vector<2x64xf32>
    %843 = tpu.matmul %842, %3, %cst_146 {dimension_numbers = #tpu.dot_dimension_numbers<[1], [0], [0], [1], [0, 0, 1, 1], [], []>} : vector<2x48xf32>, vector<48x64xf32>, vector<2x64xf32> -> vector<2x64xf32>
    %844 = vector.broadcast %14 : vector<1x64xf32> to vector<2x64xf32>
    %845 = arith.addf %843, %844 : vector<2x64xf32>
    %846 = arith.negf %845 : vector<2x64xf32>
    %847 = math.exp %846 : vector<2x64xf32>
    %cst_147 = arith.constant 1.000000e+00 : f32
    %848 = vector.broadcast %cst_147 : f32 to vector<2x64xf32>
    %849 = arith.addf %848, %847 : vector<2x64xf32>
    %850 = arith.divf %848, %849 : vector<2x64xf32>
    %851 = math.tanh %845 : vector<2x64xf32>
    %852 = vector.extract_strided_slice %850 {offsets = [0, 16], sizes = [2, 16], strides = [1, 1]} : vector<2x64xf32> to vector<2x16xf32>
    %853 = arith.mulf %852, %782 : vector<2x16xf32>
    %854 = vector.extract_strided_slice %850 {offsets = [0, 0], sizes = [2, 16], strides = [1, 1]} : vector<2x64xf32> to vector<2x16xf32>
    %855 = vector.extract_strided_slice %851 {offsets = [0, 32], sizes = [2, 16], strides = [1, 1]} : vector<2x64xf32> to vector<2x16xf32>
    %856 = arith.mulf %854, %855 : vector<2x16xf32>
    %857 = arith.addf %853, %856 : vector<2x16xf32>
    %858 = vector.extract_strided_slice %850 {offsets = [0, 48], sizes = [2, 16], strides = [1, 1]} : vector<2x64xf32> to vector<2x16xf32>
    %859 = math.tanh %857 : vector<2x16xf32>
    %860 = arith.mulf %858, %859 : vector<2x16xf32>
    %861 = tpu.concatenate %860, %804 in 1 : vector<2x16xf32>, vector<2x16xf32> -> vector<2x32xf32>
    %cst_148 = arith.constant dense<0.000000e+00> : vector<2x64xf32>
    %862 = tpu.matmul %861, %4, %cst_148 {dimension_numbers = #tpu.dot_dimension_numbers<[1], [0], [0], [1], [0, 0, 1, 1], [], []>} : vector<2x32xf32>, vector<32x64xf32>, vector<2x64xf32> -> vector<2x64xf32>
    %863 = vector.broadcast %15 : vector<1x64xf32> to vector<2x64xf32>
    %864 = arith.addf %862, %863 : vector<2x64xf32>
    %865 = arith.negf %864 : vector<2x64xf32>
    %866 = math.exp %865 : vector<2x64xf32>
    %cst_149 = arith.constant 1.000000e+00 : f32
    %867 = vector.broadcast %cst_149 : f32 to vector<2x64xf32>
    %868 = arith.addf %867, %866 : vector<2x64xf32>
    %869 = arith.divf %867, %868 : vector<2x64xf32>
    %870 = math.tanh %864 : vector<2x64xf32>
    %871 = vector.extract_strided_slice %869 {offsets = [0, 16], sizes = [2, 16], strides = [1, 1]} : vector<2x64xf32> to vector<2x16xf32>
    %872 = arith.mulf %871, %801 : vector<2x16xf32>
    %873 = vector.extract_strided_slice %869 {offsets = [0, 0], sizes = [2, 16], strides = [1, 1]} : vector<2x64xf32> to vector<2x16xf32>
    %874 = vector.extract_strided_slice %870 {offsets = [0, 32], sizes = [2, 16], strides = [1, 1]} : vector<2x64xf32> to vector<2x16xf32>
    %875 = arith.mulf %873, %874 : vector<2x16xf32>
    %876 = arith.addf %872, %875 : vector<2x16xf32>
    %877 = vector.extract_strided_slice %869 {offsets = [0, 48], sizes = [2, 16], strides = [1, 1]} : vector<2x64xf32> to vector<2x16xf32>
    %878 = math.tanh %876 : vector<2x16xf32>
    %879 = arith.mulf %877, %878 : vector<2x16xf32>
    %cst_150 = arith.constant dense<0.000000e+00> : vector<2x56xf32>
    %880 = tpu.matmul %879, %5, %cst_150 {dimension_numbers = #tpu.dot_dimension_numbers<[1], [0], [0], [1], [0, 0, 1, 1], [], []>} : vector<2x16xf32>, vector<16x56xf32>, vector<2x56xf32> -> vector<2x56xf32>
    %881 = vector.extract_strided_slice %880 {offsets = [0, 0], sizes = [2, 16], strides = [1, 1]} : vector<2x56xf32> to vector<2x16xf32>
    %882 = vector.broadcast %17 : vector<1x16xf32> to vector<2x16xf32>
    %883 = arith.addf %881, %882 : vector<2x16xf32>
    %884 = vector.shape_cast %883 : vector<2x16xf32> to vector<2x1x16xf32>
    "tpu.trace_start"() <{level = 10 : i32, message = "bqa,bah->bqh"}> : () -> ()
    %cst_151 = arith.constant dense<0.000000e+00> : vector<2x1x16xf32>
    %885 = tpu.matmul %884, %292, %cst_151 {dimension_numbers = #tpu.dot_dimension_numbers<[2], [1], [1], [2], [0, 0, 0, 1, 1, 2], [0], [0]>} : vector<2x1x16xf32>, vector<2x16x16xf32>, vector<2x1x16xf32> -> vector<2x1x16xf32>
    "tpu.trace_stop"() : () -> ()
    %886 = vector.shape_cast %885 : vector<2x1x16xf32> to vector<2x16xf32>
    %cst_152 = arith.constant dense<0.000000e+00> : vector<2x40xf32>
    %887 = tpu.matmul %886, %6, %cst_152 {dimension_numbers = #tpu.dot_dimension_numbers<[1], [0], [0], [1], [0, 0, 1, 1], [], []>} : vector<2x16xf32>, vector<16x40xf32>, vector<2x40xf32> -> vector<2x40xf32>
    %888 = vector.extract_strided_slice %880 {offsets = [0, 16], sizes = [2, 40], strides = [1, 1]} : vector<2x56xf32> to vector<2x40xf32>
    %889 = arith.addf %887, %888 : vector<2x40xf32>
    %890 = arith.addf %889, %295 : vector<2x40xf32>
    %cst_153 = arith.constant dense<0.000000e+00> : vector<2x32xf32>
    %891 = tpu.matmul %890, %8, %cst_153 {dimension_numbers = #tpu.dot_dimension_numbers<[1], [0], [0], [1], [0, 0, 1, 1], [], []>} : vector<2x40xf32>, vector<40x32xf32>, vector<2x32xf32> -> vector<2x32xf32>
    %892 = vector.broadcast %19 : vector<1x32xf32> to vector<2x32xf32>
    %893 = arith.addf %891, %892 : vector<2x32xf32>
    %894 = math.tanh %893 : vector<2x32xf32>
    %cst_154 = arith.constant dense<0xFF800000> : vector<2xf32>
    %895 = vector.multi_reduction <maximumf>, %894, %cst_154 [1] : vector<2x32xf32> to vector<2xf32>
    %896 = vector.shape_cast %895 : vector<2xf32> to vector<2x1xf32>
    %897 = vector.broadcast %896 : vector<2x1xf32> to vector<2x32xf32>
    %898 = arith.subf %894, %897 : vector<2x32xf32>
    %899 = math.exp %898 : vector<2x32xf32>
    %cst_155 = arith.constant dense<0.000000e+00> : vector<2xf32>
    %900 = vector.multi_reduction <add>, %899, %cst_155 [1] : vector<2x32xf32> to vector<2xf32>
    %901 = vector.shape_cast %900 : vector<2xf32> to vector<2x1xf32>
    %902 = math.log %901 : vector<2x1xf32>
    %903 = vector.broadcast %902 : vector<2x1xf32> to vector<2x32xf32>
    %904 = arith.subf %898, %903 : vector<2x32xf32>
    %905 = tpu.concatenate %300, %379, %454, %529, %604, %679, %754, %829, %904 in 1 : vector<2x32xf32>, vector<2x32xf32>, vector<2x32xf32>, vector<2x32xf32>, vector<2x32xf32>, vector<2x32xf32>, vector<2x32xf32>, vector<2x32xf32>, vector<2x32xf32> -> vector<2x288xf32>
    %c0_156 = arith.constant 0 : index
    %c0_157 = arith.constant 0 : index
    %906 = vector.load %arg3[%c0_156, %c0_157] : memref<2x288xf32, #tpu.memory_space<vmem>>, vector<2x288xf32>
    tpu.vector_store %arg3[%c0_156, %c0_157], %905 {strides = array<i32>} : memref<2x288xf32, #tpu.memory_space<vmem>>, vector<2x288xf32>,
    return
  }
}

</mosaic_0001>

<bundles_post_ra>
// kernel: tpu_custom_call.1
= control target key start
LH: loop header
LB: loop body
LE: loop exit
PB: predicated region body
PF: predicated region fallthrough
CT: control target
= control target key end

     0   :  { %8 = vsyncpa [#allocation3], 0  ;;  %s10001_s0 = inlined_call_operand.hbm [shape: f32[16,16], index: 0, kind: input, shape index: {}]   ;;  %s10002_s1 = inlined_call_operand.hbm [shape: f32[2,8], index: 1, kind: input, shape index: {}]   ;;  %s10003_s2 = inlined_call_operand.hbm [shape: f32[280,128], index: 2, kind: input, shape index: {}]   ;;  %s10004_s3 = inlined_call_operand.hbm [shape: f32[2,288], index: 3, kind: output, shape index: {}]  }
   0x1   :  { %9 = vsyncpa [#allocation6], 0 }
   0x2   :  { %10 = vsyncpa [#allocation4], 0  ;;  %s8571_s12 = smov [#allocation5]   ;;  %s8572_s14 = smov [#allocation2]  }
   0x3   :  { %s29_s13 = sshll.u32 %s8571_s12, 4  ;;  %s16_s15 = sshll.u32 %s8572_s14, 4  ;;  %s30_s13 = int_to_ptr.vmem [resolvable:$true] %s29_s13  ;;  %s17_s15 = int_to_ptr.vmem [resolvable:$true] %s16_s15 }
   0x4   :  { %s8493_s16 = scalar_lea.vmem %s30_s13, 32  ;;  %p8498_p1 = scmp.lt.s32.totalorder %s30_s13, %s30_s13 }
   0x5   :  { %p8494_p0 = scmp.ne.s32.totalorder %s30_s13, %s8493_s16  ;;  %p8499_p2 = scmp.lt.s32.totalorder %s8493_s16, %s8493_s16 }
   0x7   :  { %p8500_p3 = por %p8499_p2, %p8498_p1 }
   0x9   :  { %p8501_p4 = pnand %p8500_p3, %p8494_p0 }
   0xb   :  { %8504 = shalt.err (!%p8501_p4)
}
   0xc   :  { %32 = dma.hbm_to_vmem [thread:$0]  %s10002_s1, 32, %s30_s13, [#allocation6]  }
   0xd   :  { %s8513_s19 = scalar_lea.vmem %s17_s15, 256  ;;  %p8518_p6 = scmp.lt.s32.totalorder %s17_s15, %s17_s15 }
   0xe   :  { %p8514_p5 = scmp.ne.s32.totalorder %s17_s15, %s8513_s19  ;;  %p8519_p7 = scmp.lt.s32.totalorder %s8513_s19, %s8513_s19 }
  0x10   :  { %p8520_p8 = por %p8519_p7, %p8518_p6 }
  0x12   :  { %p8521_p9 = pnand %p8520_p8, %p8514_p5 }
  0x14   :  { %8524 = shalt.err (!%p8521_p9)
}
  0x15   :  { %s8573_s20 = smov 128   ;;  %s8574_s21 = smov 8  }
  0x16   :  { %22 = dma.hbm_to_vmem [thread:$0]  %s10001_s0, 256, %s17_s15, [#allocation3], %s8573_s20, %s8573_s20, %s8574_s21  }
  0x17   :  { %s8575_s24 = smov [#allocation7]  }
  0x18   :  { %s38_s25 = sshll.u32 %s8575_s24, 4  ;;  %s39_s25 = int_to_ptr.vmem [resolvable:$true] %s38_s25 }
  0x19   :  { %s8533_s26 = scalar_lea.vmem %s39_s25, 4480  ;;  %p8538_p11 = scmp.lt.s32.totalorder %s39_s25, %s39_s25 }
  0x1a   :  { %p8534_p10 = scmp.ne.s32.totalorder %s39_s25, %s8533_s26  ;;  %p8539_p12 = scmp.lt.s32.totalorder %s8533_s26, %s8533_s26 }
  0x1c   :  { %p8540_p13 = por %p8539_p12, %p8538_p11 }
  0x1e   :  { %p8541_p0 = pnand %p8540_p13, %p8534_p10 }
  0x20   :  { %8544 = shalt.err (!%p8541_p0)
}
  0x21   :  { %44 = dma.hbm_to_vmem [thread:$0]  %s10003_s2, 4480, %s39_s25, [#allocation6], %s8573_s20, %s8573_s20, %s8574_s21  }
  0x22   :  { %8565 = dma.done.wait [#allocation3], 256  }
  0x23   :  { %8566 = vsyncadd [#allocation3], 4294967040 }
  0x24   :  { %8567 = dma.done.wait [#allocation6], 4512  }
  0x25   :  { %8568 = vsyncadd [#allocation6], 4294962784  ;;  %v10005_v0 = vmov 0.0   ;;  %vm8577_vm0 = vmmov 0   ;;  %vm98_vm1 = vcmask 130048   ;;  %v55_v1 = vld [vmem:[#allocation7 + $0x8] sm:$0xff] }
  0x26   :  { %7542 = vmatprep.subr.mxu0 %v10005_v0  ;;  %7550 = vmatprep.mubr.msk.f32.mxu0 %vm8577_vm0, %v10005_v0  ;;  %v54_v2 = vld [vmem:[#allocation7] sm:$0xff]  ;;  %v96_v3 = vld [vmem:[#allocation2] sm:$0xff]  ;;  %v97_v4 = vld [vmem:[#allocation2 + $0x8] sm:$0xff]  ;;  %s8578_s0 = smov 64   ;;  %s8579_s2 = smov 32   ;;  %vm277_vm2 = vcmask 261120  }
  0x27   :  { %7528 = vmatprep.subr.mxu1 %v55_v1  ;;  %7532 = vmatprep.mubr.msk.f32.mxu1 %vm98_vm1, %v96_v3  ;;  %v57_v5 = vld [vmem:[#allocation7 + $0x18] sm:$0xff]  ;;  %v56_v7 = vld [vmem:[#allocation7 + $0x10] sm:$0xff]  ;;  %v8628_v9 = vld [vmem:[#allocation7 + $0x28] sm:$0xff]  ;;  %vm1120_vm3 = vcmask 1041408   ;;  %vm1122_vm4 = vcmask 1043456   ;;  %vm1124_vm5 = vcmask 1045504  }
  0x28   :  { %7529 = vmatpush3.msra.mxu1 %v55_v1  ;;  %v8620_v6 = vld [vmem:[#allocation7 + $0x38] sm:$0xff]  ;;  %v8624_v8 = vld [vmem:[#allocation7 + $0x30] sm:$0xff]  ;;  %v8632_v10 = vld [vmem:[#allocation7 + $0x20] sm:$0xff]  ;;  %s8580_s28 = smov 16   ;;  %vm1941_vm10 = vcmask 392192   ;;  %s8581_s29 = smov 96  }
  0x29   :  { %7530 = vmatprep.subr.mxu1 %v54_v2  ;;  %7543 = vmatpush3.msra.mxu0 %v8620_v6  ;;  %v7116_v17 = vld [vmem:[#allocation7 + $0x110] ss:$0 sm:$0xff]  ;;  %vm1834_vm11 = vcmask 64512   ;;  %s8582_s30 = smov 80   ;;  %s8583_s4 = smov 112   ;;  %vm2395_vm12 = vcmask 1041409  }
  0x2a   :  { %7531 = vmatpush3.msra.mxu1 %v54_v2  ;;  %7544 = vmatprep.subr.mxu0 %v10005_v0  ;;  %vm2478_vm13 = vcmask 326656   ;;  %vm2553_vm14 = vcmask 254976   ;;  %s8586_s5 = smov [#allocation8]  }
  0x2b   :  { %7533 = vmatmul.mubr.msk.f32.vlgmr.msra.gmra.mxu1 %vm98_vm1, %v97_v4  ;;  %7535 = vmatprep.subr.mxu1 %v57_v5  ;;  %s7102_s6 = sshll.u32 %s8586_s5, 4  ;;  %s7103_s6 = int_to_ptr.vmem [resolvable:$true] %s7102_s6 }
  0x2c   :  { %7536 = vmatpush3.msra.mxu1 %v57_v5  ;;  %7539 = vmatprep.mubr.msk.f32.mxu1 %vm98_vm1, %v96_v3  ;;  %s8545_s7 = scalar_lea.vmem %s7103_s6, 96  ;;  %p8550_p2 = scmp.lt.s32.totalorder %s7103_s6, %s7103_s6 }
  0x2d   :  { %7537 = vmatprep.subr.mxu1 %v56_v7  ;;  %7545 = vmatpush3.msra.mxu0 %v8624_v8  ;;  %p8546_p1 = scmp.ne.s32.totalorder %s7103_s6, %s8545_s7  ;;  %p8551_p3 = scmp.lt.s32.totalorder %s8545_s7, %s8545_s7 }
  0x2e   :  { %7538 = vmatpush3.msra.mxu1 %v56_v7  ;;  %7546 = vmatprep.subr.mxu0 %v10005_v0 }
  0x2f   :  { %7540 = vmatmul.mubr.msk.f32.vlgmr.msra.gmra.mxu1 %vm98_vm1, %v97_v4  ;;  %7547 = vmatpush3.msra.mxu0 %v8628_v9  ;;  %p8552_p4 = por %p8551_p3, %p8550_p2 }
  0x30   :  { %7548 = vmatprep.subr.mxu0 %v10005_v0  ;;  %7553 = vmatprep.subr.mxu1 %v10005_v0 }
  0x31   :  { %7549 = vmatpush3.msra.mxu0 %v8632_v10  ;;  %7554 = vmatpush3.msra.mxu1 %v8620_v6  ;;  %p8553_p5 = pnand %p8552_p4, %p8546_p1 }
  0x32   :  { %7551 = vmatmul.mubr.f32.vlgmr.msra.gmra.mxu0 %v10005_v0  ;;  %7555 = vmatprep.subr.mxu1 %v10005_v0 }
  0x33   :  { %7556 = vmatpush3.msra.mxu1 %v8624_v8  ;;  %7561 = vmatprep.mubr.msk.f32.mxu1 %vm8577_vm0, %v10005_v0 }
  0x34   :  { %7557 = vmatprep.subr.mxu1 %v10005_v0  ;;  %7564 = vmatprep.subr.mxu0 %v10005_v0 }
  0x35   :  { %7558 = vmatpush3.msra.mxu1 %v8628_v9  ;;  %7565 = vmatpush3.msra.mxu0 %v8620_v6 }
  0x36   :  { %7559 = vmatprep.subr.mxu1 %v10005_v0  ;;  %7566 = vmatprep.subr.mxu0 %v10005_v0 }
  0x37   :  { %7560 = vmatpush3.msra.mxu1 %v8632_v10  ;;  %7567 = vmatpush3.msra.mxu0 %v8624_v8 }
  0x38   :  { %7568 = vmatprep.subr.mxu0 %v10005_v0  ;;  %7572 = vmatprep.mubr.msk.f32.mxu0 %vm8577_vm0, %v10005_v0 }
  0x39   :  { %7569 = vmatpush3.msra.mxu0 %v8628_v9  ;;  %7575 = vmatprep.subr.mxu1 %v10005_v0 }
  0x3a   :  { %7570 = vmatprep.subr.mxu0 %v10005_v0 }
  0x3b   :  { %7571 = vmatpush3.msra.mxu0 %v8632_v10 }
  0x3c   :  { %7586 = vmatprep.subr.mxu0 %v10005_v0 }
  0xeb   :  { %v7534_v11 = vpop.f32.mrf.mxu1 }
  0xed   :  { %v171_v12 = vpop.f32.mrf.mxu1 }
  0xef   :  { %v7541_v13 = vpop.f32.mrf.mxu1 }
  0xf0   :  { %v256_v14 = vrot.slane %v7541_v13, 6  ;;  %v264_v15 = vrot.slane %v7541_v13, 2 }
  0xf1   :  { %v246_v16 = vpop.f32.mrf.mxu1 }
  0xf2   :  { %v258_v18 = vadd.f32 %v256_v14, %v171_v12  ;;  %v266_v19 = vadd.f32 %v264_v15, %v171_v12  ;;  %v269_v20 = vrot.slane %v246_v16, 6  ;;  %v273_v21 = vrot.slane %v246_v16, 2  ;;  %v347_v22 = vpop.f32.mrf.mxu0 }
  0xf4   :  { %v271_v23 = vadd.f32 %v7534_v11, %v269_v20  ;;  %v275_v24 = vadd.f32 %v7534_v11, %v273_v21  ;;  %v8661_v25 = vadd.f32 %v7116_v17, %v258_v18  ;;  %v7552_v26 = vpop.f32.mrf.mxu0  ;;  %v8663_v27 = vadd.f32 %v7116_v17, %v266_v19 }
  0xf6   :  { %v351_v28 = vadd.f32 %v347_v22, %v8661_v25  ;;  %v8666_v29 = vadd.f32 %v7116_v17, %v271_v23  ;;  %v8668_v30 = vadd.f32 %v7116_v17, %v275_v24 }
  0xf8   :  { %8208 = vtanh.f32 %v351_v28  ;;  %v7117_v32 = vmul.f32 -1.442695, %v351_v28 }
  0xfa   :  { %8210 = vpow2.f32 %v7117_v32 }
 0x105   :  { %v8209_v31 = vpop.eup %8208 }
 0x106   :  { %361 = vrot.lane.b32.xlu0 %v8209_v31, %s8578_s0 }
 0x107   :  { %v8211_v33 = vpop.eup %8210 }
 0x108   :  { %v355_v34 = vadd.f32 1.0, %v8211_v33 }
 0x10a   :  { %8212 = vrcp.f32 %v355_v34 }
 0x117   :  { %v8213_v35 = vpop.eup %8212 }
 0x118   :  { %v359_v38 = vmul.f32 0.0, %v8213_v35 }
 0x178   :  { %v362_v36 = vpop.permute.xlu0 %361 }
 0x179   :  { %v364_v37 = vmul.f32 %v8213_v35, %v362_v36 }
 0x17b   :  { %366 = vrot.lane.b32.xlu0 %v364_v37, %s8579_s2 }
 0x1ed   :  { %v367_v39 = vpop.permute.xlu0 %366 }
 0x1ee   :  { %v369_v40 = vadd.f32 %v367_v39, %v359_v38 }
 0x1f0   :  { %8214 = vtanh.f32 %v369_v40  ;;  %v463_v56 = vrot.slane %v369_v40, 6 }
 0x1fd   :  { %v8215_v41 = vpop.eup %8214 }
 0x1fe   :  { %372 = vrot.lane.b32.xlu1 %v8215_v41, %s8578_s0 }
 0x270   :  { %v373_v42 = vpop.permute.xlu1 %372 }
 0x271   :  { %v8673_v43 = vmul.f32 %v8213_v35, %v373_v42 }
 0x273   :  { %377 = vrot.lane.b32.xlu1 %v8673_v43, %s8579_s2 }
 0x2e5   :  { %v378_v44 = vpop.permute.xlu1 %377 }
 0x2e6   :  { %7562 = vmatmul.mubr.msk.f32.vlgmr.msra.gmra.mxu1 %vm277_vm2, %v378_v44 }
 0x2e7   :  { %7576 = vmatpush3.msra.mxu1 %v8620_v6  ;;  %7583 = vmatprep.mubr.msk.f32.mxu1 %vm8577_vm0, %v10005_v0 }
 0x2e8   :  { %7577 = vmatprep.subr.mxu1 %v10005_v0 }
 0x2e9   :  { %7578 = vmatpush3.msra.mxu1 %v8624_v8 }
 0x2ea   :  { %7579 = vmatprep.subr.mxu1 %v10005_v0 }
 0x2eb   :  { %7580 = vmatpush3.msra.mxu1 %v8628_v9 }
 0x2ec   :  { %7581 = vmatprep.subr.mxu1 %v10005_v0 }
 0x2ed   :  { %7582 = vmatpush3.msra.mxu1 %v8632_v10 }
 0x2ee   :  { %7597 = vmatprep.subr.mxu1 %v10005_v0 }
 0x3a6   :  { %v447_v45 = vpop.f32.mrf.mxu1 }
 0x3a7   :  { %v452_v46 = vrot.slane %v447_v45, 6 }
 0x3a8   :  { %v7563_v47 = vpop.f32.mrf.mxu1 }
 0x3a9   :  { %v454_v48 = vadd.f32 %v452_v46, %v8663_v27 }
 0x3ab   :  { %8216 = vtanh.f32 %v454_v48  ;;  %v7119_v50 = vmul.f32 -1.442695, %v454_v48 }
 0x3ad   :  { %8218 = vpow2.f32 %v7119_v50 }
 0x3b8   :  { %v8217_v49 = vpop.eup %8216 }
 0x3b9   :  { %467 = vrot.lane.b32.xlu0 %v8217_v49, %s8578_s0 }
 0x3ba   :  { %v8219_v51 = vpop.eup %8218 }
 0x3bb   :  { %v458_v52 = vadd.f32 1.0, %v8219_v51 }
 0x3bd   :  { %8220 = vrcp.f32 %v458_v52 }
 0x3ca   :  { %v8221_v53 = vpop.eup %8220 }
 0x3cb   :  { %v465_v57 = vmul.f32 %v8221_v53, %v463_v56 }
 0x42b   :  { %v468_v54 = vpop.permute.xlu0 %467 }
 0x42c   :  { %v470_v55 = vmul.f32 %v8221_v53, %v468_v54 }
 0x42e   :  { %472 = vrot.lane.b32.xlu1 %v470_v55, %s8579_s2 }
 0x4a0   :  { %v473_v58 = vpop.permute.xlu1 %472 }
 0x4a1   :  { %v475_v59 = vadd.f32 %v473_v58, %v465_v57 }
 0x4a3   :  { %8222 = vtanh.f32 %v475_v59  ;;  %v570_v17 = vrot.slane %v475_v59, 6 }
 0x4b0   :  { %v8223_v60 = vpop.eup %8222 }
 0x4b1   :  { %478 = vrot.lane.b32.xlu0 %v8223_v60, %s8578_s0 }
 0x523   :  { %v479_v61 = vpop.permute.xlu0 %478 }
 0x524   :  { %v8692_v62 = vmul.f32 %v8221_v53, %v479_v61 }
 0x526   :  { %v483_v63 = vrot.slane %v8692_v62, 2  ;;  %v1121_v24 = vsel %vm1120_vm3, %v8673_v43, %v8692_v62  ;;  %v1141_v52 = vrot.slane %v8692_v62, 6 }
 0x528   :  { %484 = vrot.lane.b32.xlu1 %v483_v63, %s8579_s2 }
 0x59a   :  { %v485_v1 = vpop.permute.xlu1 %484 }
 0x59b   :  { %7573 = vmatmul.mubr.msk.f32.vlgmr.msra.gmra.mxu0 %vm277_vm2, %v485_v1 }
 0x59c   :  { %7587 = vmatpush3.msra.mxu0 %v8620_v6  ;;  %7594 = vmatprep.mubr.msk.f32.mxu0 %vm8577_vm0, %v10005_v0 }
 0x59d   :  { %7588 = vmatprep.subr.mxu0 %v10005_v0 }
 0x59e   :  { %7589 = vmatpush3.msra.mxu0 %v8624_v8 }
 0x59f   :  { %7590 = vmatprep.subr.mxu0 %v10005_v0 }
 0x5a0   :  { %7591 = vmatpush3.msra.mxu0 %v8628_v9 }
 0x5a1   :  { %7592 = vmatprep.subr.mxu0 %v10005_v0 }
 0x5a2   :  { %7593 = vmatpush3.msra.mxu0 %v8632_v10 }
 0x5a3   :  { %7608 = vmatprep.subr.mxu0 %v10005_v0 }
 0x65b   :  { %v554_v2 = vpop.f32.mrf.mxu0 }
 0x65c   :  { %v559_v3 = vrot.slane %v554_v2, 4 }
 0x65d   :  { %v7574_v4 = vpop.f32.mrf.mxu0 }
 0x65e   :  { %v561_v5 = vadd.f32 %v559_v3, %v8661_v25 }
 0x660   :  { %8224 = vtanh.f32 %v561_v5  ;;  %v7121_v11 = vmul.f32 -1.442695, %v561_v5 }
 0x662   :  { %8226 = vpow2.f32 %v7121_v11 }
 0x66d   :  { %v8225_v7 = vpop.eup %8224 }
 0x66e   :  { %574 = vrot.lane.b32.xlu0 %v8225_v7, %s8578_s0 }
 0x66f   :  { %v8227_v12 = vpop.eup %8226 }
 0x670   :  { %v565_v13 = vadd.f32 1.0, %v8227_v12 }
 0x672   :  { %8228 = vrcp.f32 %v565_v13 }
 0x67f   :  { %v8229_v14 = vpop.eup %8228 }
 0x680   :  { %v572_v18 = vmul.f32 %v8229_v14, %v570_v17 }
 0x6e0   :  { %v575_v15 = vpop.permute.xlu0 %574 }
 0x6e1   :  { %v577_v16 = vmul.f32 %v8229_v14, %v575_v15 }
 0x6e3   :  { %579 = vrot.lane.b32.xlu1 %v577_v16, %s8579_s2 }
 0x755   :  { %v580_v19 = vpop.permute.xlu1 %579 }
 0x756   :  { %v582_v20 = vadd.f32 %v580_v19, %v572_v18 }
 0x758   :  { %8230 = vtanh.f32 %v582_v20  ;;  %v677_v42 = vrot.slane %v582_v20, 6 }
 0x765   :  { %v8231_v21 = vpop.eup %8230 }
 0x766   :  { %585 = vrot.lane.b32.xlu0 %v8231_v21, %s8578_s0 }
 0x7d8   :  { %v586_v22 = vpop.permute.xlu0 %585 }
 0x7d9   :  { %v588_v23 = vmul.f32 %v8229_v14, %v586_v22 }
 0x7db   :  { %v590_v25 = vrot.slane %v588_v23, 4  ;;  %v1123_v26 = vsel %vm1122_vm4, %v1121_v24, %v588_v23  ;;  %v1139_v49 = vrot.slane %v588_v23, 2 }
 0x7dd   :  { %591 = vrot.lane.b32.xlu1 %v590_v25, %s8579_s2 }
 0x84f   :  { %v592_v28 = vpop.permute.xlu1 %591 }
 0x850   :  { %7584 = vmatmul.mubr.msk.f32.vlgmr.msra.gmra.mxu1 %vm277_vm2, %v592_v28 }
 0x851   :  { %7598 = vmatpush3.msra.mxu1 %v8620_v6  ;;  %7605 = vmatprep.mubr.msk.f32.mxu1 %vm8577_vm0, %v10005_v0 }
 0x852   :  { %7599 = vmatprep.subr.mxu1 %v10005_v0 }
 0x853   :  { %7600 = vmatpush3.msra.mxu1 %v8624_v8 }
 0x854   :  { %7601 = vmatprep.subr.mxu1 %v10005_v0 }
 0x855   :  { %7602 = vmatpush3.msra.mxu1 %v8628_v9 }
 0x856   :  { %7603 = vmatprep.subr.mxu1 %v10005_v0 }
 0x857   :  { %7604 = vmatpush3.msra.mxu1 %v8632_v10 }
 0x858   :  { %7619 = vmatprep.subr.mxu1 %v10005_v0 }
 0x910   :  { %v661_v31 = vpop.f32.mrf.mxu1 }
 0x911   :  { %v666_v32 = vrot.slane %v661_v31, 2 }
 0x912   :  { %v7585_v33 = vpop.f32.mrf.mxu1 }
 0x913   :  { %v668_v34 = vadd.f32 %v666_v32, %v8663_v27 }
 0x915   :  { %8232 = vtanh.f32 %v668_v34  ;;  %v7123_v36 = vmul.f32 -1.442695, %v668_v34 }
 0x917   :  { %8234 = vpow2.f32 %v7123_v36 }
 0x922   :  { %v8233_v35 = vpop.eup %8232 }
 0x923   :  { %681 = vrot.lane.b32.xlu0 %v8233_v35, %s8578_s0 }
 0x924   :  { %v8235_v37 = vpop.eup %8234 }
 0x925   :  { %v672_v38 = vadd.f32 1.0, %v8235_v37 }
 0x927   :  { %8236 = vrcp.f32 %v672_v38 }
 0x934   :  { %v8237_v39 = vpop.eup %8236 }
 0x935   :  { %v679_v44 = vmul.f32 %v8237_v39, %v677_v42 }
 0x995   :  { %v682_v40 = vpop.permute.xlu0 %681 }
 0x996   :  { %v684_v41 = vmul.f32 %v8237_v39, %v682_v40 }
 0x998   :  { %686 = vrot.lane.b32.xlu1 %v684_v41, %s8579_s2 }
 0xa0a   :  { %v687_v45 = vpop.permute.xlu1 %686 }
 0xa0b   :  { %v689_v46 = vadd.f32 %v687_v45, %v679_v44 }
 0xa0d   :  { %8238 = vtanh.f32 %v689_v46  ;;  %v781_v3 = vrot.slane %v689_v46, 6 }
 0xa1a   :  { %v8239_v27 = vpop.eup %8238 }
 0xa1b   :  { %692 = vrot.lane.b32.xlu0 %v8239_v27, %s8578_s0 }
 0xa8d   :  { %v693_v47 = vpop.permute.xlu0 %692 }
 0xa8e   :  { %v695_v48 = vmul.f32 %v8237_v39, %v693_v47 }
 0xa90   :  { %v697_v50 = vrot.slane %v695_v48, 6  ;;  %v8732_v51 = vsel %vm1124_vm5, %v1123_v26, %v695_v48 }
 0xa92   :  { %698 = vrot.lane.b32.xlu1 %v697_v50, %s8579_s2  ;;  %v1148_v53 = vsel %vm1120_vm3, %v697_v50, %v1139_v49 }
 0xa93   :  { %v8738_v54 = vsel %vm1122_vm4, %v1148_v53, %v1141_v52 }
 0xb04   :  { %v699_v55 = vpop.permute.xlu1 %698 }
 0xb05   :  { %7595 = vmatmul.mubr.msk.f32.vlgmr.msra.gmra.mxu0 %vm277_vm2, %v699_v55 }
 0xb06   :  { %7609 = vmatpush3.msra.mxu0 %v8620_v6  ;;  %7616 = vmatprep.mubr.msk.f32.mxu0 %vm8577_vm0, %v10005_v0 }
 0xb07   :  { %7610 = vmatprep.subr.mxu0 %v10005_v0 }
 0xb08   :  { %7611 = vmatpush3.msra.mxu0 %v8624_v8 }
 0xb09   :  { %7612 = vmatprep.subr.mxu0 %v10005_v0 }
 0xb0a   :  { %7613 = vmatpush3.msra.mxu0 %v8628_v9 }
 0xb0b   :  { %7614 = vmatprep.subr.mxu0 %v10005_v0 }
 0xb0c   :  { %7615 = vmatpush3.msra.mxu0 %v8632_v10 }
 0xbc5   :  { %v768_v56 = vpop.f32.mrf.mxu0 }
 0xbc6   :  { %v772_v57 = vadd.f32 %v768_v56, %v8666_v29 }
 0xbc7   :  { %v7596_v58 = vpop.f32.mrf.mxu0 }
 0xbc8   :  { %8240 = vtanh.f32 %v772_v57  ;;  %v7125_v60 = vmul.f32 -1.442695, %v772_v57 }
 0xbca   :  { %8242 = vpow2.f32 %v7125_v60 }
 0xbd5   :  { %v8241_v59 = vpop.eup %8240 }
 0xbd6   :  { %785 = vrot.lane.b32.xlu0 %v8241_v59, %s8578_s0 }
 0xbd7   :  { %v8243_v61 = vpop.eup %8242 }
 0xbd8   :  { %v776_v62 = vadd.f32 1.0, %v8243_v61 }
 0xbda   :  { %8244 = vrcp.f32 %v776_v62 }
 0xbe7   :  { %v8245_v63 = vpop.eup %8244 }
 0xbe8   :  { %v783_v4 = vmul.f32 %v8245_v63, %v781_v3 }
 0xc48   :  { %v786_v1 = vpop.permute.xlu0 %785 }
 0xc49   :  { %v788_v2 = vmul.f32 %v8245_v63, %v786_v1 }
 0xc4b   :  { %790 = vrot.lane.b32.xlu1 %v788_v2, %s8579_s2 }
 0xcbd   :  { %v791_v5 = vpop.permute.xlu1 %790 }
 0xcbe   :  { %v793_v7 = vadd.f32 %v791_v5, %v783_v4 }
 0xcc0   :  { %8246 = vtanh.f32 %v793_v7 }
 0xccd   :  { %v8247_v11 = vpop.eup %8246 }
 0xcce   :  { %796 = vrot.lane.b32.xlu0 %v8247_v11, %s8578_s0 }
 0xd40   :  { %v797_v12 = vpop.permute.xlu0 %796 }
 0xd41   :  { %v8754_v13 = vmul.f32 %v8245_v63, %v797_v12 }
 0xd43   :  { %801 = vrot.lane.b32.xlu1 %v8754_v13, %s8579_s2 }
 0xdb5   :  { %v802_v14 = vpop.permute.xlu1 %801 }
 0xdb6   :  { %7606 = vmatmul.mubr.msk.f32.vlgmr.msra.gmra.mxu1 %vm277_vm2, %v802_v14  ;;  %v83_v14 = vld [vmem:[#allocation7 + $0xe8] sm:$0xff] }
 0xdb7   :  { %7620 = vmatpush3.msra.mxu1 %v8620_v6  ;;  %7627 = vmatprep.mubr.msk.f32.mxu1 %vm8577_vm0, %v10005_v0 }
 0xdb8   :  { %7621 = vmatprep.subr.mxu1 %v10005_v0 }
 0xdb9   :  { %7622 = vmatpush3.msra.mxu1 %v8624_v8 }
 0xdba   :  { %7623 = vmatprep.subr.mxu1 %v10005_v0 }
 0xdbb   :  { %7624 = vmatpush3.msra.mxu1 %v8628_v9 }
 0xdbc   :  { %7625 = vmatprep.subr.mxu1 %v10005_v0 }
 0xdbd   :  { %7626 = vmatpush3.msra.mxu1 %v8632_v10  ;;  %v887_v10 = vrot.slane %v793_v7, 6 }
 0xdbe   :  { %7637 = vmatprep.subr.mxu1 %v83_v14 }
 0xe76   :  { %v871_v15 = vpop.f32.mrf.mxu1 }
 0xe77   :  { %v876_v16 = vrot.slane %v871_v15, 6  ;;  %v82_v15 = vld [vmem:[#allocation7 + $0xe0] sm:$0xff] }
 0xe78   :  { %v7607_v17 = vpop.f32.mrf.mxu1 }
 0xe79   :  { %v878_v6 = vadd.f32 %v876_v16, %v8668_v30  ;;  %v85_v16 = vld [vmem:[#allocation7 + $0xf8] sm:$0xff]  ;;  %v84_v17 = vld [vmem:[#allocation7 + $0xf0] sm:$0xff] }
 0xe7a   :  { %7630 = vmatprep.subr.mxu0 %v85_v16 }
 0xe7b   :  { %8248 = vtanh.f32 %v878_v6  ;;  %v7127_v19 = vmul.f32 -1.442695, %v878_v6 }
 0xe7d   :  { %8250 = vpow2.f32 %v7127_v19 }
 0xe88   :  { %v8249_v18 = vpop.eup %8248 }
 0xe89   :  { %891 = vrot.lane.b32.xlu0 %v8249_v18, %s8578_s0 }
 0xe8a   :  { %v8251_v8 = vpop.eup %8250 }
 0xe8b   :  { %v882_v20 = vadd.f32 1.0, %v8251_v8 }
 0xe8d   :  { %8252 = vrcp.f32 %v882_v20 }
 0xe9a   :  { %v8253_v21 = vpop.eup %8252 }
 0xe9b   :  { %v889_v23 = vmul.f32 %v8253_v21, %v887_v10 }
 0xefb   :  { %v892_v9 = vpop.permute.xlu0 %891 }
 0xefc   :  { %v894_v22 = vmul.f32 %v8253_v21, %v892_v9  ;;  %v1136_v9 = vrot.slane %v8754_v13, 2 }
 0xefe   :  { %896 = vrot.lane.b32.xlu1 %v894_v22, %s8579_s2 }
 0xf70   :  { %v897_v24 = vpop.permute.xlu1 %896 }
 0xf71   :  { %v899_v25 = vadd.f32 %v897_v24, %v889_v23  ;;  %v1143_v24 = vrot.slane %v8673_v43, 2 }
 0xf73   :  { %8254 = vtanh.f32 %v899_v25  ;;  %v994_v46 = vrot.slane %v899_v25, 6  ;;  %v1150_v25 = vsel %vm1124_vm5, %v8738_v54, %v1143_v24 }
 0xf80   :  { %v8255_v26 = vpop.eup %8254 }
 0xf81   :  { %902 = vrot.lane.b32.xlu0 %v8255_v26, %s8578_s0  ;;  %v1412_v26 = vlaneseq }
 0xff3   :  { %v903_v28 = vpop.permute.xlu0 %902 }
 0xff4   :  { %v8772_v31 = vmul.f32 %v8253_v21, %v903_v28  ;;  %v8808_v28 = vand.u32 127, %v1412_v26 }
 0xff6   :  { %v907_v32 = vrot.slane %v8772_v31, 2  ;;  %v1126_v52 = vsel %vm1120_vm3, %v8754_v13, %v8772_v31  ;;  %v1134_v20 = vrot.slane %v8772_v31, 6  ;;  %vm1910_vm6 = vcmp.eq.s32.totalorder %v8808_v28, 1 }
 0xff7   :  { %v8812_v13 = vsel %vm1910_vm6, 1.0, %v10005_v0 }
 0xff8   :  { %908 = vrot.lane.b32.xlu1 %v907_v32, %s8579_s2  ;;  %10010 = vst [vmem:[#allocation12_spill] sm:$0xff] %v8812_v13  ;;  %v1913_v31 = vsel %vm277_vm2, %v8812_v13, -inf }
0x106a   :  { %v909_v33 = vpop.permute.xlu1 %908 }
0x106b   :  { %7617 = vmatmul.mubr.msk.f32.vlgmr.msra.gmra.mxu0 %vm277_vm2, %v909_v33 }
0x106c   :  { %7631 = vmatpush3.msra.mxu0 %v85_v16 }
0x106d   :  { %7632 = vmatprep.subr.mxu0 %v84_v17 }
0x106e   :  { %7633 = vmatpush3.msra.mxu0 %v84_v17 }
0x112b   :  { %v978_v34 = vpop.f32.mrf.mxu0 }
0x112c   :  { %v983_v35 = vrot.slane %v978_v34, 4 }
0x112d   :  { %v7618_v36 = vpop.f32.mrf.mxu0 }
0x112e   :  { %v985_v37 = vadd.f32 %v983_v35, %v8666_v29 }
0x1130   :  { %8256 = vtanh.f32 %v985_v37  ;;  %v7129_v39 = vmul.f32 -1.442695, %v985_v37 }
0x1132   :  { %8258 = vpow2.f32 %v7129_v39  ;;  %v86_v39 = vld [vmem:[#allocation7 + $0x100] sm:$0xff] }
0x113d   :  { %v8257_v38 = vpop.eup %8256 }
0x113e   :  { %998 = vrot.lane.b32.xlu0 %v8257_v38, %s8578_s0  ;;  %v87_v38 = vld [vmem:[#allocation7 + $0x108] sm:$0xff] }
0x113f   :  { %v8259_v40 = vpop.eup %8258  ;;  %7644 = vmatprep.subr.mxu0 %v87_v38 }
0x1140   :  { %v989_v41 = vadd.f32 1.0, %v8259_v40 }
0x1142   :  { %8260 = vrcp.f32 %v989_v41 }
0x114f   :  { %v8261_v42 = vpop.eup %8260 }
0x1150   :  { %v996_v27 = vmul.f32 %v8261_v42, %v994_v46  ;;  %v7136_v46 = vld [vmem:[#allocation7 + $0x111] ss:$0 sm:$0xff] }
0x11b0   :  { %v999_v44 = vpop.permute.xlu0 %998 }
0x11b1   :  { %v1001_v45 = vmul.f32 %v8261_v42, %v999_v44 }
0x11b3   :  { %1003 = vrot.lane.b32.xlu1 %v1001_v45, %s8579_s2 }
0x1225   :  { %v1004_v47 = vpop.permute.xlu1 %1003 }
0x1226   :  { %v1006_v48 = vadd.f32 %v1004_v47, %v996_v27 }
0x1228   :  { %8262 = vtanh.f32 %v1006_v48  ;;  %v1101_v5 = vrot.slane %v1006_v48, 6 }
0x1235   :  { %v8263_v29 = vpop.eup %8262 }
0x1236   :  { %1009 = vrot.lane.b32.xlu0 %v8263_v29, %s8578_s0  ;;  %v8829_v29 = vld [vmem:[#allocation7 + $0x68] sm:$0xff] }
0x12a8   :  { %v1010_v49 = vpop.permute.xlu0 %1009 }
0x12a9   :  { %v1012_v50 = vmul.f32 %v8261_v42, %v1010_v49 }
0x12ab   :  { %v1014_v53 = vrot.slane %v1012_v50, 4  ;;  %v1127_v55 = vsel %vm1122_vm4, %v1126_v52, %v1012_v50  ;;  %v1132_v19 = vrot.slane %v1012_v50, 2  ;;  %v8835_v50 = vld [vmem:[#allocation7 + $0x60] sm:$0xff] }
0x12ad   :  { %1015 = vrot.lane.b32.xlu1 %v1014_v53, %s8579_s2 }
0x131f   :  { %v1016_v56 = vpop.permute.xlu1 %1015 }
0x1320   :  { %7628 = vmatmul.mubr.msk.f32.vlgmr.msra.gmra.mxu1 %vm277_vm2, %v1016_v56  ;;  %v8843_v56 = vld [vmem:[#allocation7 + $0x58] sm:$0xff] }
0x1321   :  { %7638 = vmatpush3.msra.mxu1 %v83_v14 }
0x1322   :  { %7639 = vmatprep.subr.mxu1 %v82_v15 }
0x1323   :  { %7640 = vmatpush3.msra.mxu1 %v82_v15 }
0x1324   :  { %7651 = vmatprep.subr.mxu1 %v10005_v0 }
0x13e0   :  { %v1085_v57 = vpop.f32.mrf.mxu1 }
0x13e1   :  { %v1090_v58 = vrot.slane %v1085_v57, 2  ;;  %v8847_v57 = vld [vmem:[#allocation7 + $0x50] sm:$0xff] }
0x13e2   :  { %v7629_v59 = vpop.f32.mrf.mxu1 }
0x13e3   :  { %v1092_v60 = vadd.f32 %v1090_v58, %v8668_v30  ;;  %v8851_v58 = vld [vmem:[#allocation7 + $0x48] sm:$0xff]  ;;  %v8854_v59 = vld [vmem:[#allocation7 + $0x40] sm:$0xff] }
0x13e5   :  { %8264 = vtanh.f32 %v1092_v60  ;;  %v7131_v62 = vmul.f32 -1.442695, %v1092_v60 }
0x13e7   :  { %8266 = vpow2.f32 %v7131_v62 }
0x13f2   :  { %v8265_v61 = vpop.eup %8264 }
0x13f3   :  { %1105 = vrot.lane.b32.xlu0 %v8265_v61, %s8578_s0 }
0x13f4   :  { %v8267_v63 = vpop.eup %8266 }
0x13f5   :  { %v1096_v1 = vadd.f32 1.0, %v8267_v63 }
0x13f7   :  { %8268 = vrcp.f32 %v1096_v1 }
0x1404   :  { %v8269_v2 = vpop.eup %8268 }
0x1405   :  { %v1103_v7 = vmul.f32 %v8269_v2, %v1101_v5  ;;  %v8868_v5 = vld [vmem:[#allocation7 + $0x114] ss:$0 sm:$0xff] }
0x1465   :  { %v1106_v3 = vpop.permute.xlu0 %1105 }
0x1466   :  { %v1108_v4 = vmul.f32 %v8269_v2, %v1106_v3 }
0x1468   :  { %1110 = vrot.lane.b32.xlu1 %v1108_v4, %s8579_s2  ;;  %v8866_v4 = vshrl.u32 %v1412_v26, 7 }
0x146a   :  { %10011 = vst [vmem:[#allocation13_spill] sm:$0xff] %v8866_v4  ;;  %v1529_v15 = vsub.s32 5, %v8866_v4  ;;  %v1487_v16 = vsub.s32 3, %v8866_v4 }
0x14da   :  { %v1111_v11 = vpop.permute.xlu1 %1110 }
0x14db   :  { %v1113_v12 = vadd.f32 %v1111_v11, %v1103_v7  ;;  %v1476_v11 = vsub.s32 2, %v8866_v4 }
0x14dd   :  { %8270 = vtanh.f32 %v1113_v12 }
0x14ea   :  { %v8271_v30 = vpop.eup %8270 }
0x14eb   :  { %1116 = vrot.lane.b32.xlu0 %v8271_v30, %s8578_s0 }
0x14ef   :  { %1238 = vrot.lane.b32.xlu0 %v8732_v51, %s8579_s2 }
0x155d   :  { %v1117_v6 = vpop.permute.xlu0 %1116 }
0x155e   :  { %v1119_v18 = vmul.f32 %v8269_v2, %v1117_v6 }
0x1560   :  { %v1130_v8 = vrot.slane %v1119_v18, 6  ;;  %v1128_v51 = vsel %vm1124_vm5, %v1127_v55, %v1119_v18 }
0x1561   :  { %1240 = vrot.lane.b32.xlu0 %v1128_v51, %s8579_s2  ;;  %v1239_v21 = vpop.permute.xlu0 %1238 }
0x1562   :  { %7641 = vmatprep.mubr.msk.f32.mxu1 %vm98_vm1, %v1239_v21  ;;  %v1145_v22 = vsel %vm1120_vm3, %v1130_v8, %v1132_v19  ;;  %v8894_v19 = vld [vmem:[#allocation7 + $0x112] ss:$0 sm:$0xff] }
0x1563   :  { %v1146_v10 = vsel %vm1122_vm4, %v1145_v22, %v1134_v20 }
0x1564   :  { %v1147_v23 = vsel %vm1124_vm5, %v1146_v10, %v1136_v9 }
0x1565   :  { %1153 = vrot.lane.b32.xlu1 %v1147_v23, %s8580_s28 }
0x1569   :  { %1155 = vrot.lane.b32.xlu1 %v1150_v25, %s8580_s28 }
0x158d   :  { %1914 = vmax.xlane.f32.xlu1 %v1913_v31 }
0x15d3   :  { %v1241_v32 = vpop.permute.xlu0 %1240 }
0x15d4   :  { %7642 = vmatmul.mubr.msk.f32.vlgmr.msra.gmra.mxu1 %vm98_vm1, %v1241_v32 }
0x15d5   :  { %7653 = vmatprep.mubr.msk.f32.mxu1 %vm8577_vm0, %v10005_v0 }
0x15d7   :  { %v1154_v43 = vpop.permute.xlu1 %1153 }
0x15d8   :  { %7634 = vmatprep.mubr.msk.f32.mxu0 %vm98_vm1, %v1154_v43  ;;  %v76_v43 = vld [vmem:[#allocation7 + $0xb0] sm:$0xff] }
0x15d9   :  { %7652 = vmatpush3.msra.mxu1 %v76_v43 }
0x15da   :  { %7671 = vmatprep.subr.mxu1 %v10005_v0 }
0x15db   :  { %v1156_v54 = vpop.permute.xlu1 %1155 }
0x15dc   :  { %7635 = vmatmul.mubr.msk.f32.vlgmr.msra.gmra.mxu0 %vm98_vm1, %v1156_v54  ;;  %v95_v54 = vld [vmem:[#allocation5] sm:$0x3] }
0x15dd   :  { %7645 = vmatpush3.msra.mxu0 %v87_v38  ;;  %7654 = vmatmul.mubr.msk.f32.vlgmr.msra.gmra.mxu1 %vm1834_vm11, %v95_v54  ;;  %v8971_v54 = vld [vmem:[#allocation7 + $0x90] sm:$0xff] }
0x15de   :  { %7646 = vmatprep.subr.mxu0 %v86_v39  ;;  %7679 = vmatprep.mubr.msk.f32.mxu1 %vm8577_vm0, %v10005_v0 }
0x15df   :  { %7647 = vmatpush3.msra.mxu0 %v86_v39 }
0x15e0   :  { %7656 = vmatprep.subr.mxu0 %v10005_v0 }
0x1616   :  { %v1915_v33 = vpop.xlane.xlu1 %1914 }
0x1617   :  { %vm1916_vm7 = vcmp.eq.f32.partialorder %v8812_v13, %v1915_v33  ;;  %v8902_v33 = vld [vmem:[#allocation7 + $0x88] sm:$0xff] }
0x1618   :  { %v1917_v34 = vsel %vm1916_vm7, %v8808_v28, 32  ;;  %7672 = vmatpush3.msra.mxu1 %v8902_v33 }
0x1619   :  { %v1918_v35 = vsel %vm277_vm2, %v1917_v34, 2147483647  ;;  %v8905_v34 = vld [vmem:[#allocation7 + $0x80] sm:$0xff]  ;;  %7673 = vmatprep.subr.mxu1 %v10005_v0 }
0x161a   :  { %v1920_v36 = vshra.s32 %v1918_v35, 16  ;;  %v1919_v49 = vand.u32 65535, %v1918_v35  ;;  %v8911_v35 = vld [vmem:[#allocation7 + $0x78] sm:$0xff]  ;;  %7674 = vmatpush3.msra.mxu1 %v8905_v34 }
0x161b   :  { %7675 = vmatprep.subr.mxu1 %v10005_v0 }
0x161c   :  { %v1922_v37 = vcvt.s32.f32 %v1920_v36  ;;  %v1921_v53 = vcvt.s32.f32 %v1919_v49  ;;  %7676 = vmatpush3.msra.mxu1 %v8911_v35 }
0x161d   :  { %7677 = vmatprep.subr.mxu1 %v10005_v0 }
0x161e   :  { %1923 = vmin.xlane.f32.xlu0 %v1922_v37 }
0x1694   :  { %v7643_v40 = vpop.f32.mrf.mxu1 }
0x1696   :  { %v1312_v42 = vpop.f32.mrf.mxu1 }
0x169c   :  { %v7636_v41 = vpop.f32.mrf.mxu0 }
0x169d   :  { %v1318_v44 = vadd.f32 %v7643_v40, %v7636_v41  ;;  %v8926_v40 = vpop.f32.mrf.mxu1 }
0x169e   :  { %v1227_v45 = vpop.f32.mrf.mxu0 }
0x169f   :  { %v1313_v27 = vadd.f32 %v1312_v42, %v1227_v45  ;;  %v8827_v48 = vadd.f32 %v7136_v46, %v1318_v44  ;;  %v7655_v41 = vpop.f32.mrf.mxu1  ;;  %v8932_v45 = vld [vmem:[#allocation7 + $0x113] ss:$0 sm:$0xff] }
0x16a1   :  { %v8825_v47 = vadd.f32 %v7136_v46, %v1313_v27 }
0x16a3   :  { %7648 = vmatprep.mubr.msk.f32.mxu0 %vm98_vm1, %v8825_v47 }
0x16a4   :  { %7649 = vmatmul.mubr.msk.f32.vlgmr.msra.gmra.mxu0 %vm98_vm1, %v8827_v48 }
0x16a5   :  { %7657 = vmatpush3.msra.mxu0 %v8829_v29  ;;  %7668 = vmatprep.mubr.msk.f32.mxu0 %vm8577_vm0, %v10005_v0 }
0x16a6   :  { %7658 = vmatprep.subr.mxu0 %v10005_v0 }
0x16a7   :  { %v1924_v52 = vpop.xlane.xlu0 %1923  ;;  %7659 = vmatpush3.msra.mxu0 %v8835_v50 }
0x16a8   :  { %vm1925_vm8 = vcmp.eq.f32.partialorder %v1922_v37, %v1924_v52  ;;  %7660 = vmatprep.subr.mxu0 %v10005_v0  ;;  %v1930_v60 = vcvt.f32.s32 %v1924_v52  ;;  %v8918_v37 = vld [vmem:[#allocation7 + $0x70] sm:$0xff] }
0x16a9   :  { %v1926_v55 = vsel %vm1925_vm8, %v1921_v53, inf  ;;  %7661 = vmatpush3.msra.mxu0 %v8843_v56  ;;  %7678 = vmatpush3.msra.mxu1 %v8918_v37 }
0x16aa   :  { %1927 = vmin.xlane.f32.xlu0 %v1926_v55  ;;  %7662 = vmatprep.subr.mxu0 %v10005_v0  ;;  %v1931_v62 = vshll.u32 %v1930_v60, 16 }
0x16ab   :  { %7663 = vmatpush3.msra.mxu0 %v8847_v57  ;;  %7682 = vmatprep.subr.mxu1 %v10005_v0 }
0x16ac   :  { %7664 = vmatprep.subr.mxu0 %v10005_v0 }
0x16ad   :  { %7665 = vmatpush3.msra.mxu0 %v8851_v58 }
0x16ae   :  { %7666 = vmatprep.subr.mxu0 %v10005_v0 }
0x16af   :  { %7667 = vmatpush3.msra.mxu0 %v8854_v59 }
0x16b0   :  { %7689 = vmatprep.subr.mxu0 %v10005_v0 }
0x1733   :  { %v1928_v61 = vpop.xlane.xlu0 %1927 }
0x1734   :  { %v1929_v63 = vcvt.f32.s32 %v1928_v61 }
0x1736   :  { %v1932_v1 = vadd.s32 %v1931_v62, %v1929_v63 }
0x1738   :  { %vm1933_vm9 = vcmp.eq.s32.totalorder %v8808_v28, %v1932_v1 }
0x1739   :  { %v7143_v2 = vsel %vm1933_vm9, 1.0, %v10005_v0 }
0x173a   :  { %v1936_v3 = vsel %vm277_vm2, %v7143_v2, 0.0 }
0x173b   :  { %7669 = vmatmul.mubr.msk.f32.vlgmr.msra.gmra.mxu0 %vm1941_vm10, %v1936_v3 }
0x173c   :  { %7693 = vmatprep.mubr.msk.f32.mxu0 %vm8577_vm0, %v10005_v0 }
0x1764   :  { %v7650_v7 = vpop.f32.mrf.mxu0 }
0x1765   :  { %v8872_v12 = vadd.f32 %v7650_v7, %v8868_v5 }
0x1766   :  { %v1403_v30 = vpop.f32.mrf.mxu0 }
0x1767   :  { %v8875_v14 = vadd.f32 %v8868_v5, %v1403_v30  ;;  %v8882_v17 = vrot.slane %v8872_v12, %v1476_v11  ;;  %v8892_v18 = vrot.slane %v8872_v12, %v1529_v15  ;;  %v1425_v30 = vsub.s32 1, %v8866_v4 }
0x1769   :  { %v8887_v6 = vrot.slane %v8875_v14, %v1487_v16 }
0x17fb   :  { %v2011_v8 = vpop.f32.mrf.mxu0 }
0x17fc   :  { %v2012_v51 = vadd.f32 %v8894_v19, %v2011_v8  ;;  %v1426_v8 = vrot.slane %v8875_v14, %v1425_v30 }
0x17fd   :  { %v7670_v20 = vpop.f32.mrf.mxu0 }
0x17fe   :  { %8272 = vtanh.f32 %v2012_v51  ;;  %v7146_v9 = vmul.f32 -1.442695, %v2012_v51  ;;  %v8944_v51 = vsub.s32 0, %v8866_v4 }
0x1800   :  { %8274 = vpow2.f32 %v7146_v9  ;;  %v1415_v20 = vrot.slane %v8875_v14, %v8944_v51  ;;  %v1530_v9 = vrot.slane %v8875_v14, %v1529_v15  ;;  %v1635_v15 = vrot.slane %v8872_v12, %v1425_v30 }
0x180b   :  { %v8273_v21 = vpop.eup %8272 }
0x180c   :  { %2024 = vrot.lane.b32.xlu1 %v8273_v21, %s8581_s29  ;;  %v1477_v21 = vrot.slane %v8875_v14, %v1476_v11  ;;  %v1581_v11 = vsub.s32 6, %v8866_v4 }
0x180d   :  { %v8275_v22 = vpop.eup %8274 }
0x180e   :  { %v2018_v10 = vadd.f32 1.0, %v8275_v22  ;;  %v1518_v22 = vsub.s32 4, %v8866_v4 }
0x1810   :  { %8276 = vrcp.f32 %v2018_v10  ;;  %v1519_v10 = vrot.slane %v8875_v14, %v1518_v22  ;;  %v1728_v43 = vrot.slane %v8872_v12, %v1518_v22 }
0x181d   :  { %v8277_v23 = vpop.eup %8276 }
0x181e   :  { %v2022_v26 = vmul.f32 0.0, %v8277_v23 }
0x187e   :  { %v2025_v24 = vpop.permute.xlu1 %2024 }
0x187f   :  { %v2027_v25 = vmul.f32 %v8277_v23, %v2025_v24 }
0x1881   :  { %2029 = vrot.lane.b32.xlu0 %v2027_v25, %s8580_s28  ;;  %v1582_v25 = vrot.slane %v8875_v14, %v1581_v11 }
0x18f3   :  { %v2030_v31 = vpop.permute.xlu0 %2029 }
0x18f4   :  { %v8899_v32 = vadd.f32 %v2030_v31, %v2022_v26  ;;  %v1624_v26 = vrot.slane %v8872_v12, %v8944_v51  ;;  %v1697_v31 = vrot.slane %v8872_v12, %v1487_v16 }
0x18f6   :  { %8278 = vtanh.f32 %v8899_v32 }
0x1903   :  { %v8279_v36 = vpop.eup %8278 }
0x1904   :  { %2035 = vrot.lane.b32.xlu1 %v8279_v36, %s8579_s2 }
0x1976   :  { %v2036_v38 = vpop.permute.xlu1 %2035 }
0x1977   :  { %v8922_v39 = vmul.f32 %v8277_v23, %v2036_v38  ;;  %v1592_v23 = vsub.s32 7, %v8866_v4 }
0x1979   :  { %2040 = vrot.lane.b32.xlu1 %v8922_v39, %s8582_s30  ;;  %v1593_v24 = vrot.slane %v8875_v14, %v1592_v23  ;;  %v8969_v14 = vld [vmem:[#allocation7 + $0x98] sm:$0xff]  ;;  %v1802_v36 = vrot.slane %v8872_v12, %v1592_v23 }
0x19eb   :  { %v2041_v42 = vpop.permute.xlu1 %2040 }
0x19ec   :  { %v2043_v44 = vsel %vm98_vm1, %v2041_v42, 0.0 }
0x19ed   :  { %7680 = vmatmul.mubr.msk.f32.vlgmr.msra.gmra.mxu1 %vm277_vm2, %v2043_v44 }
0x19ee   :  { %7686 = vmatprep.mubr.msk.f32.mxu1 %vm8577_vm0, %v10005_v0  ;;  %7683 = vmatpush3.msra.mxu1 %v8969_v14 }
0x19ef   :  { %7684 = vmatprep.subr.mxu1 %v10005_v0 }
0x19f0   :  { %7685 = vmatpush3.msra.mxu1 %v8971_v54 }
0x19f1   :  { %7696 = vmatprep.subr.mxu1 %v10005_v0 }
0x1aad   :  { %v2117_v46 = vpop.f32.mrf.mxu1 }
0x1aae   :  { %v2118_v27 = vadd.f32 %v8932_v45, %v2117_v46 }
0x1aaf   :  { %v7681_v49 = vpop.f32.mrf.mxu1 }
0x1ab0   :  { %8280 = vtanh.f32 %v2118_v27  ;;  %v7149_v53 = vmul.f32 -1.442695, %v2118_v27  ;;  %v8584_v27 = vmov 1966171168  }
0x1ab1   :  { %v1435_v49 = vunpack.c.l.s4 %v8584_v27 }
0x1ab2   :  { %8282 = vpow2.f32 %v7149_v53 }
0x1ab3   :  { %v1436_v53 = vunpack.c.0.s8 %v1435_v49 }
0x1abd   :  { %v8281_v52 = vpop.eup %8280 }
0x1abe   :  { %2130 = vrot.lane.b32.xlu0 %v8281_v52, %s8581_s29 }
0x1abf   :  { %v8283_v55 = vpop.eup %8282 }
0x1ac0   :  { %v2124_v60 = vadd.f32 1.0, %v8283_v55 }
0x1ac2   :  { %8284 = vrcp.f32 %v2124_v60  ;;  %v1538_v60 = vcombine.high %v8825_v47, %v8825_v47 }
0x1acf   :  { %v8285_v61 = vpop.eup %8284 }
0x1ad0   :  { %v2128_v1 = vmul.f32 0.0, %v8285_v61 }
0x1b30   :  { %v2131_v62 = vpop.permute.xlu0 %2130 }
0x1b31   :  { %v2133_v63 = vmul.f32 %v8285_v61, %v2131_v62 }
0x1b33   :  { %2135 = vrot.lane.b32.xlu1 %v2133_v63, %s8580_s28 }
0x1ba5   :  { %v2136_v2 = vpop.permute.xlu1 %2135 }
0x1ba6   :  { %v8937_v3 = vadd.f32 %v2136_v2, %v2128_v1 }
0x1ba8   :  { %10012 = vst [vmem:[#allocation14_spill] sm:$0xff] %v8937_v3  ;;  %8286 = vtanh.f32 %v8937_v3 }
0x1bb5   :  { %v8287_v7 = vpop.eup %8286 }
0x1bb6   :  { %2141 = vrot.lane.b32.xlu0 %v8287_v7, %s8579_s2 }
0x1bba   :  { %1432 = vbcast.lane.b32.xlu0 %v1426_v8, 264 }
0x1bbe   :  { %1421 = vbcast.lane.b32.xlu0 %v1415_v20, 264 }
0x1bc2   :  { %1483 = vbcast.lane.b32.xlu0 %v1477_v21, 264 }
0x1bc6   :  { %1536 = vbcast.lane.b32.xlu0 %v1530_v9, 264 }
0x1bca   :  { %1479 = vbcast.lane.b32.xlu0 %v1477_v21, 256 }
0x1bce   :  { %1532 = vbcast.lane.b32.xlu0 %v1530_v9, 256 }
0x1bd2   :  { %1521 = vbcast.lane.b32.xlu0 %v1519_v10, 256 }
0x1bd6   :  { %1595 = vbcast.lane.b32.xlu0 %v1593_v24, 256 }
0x1bda   :  { %1584 = vbcast.lane.b32.xlu0 %v1582_v25, 256 }
0x1bde   :  { %1637 = vbcast.lane.b32.xlu0 %v1635_v15, 256 }
0x1be2   :  { %1626 = vbcast.lane.b32.xlu0 %v1624_v26, 256 }
0x1be6   :  { %1699 = vbcast.lane.b32.xlu0 %v1697_v31, 256 }
0x1bea   :  { %2221 = vrot.lane.b32.xlu0 %v8868_v5, %s8583_s4  ;;  %v1791_v5 = vrot.slane %v8872_v12, %v1581_v11 }
0x1bee   :  { %1734 = vbcast.lane.b32.xlu0 %v1728_v43, 264 }
0x1bf2   :  { %1808 = vbcast.lane.b32.xlu0 %v1802_v36, 264 }
0x1bf6   :  { %1797 = vbcast.lane.b32.xlu0 %v1791_v5, 264 }
0x1bfa   :  { %1793 = vbcast.lane.b32.xlu0 %v1791_v5, 256 }
0x1c28   :  { %v2142_v16 = vpop.permute.xlu0 %2141 }
0x1c29   :  { %v8979_v38 = vmul.f32 %v8285_v61, %v2142_v16 }
0x1c2b   :  { %2146 = vrot.lane.b32.xlu1 %v8979_v38, %s8582_s30 }
0x1c2c   :  { %v8989_v12 = vpop.permute.xlu0 %1432 }
0x1c2f   :  { %1494 = vbcast.lane.b32.xlu1 %v8887_v6, 264 }
0x1c33   :  { %1428 = vbcast.lane.b32.xlu1 %v1426_v8, 256 }
0x1c37   :  { %1490 = vbcast.lane.b32.xlu1 %v8887_v6, 256  ;;  %v8991_v6 = vpop.permute.xlu0 %1421 }
0x1c3b   :  { %1417 = vbcast.lane.b32.xlu1 %v1415_v20, 256  ;;  %v8993_v41 = vpop.permute.xlu0 %1483 }
0x1c3f   :  { %1525 = vbcast.lane.b32.xlu1 %v1519_v10, 264  ;;  %v8995_v42 = vpop.permute.xlu0 %1536 }
0x1c43   :  { %1599 = vbcast.lane.b32.xlu1 %v1593_v24, 264  ;;  %v1480_v44 = vpop.permute.xlu0 %1479 }
0x1c47   :  { %1588 = vbcast.lane.b32.xlu1 %v1582_v25, 264  ;;  %v1533_v46 = vpop.permute.xlu0 %1532 }
0x1c4b   :  { %1641 = vbcast.lane.b32.xlu1 %v1635_v15, 264  ;;  %v1522_v52 = vpop.permute.xlu0 %1521 }
0x1c4f   :  { %1630 = vbcast.lane.b32.xlu1 %v1624_v26, 264 }
0x1c53   :  { %1703 = vbcast.lane.b32.xlu1 %v1697_v31, 264 }
0x1c57   :  { %1692 = vbcast.lane.b32.xlu1 %v8882_v17, 264 }
0x1c5b   :  { %1745 = vbcast.lane.b32.xlu1 %v8892_v18, 264 }
0x1c5f   :  { %1688 = vbcast.lane.b32.xlu1 %v8882_v17, 256  ;;  %v8998_v17 = vsub.s32 %v1436_v53, %v8866_v4 }
0x1c61   :  { %v1440_v55 = vrot.slane %v8825_v47, %v8998_v17  ;;  %v1545_v61 = vrot.slane %v1538_v60, %v8998_v17  ;;  %v1649_v2 = vrot.slane %v8827_v48, %v8998_v17 }
0x1c63   :  { %1741 = vbcast.lane.b32.xlu1 %v8892_v18, 256  ;;  %v1596_v18 = vpop.permute.xlu0 %1595  ;;  %v1441_v62 = vcombine.high %v1440_v55, %v1440_v55  ;;  %v1546_v30 = vcombine.high %v1545_v61, %v1545_v61  ;;  %v1650_v20 = vcombine.high %v1649_v2, %v1649_v2  ;;  %v1448_v47 = vrot.slane %v1440_v55, %v8998_v17 }
0x1c64   :  { %v1553_v23 = vrot.slane %v1545_v61, %v8998_v17 }
0x1c65   :  { %v1455_v7 = vrot.slane %v1441_v62, %v8998_v17  ;;  %v1560_v9 = vrot.slane %v1546_v30, %v8998_v17  ;;  %v1664_v24 = vrot.slane %v1650_v20, %v8998_v17  ;;  %v1496_v25 = vcombine.high %v1448_v47, %v1448_v47 }
0x1c66   :  { %v1459_v27 = vrot.slane %v1448_v47, %v8944_v51  ;;  %v1601_v49 = vcombine.high %v1553_v23, %v1553_v23  ;;  %v1657_v30 = vrot.slane %v1649_v2, %v8998_v17 }
0x1c67   :  { %1730 = vbcast.lane.b32.xlu1 %v1728_v43, 256  ;;  %v1585_v63 = vpop.permute.xlu0 %1584  ;;  %v1497_v22 = vcombine.high %v1455_v7, %v1455_v7  ;;  %v1463_v11 = vrot.slane %v1455_v7, %v8944_v51  ;;  %v1602_v15 = vcombine.high %v1560_v9, %v1560_v9  ;;  %v1706_v53 = vcombine.high %v1664_v24, %v1664_v24 }
0x1c68   :  { %v1501_v55 = vrot.slane %v1496_v25, %v8944_v51  ;;  %v1672_v7 = vrot.slane %v1664_v24, %v8944_v51  ;;  %v1606_v47 = vrot.slane %v1601_v49, %v8944_v51 }
0x1c69   :  { %v1505_v26 = vrot.slane %v1497_v22, %v8944_v51  ;;  %v1610_v61 = vrot.slane %v1602_v15, %v8944_v51 }
0x1c6a   :  { %v1613_v24 = vmul.f32 %v1606_v47, %v1585_v63  ;;  %v1509_v63 = vmul.f32 %v1501_v55, %v8993_v41 }
0x1c6b   :  { %1804 = vbcast.lane.b32.xlu1 %v1802_v36, 256  ;;  %v1638_v21 = vpop.permute.xlu0 %1637  ;;  %v1568_v36 = vrot.slane %v1560_v9, %v8944_v51  ;;  %v1508_v9 = vmul.f32 %v1501_v55, %v1480_v44  ;;  %v1615_v22 = vmul.f32 %v1610_v61, %v1596_v18 }
0x1c6c   :  { %v1677_v4 = vmul.f32 %v1672_v7, %v1638_v21  ;;  %v1747_v21 = vcombine.high %v8827_v48, %v8827_v48 }
0x1c6d   :  { %v1573_v60 = vmul.f32 %v1568_v36, %v1533_v46 }
0x1c6f   :  { %v1627_v31 = vpop.permute.xlu0 %1626 }
0x1c73   :  { %v1700_v25 = vpop.permute.xlu0 %1699 }
0x1c9d   :  { %v2147_v1 = vpop.permute.xlu1 %2146 }
0x1c9e   :  { %7687 = vmatmul.mubr.msk.f32.vlgmr.msra.gmra.mxu1 %vm98_vm1, %v2147_v1  ;;  %v1564_v1 = vrot.slane %v1553_v23, %v8944_v51  ;;  %v1668_v23 = vrot.slane %v1657_v30, %v8944_v51 }
0x1c9f   :  { %7700 = vmatprep.mubr.msk.f32.mxu1 %vm8577_vm0, %v10005_v0  ;;  %v1714_v0 = vrot.slane %v1706_v53, %v8944_v51  ;;  %v1469_v53 = vmul.f32 %v1463_v11, %v8989_v12 }
0x1ca0   :  { %v1571_v46 = vmul.f32 %v1564_v1, %v1522_v52  ;;  %v1675_v44 = vmul.f32 %v1668_v23, %v1627_v31 }
0x1ca1   :  { %v1495_v8 = vpop.permute.xlu1 %1494  ;;  %v1719_v13 = vmul.f32 %v1714_v0, %v1700_v25 }
0x1ca2   :  { %v1511_v18 = vmul.f32 %v1505_v26, %v1495_v8  ;;  %v1467_v8 = vmul.f32 %v1459_v27, %v8991_v6  ;;  %v1705_v6 = vcombine.high %v1657_v30, %v1657_v30 }
0x1ca4   :  { %v1515_v52 = vadd.f32 %v1511_v18, %v1469_v53 }
0x1ca5   :  { %v1429_v10 = vpop.permute.xlu1 %1428 }
0x1ca6   :  { %v1468_v5 = vmul.f32 %v1463_v11, %v1429_v10  ;;  %v1513_v11 = vadd.f32 %v1509_v63, %v1467_v8 }
0x1ca9   :  { %v1491_v43 = vpop.permute.xlu1 %1490 }
0x1caa   :  { %v1510_v16 = vmul.f32 %v1505_v26, %v1491_v43  ;;  %v1754_v26 = vrot.slane %v1747_v21, %v8998_v17 }
0x1cac   :  { %v1514_v62 = vadd.f32 %v1510_v16, %v1468_v5 }
0x1cad   :  { %v1418_v20 = vpop.permute.xlu1 %1417 }
0x1cae   :  { %v1577_v10 = vadd.f32 %v1573_v60, %v1514_v62  ;;  %v1466_v43 = vmul.f32 %v1459_v27, %v1418_v20 }
0x1cb0   :  { %v1619_v15 = vadd.f32 %v1615_v22, %v1577_v10  ;;  %v1512_v5 = vadd.f32 %v1508_v9, %v1466_v43  ;;  %v9032_v9 = vpop.permute.xlu0 %2221 }
0x1cb1   :  { %v1526_v16 = vpop.permute.xlu1 %1525 }
0x1cb2   :  { %v1575_v2 = vadd.f32 %v1571_v46, %v1512_v5  ;;  %v1681_v3 = vadd.f32 %v1677_v4, %v1619_v15  ;;  %v1574_v4 = vmul.f32 %v1568_v36, %v8995_v42  ;;  %v1762_v42 = vrot.slane %v1754_v26, %v8998_v17 }
0x1cb4   :  { %v1617_v60 = vadd.f32 %v1613_v24, %v1575_v2  ;;  %v9027_v62 = vadd.f32 %v1719_v13, %v1681_v3  ;;  %v1572_v13 = vmul.f32 %v1564_v1, %v1526_v16  ;;  %v1578_v3 = vadd.f32 %v1574_v4, %v1515_v52  ;;  %v1735_v48 = vpop.permute.xlu0 %1734 }
0x1cb5   :  { %v1600_v49 = vpop.permute.xlu1 %1599  ;;  %v1755_v24 = vcombine.high %v1754_v26, %v1754_v26  ;;  %v1810_v2 = vcombine.high %v1762_v42, %v1762_v42  ;;  %v1773_v18 = vrot.slane %v1762_v42, %v8944_v51 }
0x1cb6   :  { %v1679_v20 = vadd.f32 %v1675_v44, %v1617_v60  ;;  %v1616_v31 = vmul.f32 %v1610_v61, %v1600_v49  ;;  %v1576_v46 = vadd.f32 %v1572_v13, %v1513_v11 }
0x1cb7   :  { %v1769_v1 = vrot.slane %v1755_v24, %v8998_v17  ;;  %v1815_v52 = vrot.slane %v1810_v2, %v8944_v51 }
0x1cb8   :  { %v1620_v10 = vadd.f32 %v1616_v31, %v1578_v3  ;;  %v1809_v27 = vpop.permute.xlu0 %1808 }
0x1cb9   :  { %v1589_v22 = vpop.permute.xlu1 %1588  ;;  %v1811_v60 = vcombine.high %v1769_v1, %v1769_v1  ;;  %v1777_v30 = vrot.slane %v1769_v1, %v8944_v51 }
0x1cba   :  { %v1614_v43 = vmul.f32 %v1606_v47, %v1589_v22 }
0x1cbb   :  { %v1819_v63 = vrot.slane %v1811_v60, %v8944_v51 }
0x1cbc   :  { %v1618_v41 = vadd.f32 %v1614_v43, %v1576_v46  ;;  %v1798_v53 = vpop.permute.xlu0 %1797 }
0x1cbd   :  { %v1642_v12 = vpop.permute.xlu1 %1641  ;;  %v1825_v8 = vmul.f32 %v1819_v63, %v1809_v27 }
0x1cbe   :  { %v1678_v25 = vmul.f32 %v1672_v7, %v1642_v12  ;;  %v1710_v7 = vrot.slane %v1705_v6, %v8944_v51 }
0x1cc0   :  { %v1682_v15 = vadd.f32 %v1678_v25, %v1620_v10  ;;  %v10013_v10 = vmov 0.0   ;;  %v1794_v46 = vpop.permute.xlu0 %1793 }
0x1cc1   :  { %v1631_v5 = vpop.permute.xlu1 %1630  ;;  %v1822_v24 = vmul.f32 %v1815_v52, %v1794_v46 }
0x1cc2   :  { %v1676_v55 = vmul.f32 %v1668_v23, %v1631_v5  ;;  %v1781_v23 = vmul.f32 %v1773_v18, %v1735_v48 }
0x1cc4   :  { %v1680_v36 = vadd.f32 %v1676_v55, %v1618_v41 }
0x1cc5   :  { %v1704_v61 = vpop.permute.xlu1 %1703 }
0x1cc6   :  { %v1720_v16 = vmul.f32 %v1714_v0, %v1704_v61  ;;  %v1823_v0 = vmul.f32 %v1815_v52, %v1798_v53 }
0x1cc8   :  { %v1724_v44 = vadd.f32 %v1720_v16, %v1682_v15 }
0x1cc9   :  { %v1693_v47 = vpop.permute.xlu1 %1692 }
0x1cca   :  { %v1718_v49 = vmul.f32 %v1710_v7, %v1693_v47  ;;  %v9078_v47 = vld [vmem:[#allocation7 + $0xd8] sm:$0xff] }
0x1ccc   :  { %v1722_v21 = vadd.f32 %v1718_v49, %v1680_v36 }
0x1ccd   :  { %v1746_v22 = vpop.permute.xlu1 %1745 }
0x1cce   :  { %v1785_v4 = vadd.f32 %v1781_v23, %v1722_v21  ;;  %v1783_v31 = vmul.f32 %v1777_v30, %v1746_v22 }
0x1cd0   :  { %v9045_v13 = vadd.f32 %v1823_v0, %v1785_v4  ;;  %v1787_v3 = vadd.f32 %v1783_v31, %v1724_v44  ;;  %v9073_v44 = vld [vmem:[#allocation7 + $0xa8] sm:$0xff] }
0x1cd1   :  { %v1689_v26 = vpop.permute.xlu1 %1688 }
0x1cd2   :  { %v9047_v12 = vadd.f32 %v1825_v8, %v1787_v3  ;;  %v1717_v11 = vmul.f32 %v1710_v7, %v1689_v26  ;;  %7690 = vmatpush3.msra.mxu0 %v9045_v13  ;;  %v9075_v7 = vld [vmem:[#allocation7 + $0xa0] sm:$0xff] }
0x1cd3   :  { %7691 = vmatprep.subr.mxu0 %v10013_v10 }
0x1cd4   :  { %v1721_v43 = vadd.f32 %v1717_v11, %v1679_v20  ;;  %7697 = vmatpush3.msra.mxu1 %v9047_v12 }
0x1cd5   :  { %v1742_v25 = vpop.permute.xlu1 %1741  ;;  %7698 = vmatprep.subr.mxu1 %v10013_v10 }
0x1cd6   :  { %v1782_v51 = vmul.f32 %v1777_v30, %v1742_v25 }
0x1cd8   :  { %v1786_v48 = vadd.f32 %v1782_v51, %v9027_v62 }
0x1cd9   :  { %v1731_v15 = vpop.permute.xlu1 %1730 }
0x1cda   :  { %v1780_v5 = vmul.f32 %v1773_v18, %v1731_v15  ;;  %v9080_v18 = vld [vmem:[#allocation7 + $0xd0] sm:$0xff] }
0x1cdc   :  { %v1784_v41 = vadd.f32 %v1780_v5, %v1721_v43 }
0x1cdd   :  { %v1805_v55 = vpop.permute.xlu1 %1804 }
0x1cde   :  { %v9054_v42 = vadd.f32 %v1822_v24, %v1784_v41  ;;  %v1824_v36 = vmul.f32 %v1819_v63, %v1805_v55 }
0x1ce0   :  { %v9056_v6 = vadd.f32 %v1824_v36, %v1786_v48  ;;  %7692 = vmatpush3.msra.mxu0 %v9054_v42 }
0x1ce1   :  { %7703 = vmatprep.subr.mxu0 %v10013_v10 }
0x1ce2   :  { %7699 = vmatpush3.msra.mxu1 %v9056_v6 }
0x1ce3   :  { %7710 = vmatprep.subr.mxu1 %v10013_v10 }
0x1d5e   :  { %v2216_v62 = vpop.f32.mrf.mxu1 }
0x1d5f   :  { %v2224_v20 = vadd.f32 %v9032_v9, %v2216_v62  ;;  %2398 = vrot.lane.b32.xlu1 %v2216_v62, %s8583_s4 }
0x1d60   :  { %v7688_v27 = vpop.f32.mrf.mxu1 }
0x1d61   :  { %v2232_v61 = vrot.slane %v2224_v20, %v8998_v17 }
0x1d63   :  { %v2233_v1 = vcombine.high %v2232_v61, %v2232_v61  ;;  %v2240_v16 = vrot.slane %v2232_v61, %v8998_v17 }
0x1d65   :  { %v2247_v2 = vrot.slane %v2233_v1, %v8998_v17  ;;  %7694 = vmatmul.mubr.msk.f32.vlgmr.msra.gmra.mxu0 %vm98_vm1, %v2240_v16 }
0x1d66   :  { %7707 = vmatprep.mubr.msk.f32.mxu0 %vm8577_vm0, %v10013_v10  ;;  %7704 = vmatpush3.msra.mxu0 %v9073_v44 }
0x1d67   :  { %7701 = vmatmul.mubr.msk.f32.vlgmr.msra.gmra.mxu1 %vm98_vm1, %v2247_v2  ;;  %7705 = vmatprep.subr.mxu0 %v10013_v10 }
0x1d68   :  { %7720 = vmatprep.mubr.msk.f32.mxu1 %vm8577_vm0, %v10013_v10  ;;  %7711 = vmatpush3.msra.mxu1 %v9078_v47 }
0x1d69   :  { %7706 = vmatpush3.msra.mxu0 %v9075_v7  ;;  %7712 = vmatprep.subr.mxu1 %v10013_v10 }
0x1d6a   :  { %7713 = vmatpush3.msra.mxu1 %v9080_v18  ;;  %7723 = vmatprep.subr.mxu0 %v10013_v10 }
0x1d6b   :  { %7714 = vmatprep.subr.mxu1 %v10013_v10 }
0x1e25   :  { %v2316_v60 = vpop.f32.mrf.mxu0 }
0x1e27   :  { %v7695_v49 = vpop.f32.mrf.mxu0  ;;  %v2388_v53 = vpop.f32.mrf.mxu1 }
0x1e28   :  { %v2394_v23 = vrot.slane %v2388_v53, 7 }
0x1e29   :  { %v7702_v52 = vpop.f32.mrf.mxu1 }
0x1e2a   :  { %v2396_v21 = vsel %vm2395_vm12, %v2394_v23, %v2316_v60 }
0x1e2b   :  { %7708 = vmatmul.mubr.msk.f32.vlgmr.msra.gmra.mxu0 %vm98_vm1, %v2396_v21 }
0x1e2c   :  { %7724 = vmatpush3.msra.mxu0 %v8829_v29  ;;  %7735 = vmatprep.mubr.msk.f32.mxu0 %vm8577_vm0, %v10013_v10  ;;  %v9105_v29 = vld [vmem:[#allocation7 + $0xc8] sm:$0xff] }
0x1e2d   :  { %7725 = vmatprep.subr.mxu0 %v10013_v10  ;;  %7715 = vmatpush3.msra.mxu1 %v9105_v29 }
0x1e2e   :  { %7726 = vmatpush3.msra.mxu0 %v8835_v50  ;;  %v9107_v50 = vld [vmem:[#allocation7 + $0xc0] sm:$0xff]  ;;  %7716 = vmatprep.subr.mxu1 %v10013_v10 }
0x1e2f   :  { %7727 = vmatprep.subr.mxu0 %v10013_v10  ;;  %7717 = vmatpush3.msra.mxu1 %v9107_v50 }
0x1e30   :  { %7728 = vmatpush3.msra.mxu0 %v8843_v56  ;;  %v9111_v56 = vld [vmem:[#allocation7 + $0xb8] sm:$0xff]  ;;  %7718 = vmatprep.subr.mxu1 %v10013_v10 }
0x1e31   :  { %7729 = vmatprep.subr.mxu0 %v10013_v10  ;;  %7719 = vmatpush3.msra.mxu1 %v9111_v56 }
0x1e32   :  { %7730 = vmatpush3.msra.mxu0 %v8847_v57  ;;  %7738 = vmatprep.subr.mxu1 %v10013_v10  ;;  %v7140_v57 = vld [vmem:[#allocation7 + $0x115] ss:$0 sm:$0xff] }
0x1e33   :  { %7731 = vmatprep.subr.mxu0 %v10013_v10  ;;  %v9118_v30 = vadd.f32 %v7140_v57, %v8926_v40  ;;  %v9132_v40 = vld [vmem:[#allocation7 + $0x116] ss:$0 sm:$0xff] }
0x1e34   :  { %7732 = vmatpush3.msra.mxu0 %v8851_v58  ;;  %v2399_v58 = vpop.permute.xlu1 %2398 }
0x1e35   :  { %7733 = vmatprep.subr.mxu0 %v10013_v10 }
0x1e36   :  { %7734 = vmatpush3.msra.mxu0 %v8854_v59 }
0x1e37   :  { %7749 = vmatprep.subr.mxu0 %v10013_v10 }
0x1eeb   :  { %v2469_v59 = vpop.f32.mrf.mxu0 }
0x1eec   :  { %v2470_v22 = vadd.f32 %v2469_v59, %v2399_v58 }
0x1eed   :  { %v7709_v63 = vpop.f32.mrf.mxu0 }
0x1eee   :  { %v2473_v0 = vadd.f32 %v2470_v22, %v9118_v30 }
0x1ef0   :  { %7721 = vmatmul.mubr.msk.f32.vlgmr.msra.gmra.mxu1 %vm2478_vm13, %v2473_v0 }
0x1ef1   :  { %7739 = vmatpush3.msra.mxu1 %v8902_v33  ;;  %7746 = vmatprep.mubr.msk.f32.mxu1 %vm8577_vm0, %v10013_v10 }
0x1ef2   :  { %7740 = vmatprep.subr.mxu1 %v10013_v10 }
0x1ef3   :  { %7741 = vmatpush3.msra.mxu1 %v8905_v34 }
0x1ef4   :  { %7742 = vmatprep.subr.mxu1 %v10013_v10 }
0x1ef5   :  { %7743 = vmatpush3.msra.mxu1 %v8911_v35 }
0x1ef6   :  { %7744 = vmatprep.subr.mxu1 %v10013_v10 }
0x1ef7   :  { %7745 = vmatpush3.msra.mxu1 %v8918_v37 }
0x1ef8   :  { %7756 = vmatprep.subr.mxu1 %v10013_v10 }
0x1fb0   :  { %v2548_v4 = vpop.f32.mrf.mxu1 }
0x1fb1   :  { %v9135_v31 = vadd.f32 %v9132_v40, %v2548_v4 }
0x1fb2   :  { %v7722_v8 = vpop.f32.mrf.mxu1 }
0x1fb3   :  { %v2566_v3 = vsel %vm2553_vm14, %v9135_v31, -inf }
0x1fb4   :  { %2567 = vmax.xlane.f32.xlu0 %v2566_v3 }
0x203d   :  { %v2568_v26 = vpop.xlane.xlu0 %2567 }
0x203e   :  { %vm2569_vm15 = vcmp.eq.f32.partialorder %v9135_v31, %v2568_v26 }
0x203f   :  { %v2570_v11 = vsel %vm2569_vm15, %v8808_v28, 32 }
0x2040   :  { %v2571_v43 = vsel %vm2553_vm14, %v2570_v11, 2147483647 }
0x2041   :  { %v2573_v25 = vshra.s32 %v2571_v43, 16  ;;  %v2572_v48 = vand.u32 65535, %v2571_v43 }
0x2043   :  { %v2575_v51 = vcvt.s32.f32 %v2573_v25  ;;  %v2574_v15 = vcvt.s32.f32 %v2572_v48 }
0x2045   :  { %2576 = vmin.xlane.f32.xlu1 %v2575_v51 }
0x20ce   :  { %v2577_v46 = vpop.xlane.xlu1 %2576 }
0x20cf   :  { %vm2578_vm4 = vcmp.eq.f32.partialorder %v2575_v51, %v2577_v46  ;;  %v2583_v24 = vcvt.f32.s32 %v2577_v46 }
0x20d0   :  { %v2579_v5 = vsel %vm2578_vm4, %v2574_v15, inf  ;;  %v10014_v15 = vld [vmem:[#allocation14_spill] sm:$0xff] }
0x20d1   :  { %2580 = vmin.xlane.f32.xlu0 %v2579_v5  ;;  %v2584_v55 = vshll.u32 %v2583_v24, 16 }
0x20e7   :  { %2589 = vrot.lane.b32.xlu0 %v8922_v39, %s8583_s4 }
0x215a   :  { %v2581_v41 = vpop.xlane.xlu0 %2580 }
0x215b   :  { %v2582_v36 = vcvt.f32.s32 %v2581_v41 }
0x215d   :  { %v2585_v62 = vadd.s32 %v2584_v55, %v2582_v36 }
0x215e   :  { %v2590_v27 = vpop.permute.xlu0 %2589 }
0x215f   :  { %vm2586_vm5 = vcmp.eq.s32.totalorder %v8808_v28, %v2585_v62 }
0x2160   :  { %v7156_v20 = vsel %vm2586_vm5, 1.0, %v10013_v10 }
0x2161   :  { %v2592_v61 = vsel %vm277_vm2, %v7156_v20, %v2590_v27 }
0x2162   :  { %7736 = vmatmul.mubr.msk.f32.vlgmr.msra.gmra.mxu0 %vm1941_vm10, %v2592_v61 }
0x2163   :  { %7750 = vmatpush3.msra.mxu0 %v8969_v14  ;;  %7753 = vmatprep.mubr.msk.f32.mxu0 %vm8577_vm0, %v10013_v10 }
0x2164   :  { %7751 = vmatprep.subr.mxu0 %v10013_v10 }
0x2165   :  { %7752 = vmatpush3.msra.mxu0 %v8971_v54 }
0x2166   :  { %7763 = vmatprep.subr.mxu0 %v10013_v10 }
0x2222   :  { %v2662_v39 = vpop.f32.mrf.mxu0 }
0x2223   :  { %v2663_v1 = vadd.f32 %v8894_v19, %v2662_v39 }
0x2224   :  { %v7737_v16 = vpop.f32.mrf.mxu0 }
0x2225   :  { %8288 = vtanh.f32 %v2663_v1  ;;  %v7158_v60 = vmul.f32 -1.442695, %v2663_v1 }
0x2227   :  { %8290 = vpow2.f32 %v7158_v60 }
0x2232   :  { %v8289_v2 = vpop.eup %8288 }
0x2233   :  { %2675 = vrot.lane.b32.xlu1 %v8289_v2, %s8581_s29 }
0x2234   :  { %v8291_v49 = vpop.eup %8290 }
0x2235   :  { %v2669_v53 = vadd.f32 1.0, %v8291_v49 }
0x2237   :  { %8292 = vrcp.f32 %v2669_v53 }
0x2244   :  { %v8293_v23 = vpop.eup %8292 }
0x2245   :  { %v2673_v57 = vmul.f32 %v8293_v23, %v8899_v32 }
0x22a5   :  { %v2676_v52 = vpop.permute.xlu1 %2675 }
0x22a6   :  { %v2678_v21 = vmul.f32 %v8293_v23, %v2676_v52 }
0x22a8   :  { %2680 = vrot.lane.b32.xlu1 %v2678_v21, %s8580_s28 }
0x231a   :  { %v2681_v58 = vpop.permute.xlu1 %2680 }
0x231b   :  { %v9158_v59 = vadd.f32 %v2681_v58, %v2673_v57  ;;  %v9222_v57 = vld [vmem:[#allocation7 + $0x68] sm:$0xff]  ;;  %v9228_v58 = vld [vmem:[#allocation7 + $0x60] sm:$0xff] }
0x231d   :  { %8294 = vtanh.f32 %v9158_v59 }
0x232a   :  { %v8295_v19 = vpop.eup %8294 }
0x232b   :  { %2686 = vrot.lane.b32.xlu0 %v8295_v19, %s8579_s2  ;;  %v9232_v19 = vld [vmem:[#allocation7 + $0x58] sm:$0xff] }
0x232f   :  { %2694 = vrot.lane.b32.xlu0 %v8979_v38, %s8581_s29 }
0x239d   :  { %v2687_v22 = vpop.permute.xlu0 %2686 }
0x239e   :  { %v9164_v63 = vmul.f32 %v8293_v23, %v2687_v22  ;;  %v9236_v22 = vld [vmem:[#allocation7 + $0x50] sm:$0xff] }
0x23a0   :  { %2691 = vrot.lane.b32.xlu1 %v9164_v63, %s8582_s30 }
0x23a1   :  { %v2695_v0 = vpop.permute.xlu0 %2694 }
0x2412   :  { %v2692_v4 = vpop.permute.xlu1 %2691 }
0x2413   :  { %v2697_v32 = vsel %vm98_vm1, %v2692_v4, %v2695_v0  ;;  %v9240_v0 = vld [vmem:[#allocation7 + $0x48] sm:$0xff]  ;;  %v9244_v4 = vld [vmem:[#allocation7 + $0x40] sm:$0xff] }
0x2414   :  { %7747 = vmatmul.mubr.msk.f32.vlgmr.msra.gmra.mxu1 %vm277_vm2, %v2697_v32 }
0x2415   :  { %7757 = vmatpush3.msra.mxu1 %v9045_v13  ;;  %7760 = vmatprep.mubr.msk.f32.mxu1 %vm8577_vm0, %v10013_v10 }
0x2416   :  { %7758 = vmatprep.subr.mxu1 %v10013_v10 }
0x2417   :  { %7759 = vmatpush3.msra.mxu1 %v9054_v42 }
0x2418   :  { %7770 = vmatprep.subr.mxu1 %v10013_v10 }
0x24d4   :  { %v2767_v38 = vpop.f32.mrf.mxu1 }
0x24d5   :  { %v2768_v8 = vadd.f32 %v8932_v45, %v2767_v38 }
0x24d6   :  { %v7748_v3 = vpop.f32.mrf.mxu1 }
0x24d7   :  { %8296 = vtanh.f32 %v2768_v8  ;;  %v7160_v11 = vmul.f32 -1.442695, %v2768_v8 }
0x24d9   :  { %8298 = vpow2.f32 %v7160_v11 }
0x24e4   :  { %v8297_v26 = vpop.eup %8296 }
0x24e5   :  { %2780 = vrot.lane.b32.xlu1 %v8297_v26, %s8581_s29 }
0x24e6   :  { %v8299_v43 = vpop.eup %8298 }
0x24e7   :  { %v2774_v25 = vadd.f32 1.0, %v8299_v43 }
0x24e9   :  { %8300 = vrcp.f32 %v2774_v25 }
0x24f6   :  { %v8301_v51 = vpop.eup %8300 }
0x24f7   :  { %v2778_v5 = vmul.f32 %v8301_v51, %v10014_v15 }
0x2557   :  { %v2781_v48 = vpop.permute.xlu1 %2780 }
0x2558   :  { %v2783_v46 = vmul.f32 %v8301_v51, %v2781_v48 }
0x255a   :  { %2785 = vrot.lane.b32.xlu0 %v2783_v46, %s8580_s28 }
0x25cc   :  { %v2786_v24 = vpop.permute.xlu0 %2785 }
0x25cd   :  { %v9180_v41 = vadd.f32 %v2786_v24, %v2778_v5 }
0x25cf   :  { %8302 = vtanh.f32 %v9180_v41 }
0x25dc   :  { %v8303_v45 = vpop.eup %8302 }
0x25dd   :  { %2791 = vrot.lane.b32.xlu1 %v8303_v45, %s8579_s2 }
0x264f   :  { %v2792_v55 = vpop.permute.xlu1 %2791 }
0x2650   :  { %v9184_v36 = vmul.f32 %v8301_v51, %v2792_v55 }
0x2652   :  { %2796 = vrot.lane.b32.xlu0 %v9184_v36, %s8582_s30 }
0x26c4   :  { %v2797_v62 = vpop.permute.xlu0 %2796 }
0x26c5   :  { %7754 = vmatmul.mubr.msk.f32.vlgmr.msra.gmra.mxu0 %vm98_vm1, %v2797_v62 }
0x26c6   :  { %7764 = vmatpush3.msra.mxu0 %v9047_v12  ;;  %7767 = vmatprep.mubr.msk.f32.mxu0 %vm8577_vm0, %v10013_v10 }
0x26c7   :  { %7765 = vmatprep.subr.mxu0 %v10013_v10 }
0x26c8   :  { %7766 = vmatpush3.msra.mxu0 %v9056_v6 }
0x26c9   :  { %7777 = vmatprep.subr.mxu0 %v10013_v10 }
0x2785   :  { %v2866_v20 = vpop.f32.mrf.mxu0 }
0x2786   :  { %v2870_v27 = vadd.f32 %v2866_v20, %v9032_v9  ;;  %3043 = vrot.lane.b32.xlu1 %v2866_v20, %s8583_s4 }
0x2787   :  { %v7755_v61 = vpop.f32.mrf.mxu0 }
0x2788   :  { %v2878_v39 = vrot.slane %v2870_v27, %v8998_v17 }
0x278a   :  { %v2879_v1 = vcombine.high %v2878_v39, %v2878_v39  ;;  %v2886_v16 = vrot.slane %v2878_v39, %v8998_v17 }
0x278c   :  { %v2893_v2 = vrot.slane %v2879_v1, %v8998_v17  ;;  %7761 = vmatmul.mubr.msk.f32.vlgmr.msra.gmra.mxu1 %vm98_vm1, %v2886_v16  ;;  %v9280_v16 = vld [vmem:[#allocation7 + $0x112] ss:$0 sm:$0xff] }
0x278d   :  { %7771 = vmatpush3.msra.mxu1 %v9073_v44  ;;  %7774 = vmatprep.mubr.msk.f32.mxu1 %vm8577_vm0, %v10013_v10 }
0x278e   :  { %7768 = vmatmul.mubr.msk.f32.vlgmr.msra.gmra.mxu0 %vm98_vm1, %v2893_v2  ;;  %7772 = vmatprep.subr.mxu1 %v10013_v10 }
0x278f   :  { %7773 = vmatpush3.msra.mxu1 %v9075_v7  ;;  %7778 = vmatpush3.msra.mxu0 %v9078_v47 }
0x2790   :  { %7779 = vmatprep.subr.mxu0 %v10013_v10  ;;  %7787 = vmatprep.mubr.msk.f32.mxu0 %vm8577_vm0, %v10013_v10 }
0x2791   :  { %7780 = vmatpush3.msra.mxu0 %v9080_v18  ;;  %7790 = vmatprep.subr.mxu1 %v10013_v10 }
0x2792   :  { %7781 = vmatprep.subr.mxu0 %v10013_v10 }
0x2793   :  { %7782 = vmatpush3.msra.mxu0 %v9105_v29 }
0x2794   :  { %7783 = vmatprep.subr.mxu0 %v10013_v10 }
0x2795   :  { %7784 = vmatpush3.msra.mxu0 %v9107_v50 }
0x2796   :  { %7785 = vmatprep.subr.mxu0 %v10013_v10 }
0x2797   :  { %7786 = vmatpush3.msra.mxu0 %v9111_v56 }
0x2798   :  { %7805 = vmatprep.subr.mxu0 %v10013_v10 }
0x27f8   :  { %v3044_v32 = vpop.permute.xlu1 %3043 }
0x284c   :  { %v2962_v60 = vpop.f32.mrf.mxu1 }
0x284e   :  { %v7762_v49 = vpop.f32.mrf.mxu1  ;;  %v3034_v53 = vpop.f32.mrf.mxu0 }
0x284f   :  { %v3040_v23 = vrot.slane %v3034_v53, 7 }
0x2850   :  { %v7769_v52 = vpop.f32.mrf.mxu0 }
0x2851   :  { %v3041_v21 = vsel %vm2395_vm12, %v3040_v23, %v2962_v60 }
0x2852   :  { %7775 = vmatmul.mubr.msk.f32.vlgmr.msra.gmra.mxu1 %vm98_vm1, %v3041_v21 }
0x2853   :  { %7791 = vmatpush3.msra.mxu1 %v9222_v57  ;;  %7802 = vmatprep.mubr.msk.f32.mxu1 %vm8577_vm0, %v10013_v10 }
0x2854   :  { %7792 = vmatprep.subr.mxu1 %v10013_v10 }
0x2855   :  { %7793 = vmatpush3.msra.mxu1 %v9228_v58 }
0x2856   :  { %7794 = vmatprep.subr.mxu1 %v10013_v10 }
0x2857   :  { %7795 = vmatpush3.msra.mxu1 %v9232_v19 }
0x2858   :  { %7796 = vmatprep.subr.mxu1 %v10013_v10 }
0x2859   :  { %7797 = vmatpush3.msra.mxu1 %v9236_v22 }
0x285a   :  { %7798 = vmatprep.subr.mxu1 %v10013_v10 }
0x285b   :  { %7799 = vmatpush3.msra.mxu1 %v9240_v0 }
0x285c   :  { %7800 = vmatprep.subr.mxu1 %v10013_v10 }
0x285d   :  { %7801 = vmatpush3.msra.mxu1 %v9244_v4 }
0x285e   :  { %7816 = vmatprep.subr.mxu1 %v10013_v10 }
0x2912   :  { %v3114_v38 = vpop.f32.mrf.mxu1 }
0x2913   :  { %v3115_v8 = vadd.f32 %v3114_v38, %v3044_v32 }
0x2914   :  { %v7776_v3 = vpop.f32.mrf.mxu1 }
0x2915   :  { %v3118_v26 = vadd.f32 %v3115_v8, %v9118_v30 }
0x2917   :  { %7788 = vmatmul.mubr.msk.f32.vlgmr.msra.gmra.mxu0 %vm2478_vm13, %v3118_v26 }
0x2918   :  { %7806 = vmatpush3.msra.mxu0 %v8902_v33  ;;  %7813 = vmatprep.mubr.msk.f32.mxu0 %vm8577_vm0, %v10013_v10 }
0x2919   :  { %7807 = vmatprep.subr.mxu0 %v10013_v10 }
0x291a   :  { %7808 = vmatpush3.msra.mxu0 %v8905_v34 }
0x291b   :  { %7809 = vmatprep.subr.mxu0 %v10013_v10 }
0x291c   :  { %7810 = vmatpush3.msra.mxu0 %v8911_v35 }
0x291d   :  { %7811 = vmatprep.subr.mxu0 %v10013_v10 }
0x291e   :  { %7812 = vmatpush3.msra.mxu0 %v8918_v37 }
0x291f   :  { %7823 = vmatprep.subr.mxu0 %v10013_v10 }
0x29d7   :  { %v3188_v11 = vpop.f32.mrf.mxu0 }
0x29d8   :  { %v9261_v33 = vadd.f32 %v9132_v40, %v3188_v11 }
0x29d9   :  { %v7789_v43 = vpop.f32.mrf.mxu0 }
0x29da   :  { %v3205_v25 = vsel %vm2553_vm14, %v9261_v33, -inf }
0x29db   :  { %3206 = vmax.xlane.f32.xlu0 %v3205_v25 }
0x2a64   :  { %v3207_v34 = vpop.xlane.xlu0 %3206 }
0x2a65   :  { %vm3208_vm6 = vcmp.eq.f32.partialorder %v9261_v33, %v3207_v34  ;;  %v9304_v34 = vld [vmem:[#allocation7 + $0x113] ss:$0 sm:$0xff] }
0x2a66   :  { %v3209_v35 = vsel %vm3208_vm6, %v8808_v28, 32 }
0x2a67   :  { %v3210_v51 = vsel %vm2553_vm14, %v3209_v35, 2147483647 }
0x2a68   :  { %v3212_v48 = vshra.s32 %v3210_v51, 16  ;;  %v3211_v46 = vand.u32 65535, %v3210_v51 }
0x2a6a   :  { %v3214_v37 = vcvt.s32.f32 %v3212_v48  ;;  %v3213_v5 = vcvt.s32.f32 %v3211_v46 }
0x2a6c   :  { %3215 = vmin.xlane.f32.xlu1 %v3214_v37 }
0x2af5   :  { %v3216_v15 = vpop.xlane.xlu1 %3215 }
0x2af6   :  { %vm3217_vm7 = vcmp.eq.f32.partialorder %v3214_v37, %v3216_v15  ;;  %v3222_v45 = vcvt.f32.s32 %v3216_v15 }
0x2af7   :  { %v3218_v24 = vsel %vm3217_vm7, %v3213_v5, inf }
0x2af8   :  { %3219 = vmin.xlane.f32.xlu0 %v3218_v24  ;;  %v3223_v62 = vshll.u32 %v3222_v45, 16 }
0x2b0e   :  { %3228 = vrot.lane.b32.xlu0 %v9164_v63, %s8583_s4 }
0x2b81   :  { %v3220_v55 = vpop.xlane.xlu0 %3219 }
0x2b82   :  { %v3221_v20 = vcvt.f32.s32 %v3220_v55 }
0x2b84   :  { %v3224_v27 = vadd.s32 %v3223_v62, %v3221_v20 }
0x2b85   :  { %v3229_v39 = vpop.permute.xlu0 %3228 }
0x2b86   :  { %vm3225_vm8 = vcmp.eq.s32.totalorder %v8808_v28, %v3224_v27 }
0x2b87   :  { %v7166_v61 = vsel %vm3225_vm8, 1.0, %v10013_v10 }
0x2b88   :  { %v3231_v1 = vsel %vm277_vm2, %v7166_v61, %v3229_v39 }
0x2b89   :  { %7803 = vmatmul.mubr.msk.f32.vlgmr.msra.gmra.mxu1 %vm1941_vm10, %v3231_v1 }
0x2b8a   :  { %7817 = vmatpush3.msra.mxu1 %v8969_v14  ;;  %7820 = vmatprep.mubr.msk.f32.mxu1 %vm8577_vm0, %v10013_v10 }
0x2b8b   :  { %7818 = vmatprep.subr.mxu1 %v10013_v10 }
0x2b8c   :  { %7819 = vmatpush3.msra.mxu1 %v8971_v54 }
0x2b8d   :  { %7830 = vmatprep.subr.mxu1 %v10013_v10 }
0x2c49   :  { %v3301_v63 = vpop.f32.mrf.mxu1 }
0x2c4a   :  { %v3302_v2 = vadd.f32 %v9280_v16, %v3301_v63 }
0x2c4b   :  { %v7804_v60 = vpop.f32.mrf.mxu1 }
0x2c4c   :  { %8304 = vtanh.f32 %v3302_v2  ;;  %v7168_v14 = vmul.f32 -1.442695, %v3302_v2 }
0x2c4e   :  { %8306 = vpow2.f32 %v7168_v14 }
0x2c59   :  { %v8305_v49 = vpop.eup %8304 }
0x2c5a   :  { %3314 = vrot.lane.b32.xlu1 %v8305_v49, %s8581_s29 }
0x2c5b   :  { %v8307_v53 = vpop.eup %8306 }
0x2c5c   :  { %v3308_v23 = vadd.f32 1.0, %v8307_v53 }
0x2c5e   :  { %8308 = vrcp.f32 %v3308_v23 }
0x2c6b   :  { %v8309_v52 = vpop.eup %8308 }
0x2c6c   :  { %v3312_v32 = vmul.f32 %v8309_v52, %v9158_v59 }
0x2ccc   :  { %v3315_v21 = vpop.permute.xlu1 %3314 }
0x2ccd   :  { %v3317_v54 = vmul.f32 %v8309_v52, %v3315_v21 }
0x2ccf   :  { %3319 = vrot.lane.b32.xlu1 %v3317_v54, %s8580_s28 }
0x2d41   :  { %v3320_v38 = vpop.permute.xlu1 %3319 }
0x2d42   :  { %v9286_v8 = vadd.f32 %v3320_v38, %v3312_v32 }
0x2d44   :  { %8310 = vtanh.f32 %v9286_v8 }
0x2d51   :  { %v8311_v3 = vpop.eup %8310 }
0x2d52   :  { %3325 = vrot.lane.b32.xlu0 %v8311_v3, %s8579_s2 }
0x2d56   :  { %3333 = vrot.lane.b32.xlu0 %v9184_v36, %s8581_s29 }
0x2dc4   :  { %v3326_v26 = vpop.permute.xlu0 %3325 }
0x2dc5   :  { %v9292_v11 = vmul.f32 %v8309_v52, %v3326_v26 }
0x2dc7   :  { %3330 = vrot.lane.b32.xlu1 %v9292_v11, %s8582_s30 }
0x2dc8   :  { %v3334_v43 = vpop.permute.xlu0 %3333 }
0x2e39   :  { %v3331_v25 = vpop.permute.xlu1 %3330 }
0x2e3a   :  { %v3336_v59 = vsel %vm98_vm1, %v3331_v25, %v3334_v43 }
0x2e3b   :  { %7814 = vmatmul.mubr.msk.f32.vlgmr.msra.gmra.mxu0 %vm277_vm2, %v3336_v59 }
0x2e3c   :  { %7824 = vmatpush3.msra.mxu0 %v9045_v13  ;;  %7827 = vmatprep.mubr.msk.f32.mxu0 %vm8577_vm0, %v10013_v10 }
0x2e3d   :  { %7825 = vmatprep.subr.mxu0 %v10013_v10 }
0x2e3e   :  { %7826 = vmatpush3.msra.mxu0 %v9054_v42 }
0x2e3f   :  { %7837 = vmatprep.subr.mxu0 %v10013_v10 }
0x2efb   :  { %v3406_v36 = vpop.f32.mrf.mxu0 }
0x2efc   :  { %v3407_v35 = vadd.f32 %v9304_v34, %v3406_v36  ;;  %v9368_v36 = vld [vmem:[#allocation7 + $0x88] sm:$0xff] }
0x2efd   :  { %v7815_v51 = vpop.f32.mrf.mxu0 }
0x2efe   :  { %8312 = vtanh.f32 %v3407_v35  ;;  %v7170_v37 = vmul.f32 -1.442695, %v3407_v35  ;;  %v9374_v35 = vld [vmem:[#allocation7 + $0x80] sm:$0xff]  ;;  %v9378_v51 = vld [vmem:[#allocation7 + $0x78] sm:$0xff] }
0x2f00   :  { %8314 = vpow2.f32 %v7170_v37 }
0x2f0b   :  { %v8313_v48 = vpop.eup %8312 }
0x2f0c   :  { %3419 = vrot.lane.b32.xlu1 %v8313_v48, %s8581_s29  ;;  %v9382_v48 = vld [vmem:[#allocation7 + $0x70] sm:$0xff] }
0x2f0d   :  { %v8315_v46 = vpop.eup %8314 }
0x2f0e   :  { %v3413_v15 = vadd.f32 1.0, %v8315_v46 }
0x2f10   :  { %8316 = vrcp.f32 %v3413_v15 }
0x2f1d   :  { %v8317_v5 = vpop.eup %8316 }
0x2f1e   :  { %v3417_v55 = vmul.f32 %v8317_v5, %v9180_v41 }
0x2f7e   :  { %v3420_v24 = vpop.permute.xlu1 %3419 }
0x2f7f   :  { %v3422_v45 = vmul.f32 %v8317_v5, %v3420_v24 }
0x2f81   :  { %3424 = vrot.lane.b32.xlu0 %v3422_v45, %s8580_s28 }
0x2ff3   :  { %v3425_v62 = vpop.permute.xlu0 %3424 }
0x2ff4   :  { %v9310_v20 = vadd.f32 %v3425_v62, %v3417_v55 }
0x2ff6   :  { %8318 = vtanh.f32 %v9310_v20 }
0x3003   :  { %v8319_v27 = vpop.eup %8318 }
0x3004   :  { %3430 = vrot.lane.b32.xlu1 %v8319_v27, %s8579_s2 }
0x3076   :  { %v3431_v61 = vpop.permute.xlu1 %3430 }
0x3077   :  { %v9314_v39 = vmul.f32 %v8317_v5, %v3431_v61 }
0x3079   :  { %3435 = vrot.lane.b32.xlu0 %v9314_v39, %s8582_s30 }
0x30eb   :  { %v3436_v1 = vpop.permute.xlu0 %3435 }
0x30ec   :  { %7821 = vmatmul.mubr.msk.f32.vlgmr.msra.gmra.mxu1 %vm98_vm1, %v3436_v1 }
0x30ed   :  { %7831 = vmatpush3.msra.mxu1 %v9047_v12  ;;  %7834 = vmatprep.mubr.msk.f32.mxu1 %vm8577_vm0, %v10013_v10 }
0x30ee   :  { %7832 = vmatprep.subr.mxu1 %v10013_v10 }
0x30ef   :  { %7833 = vmatpush3.msra.mxu1 %v9056_v6 }
0x30f0   :  { %7844 = vmatprep.subr.mxu1 %v10013_v10 }
0x31ac   :  { %v3505_v41 = vpop.f32.mrf.mxu1 }
0x31ad   :  { %v3509_v63 = vadd.f32 %v3505_v41, %v9032_v9  ;;  %3682 = vrot.lane.b32.xlu1 %v3505_v41, %s8583_s4 }
0x31ae   :  { %v7822_v2 = vpop.f32.mrf.mxu1 }
0x31af   :  { %v3517_v60 = vrot.slane %v3509_v63, %v8998_v17 }
0x31b1   :  { %v3518_v49 = vcombine.high %v3517_v60, %v3517_v60  ;;  %v3525_v14 = vrot.slane %v3517_v60, %v8998_v17 }
0x31b3   :  { %v3532_v53 = vrot.slane %v3518_v49, %v8998_v17  ;;  %7828 = vmatmul.mubr.msk.f32.vlgmr.msra.gmra.mxu0 %vm98_vm1, %v3525_v14 }
0x31b4   :  { %7838 = vmatpush3.msra.mxu0 %v9073_v44  ;;  %7841 = vmatprep.mubr.msk.f32.mxu0 %vm8577_vm0, %v10013_v10 }
0x31b5   :  { %7835 = vmatmul.mubr.msk.f32.vlgmr.msra.gmra.mxu1 %vm98_vm1, %v3532_v53  ;;  %7839 = vmatprep.subr.mxu0 %v10013_v10 }
0x31b6   :  { %7840 = vmatpush3.msra.mxu0 %v9075_v7  ;;  %7845 = vmatpush3.msra.mxu1 %v9078_v47 }
0x31b7   :  { %7846 = vmatprep.subr.mxu1 %v10013_v10  ;;  %7854 = vmatprep.mubr.msk.f32.mxu1 %vm8577_vm0, %v10013_v10 }
0x31b8   :  { %7847 = vmatpush3.msra.mxu1 %v9080_v18  ;;  %7857 = vmatprep.subr.mxu0 %v10013_v10 }
0x31b9   :  { %7848 = vmatprep.subr.mxu1 %v10013_v10 }
0x31ba   :  { %7849 = vmatpush3.msra.mxu1 %v9105_v29 }
0x31bb   :  { %7850 = vmatprep.subr.mxu1 %v10013_v10 }
0x31bc   :  { %7851 = vmatpush3.msra.mxu1 %v9107_v50 }
0x31bd   :  { %7852 = vmatprep.subr.mxu1 %v10013_v10 }
0x31be   :  { %7853 = vmatpush3.msra.mxu1 %v9111_v56 }
0x31bf   :  { %7872 = vmatprep.subr.mxu1 %v10013_v10 }
0x321f   :  { %v3683_v3 = vpop.permute.xlu1 %3682 }
0x3273   :  { %v3601_v23 = vpop.f32.mrf.mxu0 }
0x3275   :  { %v7829_v52 = vpop.f32.mrf.mxu0  ;;  %v3673_v21 = vpop.f32.mrf.mxu1 }
0x3276   :  { %v3679_v54 = vrot.slane %v3673_v21, 7 }
0x3277   :  { %v7836_v32 = vpop.f32.mrf.mxu1 }
0x3278   :  { %v3680_v38 = vsel %vm2395_vm12, %v3679_v54, %v3601_v23  ;;  %v9400_v54 = vld [vmem:[#allocation7 + $0x98] sm:$0xff] }
0x3279   :  { %7842 = vmatmul.mubr.msk.f32.vlgmr.msra.gmra.mxu0 %vm98_vm1, %v3680_v38 }
0x327a   :  { %7858 = vmatpush3.msra.mxu0 %v9222_v57  ;;  %7869 = vmatprep.mubr.msk.f32.mxu0 %vm8577_vm0, %v10013_v10 }
0x327b   :  { %7859 = vmatprep.subr.mxu0 %v10013_v10 }
0x327c   :  { %7860 = vmatpush3.msra.mxu0 %v9228_v58 }
0x327d   :  { %7861 = vmatprep.subr.mxu0 %v10013_v10 }
0x327e   :  { %7862 = vmatpush3.msra.mxu0 %v9232_v19 }
0x327f   :  { %7863 = vmatprep.subr.mxu0 %v10013_v10 }
0x3280   :  { %7864 = vmatpush3.msra.mxu0 %v9236_v22 }
0x3281   :  { %7865 = vmatprep.subr.mxu0 %v10013_v10 }
0x3282   :  { %7866 = vmatpush3.msra.mxu0 %v9240_v0 }
0x3283   :  { %7867 = vmatprep.subr.mxu0 %v10013_v10 }
0x3284   :  { %7868 = vmatpush3.msra.mxu0 %v9244_v4 }
0x3285   :  { %7883 = vmatprep.subr.mxu0 %v10013_v10 }
0x3339   :  { %v3753_v26 = vpop.f32.mrf.mxu0 }
0x333a   :  { %v3754_v43 = vadd.f32 %v3753_v26, %v3683_v3 }
0x333b   :  { %v7843_v25 = vpop.f32.mrf.mxu0 }
0x333c   :  { %v3757_v59 = vadd.f32 %v3754_v43, %v9118_v30 }
0x333e   :  { %7855 = vmatmul.mubr.msk.f32.vlgmr.msra.gmra.mxu1 %vm2478_vm13, %v3757_v59 }
0x333f   :  { %7873 = vmatpush3.msra.mxu1 %v9368_v36  ;;  %7880 = vmatprep.mubr.msk.f32.mxu1 %vm8577_vm0, %v10013_v10 }
0x3340   :  { %7874 = vmatprep.subr.mxu1 %v10013_v10 }
0x3341   :  { %7875 = vmatpush3.msra.mxu1 %v9374_v35 }
0x3342   :  { %7876 = vmatprep.subr.mxu1 %v10013_v10 }
0x3343   :  { %7877 = vmatpush3.msra.mxu1 %v9378_v51 }
0x3344   :  { %7878 = vmatprep.subr.mxu1 %v10013_v10 }
0x3345   :  { %7879 = vmatpush3.msra.mxu1 %v9382_v48 }
0x3346   :  { %7890 = vmatprep.subr.mxu1 %v10013_v10 }
0x33fe   :  { %v3827_v37 = vpop.f32.mrf.mxu1 }
0x33ff   :  { %v9387_v46 = vadd.f32 %v9132_v40, %v3827_v37 }
0x3400   :  { %v7856_v15 = vpop.f32.mrf.mxu1 }
0x3401   :  { %v3844_v5 = vsel %vm2553_vm14, %v9387_v46, -inf }
0x3402   :  { %3845 = vmax.xlane.f32.xlu0 %v3844_v5 }
0x348b   :  { %v3846_v24 = vpop.xlane.xlu0 %3845 }
0x348c   :  { %vm3847_vm9 = vcmp.eq.f32.partialorder %v9387_v46, %v3846_v24 }
0x348d   :  { %v3848_v45 = vsel %vm3847_vm9, %v8808_v28, 32 }
0x348e   :  { %v3849_v55 = vsel %vm2553_vm14, %v3848_v45, 2147483647 }
0x348f   :  { %v3851_v62 = vshra.s32 %v3849_v55, 16  ;;  %v3850_v61 = vand.u32 65535, %v3849_v55 }
0x3491   :  { %v3853_v27 = vcvt.s32.f32 %v3851_v62  ;;  %v3852_v41 = vcvt.s32.f32 %v3850_v61 }
0x3493   :  { %3854 = vmin.xlane.f32.xlu1 %v3853_v27 }
0x351c   :  { %v3855_v1 = vpop.xlane.xlu1 %3854 }
0x351d   :  { %vm3856_vm11 = vcmp.eq.f32.partialorder %v3853_v27, %v3855_v1  ;;  %v3861_v2 = vcvt.f32.s32 %v3855_v1 }
0x351e   :  { %v3857_v63 = vsel %vm3856_vm11, %v3852_v41, inf }
0x351f   :  { %3858 = vmin.xlane.f32.xlu0 %v3857_v63  ;;  %v3862_v49 = vshll.u32 %v3861_v2, 16 }
0x3535   :  { %3867 = vrot.lane.b32.xlu0 %v9292_v11, %s8583_s4  ;;  %v9406_v11 = vld [vmem:[#allocation7 + $0x90] sm:$0xff] }
0x35a8   :  { %v3859_v60 = vpop.xlane.xlu0 %3858 }
0x35a9   :  { %v3860_v14 = vcvt.f32.s32 %v3859_v60 }
0x35ab   :  { %v3863_v53 = vadd.s32 %v3862_v49, %v3860_v14 }
0x35ac   :  { %v3868_v52 = vpop.permute.xlu0 %3867 }
0x35ad   :  { %vm3864_vm15 = vcmp.eq.s32.totalorder %v8808_v28, %v3863_v53 }
0x35ae   :  { %v7176_v23 = vsel %vm3864_vm15, 1.0, %v10013_v10 }
0x35af   :  { %v3870_v21 = vsel %vm277_vm2, %v7176_v23, %v3868_v52 }
0x35b0   :  { %7870 = vmatmul.mubr.msk.f32.vlgmr.msra.gmra.mxu0 %vm1941_vm10, %v3870_v21 }
0x35b1   :  { %7884 = vmatpush3.msra.mxu0 %v9400_v54  ;;  %7887 = vmatprep.mubr.msk.f32.mxu0 %vm8577_vm0, %v10013_v10 }
0x35b2   :  { %7885 = vmatprep.subr.mxu0 %v10013_v10 }
0x35b3   :  { %7886 = vmatpush3.msra.mxu0 %v9406_v11 }
0x35b4   :  { %7897 = vmatprep.subr.mxu0 %v10013_v10 }
0x3670   :  { %v3940_v32 = vpop.f32.mrf.mxu0 }
0x3671   :  { %v3941_v38 = vadd.f32 %v9280_v16, %v3940_v32 }
0x3672   :  { %v7871_v3 = vpop.f32.mrf.mxu0 }
0x3673   :  { %8320 = vtanh.f32 %v3941_v38  ;;  %v7178_v43 = vmul.f32 -1.442695, %v3941_v38 }
0x3675   :  { %8322 = vpow2.f32 %v7178_v43 }
0x3680   :  { %v8321_v26 = vpop.eup %8320 }
0x3681   :  { %3953 = vrot.lane.b32.xlu1 %v8321_v26, %s8581_s29 }
0x3682   :  { %v8323_v25 = vpop.eup %8322 }
0x3683   :  { %v3947_v59 = vadd.f32 1.0, %v8323_v25 }
0x3685   :  { %8324 = vrcp.f32 %v3947_v59 }
0x3692   :  { %v8325_v37 = vpop.eup %8324 }
0x3693   :  { %v3951_v24 = vmul.f32 %v8325_v37, %v9286_v8 }
0x36f3   :  { %v3954_v15 = vpop.permute.xlu1 %3953 }
0x36f4   :  { %v3956_v5 = vmul.f32 %v8325_v37, %v3954_v15 }
0x36f6   :  { %3958 = vrot.lane.b32.xlu1 %v3956_v5, %s8580_s28 }
0x3768   :  { %v3959_v45 = vpop.permute.xlu1 %3958 }
0x3769   :  { %v9414_v55 = vadd.f32 %v3959_v45, %v3951_v24 }
0x376b   :  { %8326 = vtanh.f32 %v9414_v55 }
0x3778   :  { %v8327_v62 = vpop.eup %8326 }
0x3779   :  { %3964 = vrot.lane.b32.xlu0 %v8327_v62, %s8579_s2 }
0x377d   :  { %3972 = vrot.lane.b32.xlu0 %v9314_v39, %s8581_s29 }
0x37eb   :  { %v3965_v27 = vpop.permute.xlu0 %3964 }
0x37ec   :  { %v9420_v61 = vmul.f32 %v8325_v37, %v3965_v27 }
0x37ee   :  { %3969 = vrot.lane.b32.xlu1 %v9420_v61, %s8582_s30 }
0x37ef   :  { %v3973_v1 = vpop.permute.xlu0 %3972 }
0x3860   :  { %v3970_v41 = vpop.permute.xlu1 %3969 }
0x3861   :  { %v3975_v8 = vsel %vm98_vm1, %v3970_v41, %v3973_v1 }
0x3862   :  { %7881 = vmatmul.mubr.msk.f32.vlgmr.msra.gmra.mxu1 %vm277_vm2, %v3975_v8 }
0x3863   :  { %7891 = vmatpush3.msra.mxu1 %v9045_v13  ;;  %7894 = vmatprep.mubr.msk.f32.mxu1 %vm8577_vm0, %v10013_v10 }
0x3864   :  { %7892 = vmatprep.subr.mxu1 %v10013_v10 }
0x3865   :  { %7893 = vmatpush3.msra.mxu1 %v9054_v42 }
0x3866   :  { %7904 = vmatprep.subr.mxu1 %v10013_v10 }
0x3922   :  { %v4045_v39 = vpop.f32.mrf.mxu1 }
0x3923   :  { %v4046_v63 = vadd.f32 %v9304_v34, %v4045_v39 }
0x3924   :  { %v7882_v2 = vpop.f32.mrf.mxu1 }
0x3925   :  { %8328 = vtanh.f32 %v4046_v63  ;;  %v7180_v49 = vmul.f32 -1.442695, %v4046_v63 }
0x3927   :  { %8330 = vpow2.f32 %v7180_v49 }
0x3932   :  { %v8329_v60 = vpop.eup %8328 }
0x3933   :  { %4058 = vrot.lane.b32.xlu1 %v8329_v60, %s8581_s29 }
0x3934   :  { %v8331_v14 = vpop.eup %8330 }
0x3935   :  { %v4052_v53 = vadd.f32 1.0, %v8331_v14 }
0x3937   :  { %8332 = vrcp.f32 %v4052_v53 }
0x3944   :  { %v8333_v23 = vpop.eup %8332 }
0x3945   :  { %v4056_v32 = vmul.f32 %v8333_v23, %v9310_v20 }
0x39a5   :  { %v4059_v52 = vpop.permute.xlu1 %4058 }
0x39a6   :  { %v4061_v21 = vmul.f32 %v8333_v23, %v4059_v52 }
0x39a8   :  { %4063 = vrot.lane.b32.xlu0 %v4061_v21, %s8580_s28 }
0x3a1a   :  { %v4064_v38 = vpop.permute.xlu0 %4063 }
0x3a1b   :  { %v9436_v3 = vadd.f32 %v4064_v38, %v4056_v32 }
0x3a1d   :  { %8334 = vtanh.f32 %v9436_v3 }
0x3a2a   :  { %v8335_v26 = vpop.eup %8334 }
0x3a2b   :  { %4069 = vrot.lane.b32.xlu1 %v8335_v26, %s8579_s2 }
0x3a9d   :  { %v4070_v43 = vpop.permute.xlu1 %4069 }
0x3a9e   :  { %v9440_v25 = vmul.f32 %v8333_v23, %v4070_v43 }
0x3aa0   :  { %4074 = vrot.lane.b32.xlu0 %v9440_v25, %s8582_s30 }
0x3b12   :  { %v4075_v59 = vpop.permute.xlu0 %4074 }
0x3b13   :  { %7888 = vmatmul.mubr.msk.f32.vlgmr.msra.gmra.mxu0 %vm98_vm1, %v4075_v59 }
0x3b14   :  { %7898 = vmatpush3.msra.mxu0 %v9047_v12  ;;  %7901 = vmatprep.mubr.msk.f32.mxu0 %vm8577_vm0, %v10013_v10 }
0x3b15   :  { %7899 = vmatprep.subr.mxu0 %v10013_v10 }
0x3b16   :  { %7900 = vmatpush3.msra.mxu0 %v9056_v6 }
0x3b17   :  { %7911 = vmatprep.subr.mxu0 %v10013_v10 }
0x3bd3   :  { %v4144_v20 = vpop.f32.mrf.mxu0 }
0x3bd4   :  { %v4148_v37 = vadd.f32 %v4144_v20, %v9032_v9  ;;  %4321 = vrot.lane.b32.xlu1 %v4144_v20, %s8583_s4 }
0x3bd5   :  { %v7889_v15 = vpop.f32.mrf.mxu0 }
0x3bd6   :  { %v4156_v5 = vrot.slane %v4148_v37, %v8998_v17 }
0x3bd8   :  { %v4157_v24 = vcombine.high %v4156_v5, %v4156_v5  ;;  %v4164_v45 = vrot.slane %v4156_v5, %v8998_v17 }
0x3bda   :  { %v4171_v62 = vrot.slane %v4157_v24, %v8998_v17  ;;  %7895 = vmatmul.mubr.msk.f32.vlgmr.msra.gmra.mxu1 %vm98_vm1, %v4164_v45 }
0x3bdb   :  { %7905 = vmatpush3.msra.mxu1 %v9073_v44  ;;  %7908 = vmatprep.mubr.msk.f32.mxu1 %vm8577_vm0, %v10013_v10 }
0x3bdc   :  { %7902 = vmatmul.mubr.msk.f32.vlgmr.msra.gmra.mxu0 %vm98_vm1, %v4171_v62  ;;  %7906 = vmatprep.subr.mxu1 %v10013_v10 }
0x3bdd   :  { %7907 = vmatpush3.msra.mxu1 %v9075_v7  ;;  %7912 = vmatpush3.msra.mxu0 %v9078_v47 }
0x3bde   :  { %7913 = vmatprep.subr.mxu0 %v10013_v10  ;;  %7921 = vmatprep.mubr.msk.f32.mxu0 %vm8577_vm0, %v10013_v10 }
0x3bdf   :  { %7914 = vmatpush3.msra.mxu0 %v9080_v18  ;;  %7924 = vmatprep.subr.mxu1 %v10013_v10 }
0x3be0   :  { %7915 = vmatprep.subr.mxu0 %v10013_v10 }
0x3be1   :  { %7916 = vmatpush3.msra.mxu0 %v9105_v29 }
0x3be2   :  { %7917 = vmatprep.subr.mxu0 %v10013_v10 }
0x3be3   :  { %7918 = vmatpush3.msra.mxu0 %v9107_v50 }
0x3be4   :  { %7919 = vmatprep.subr.mxu0 %v10013_v10 }
0x3be5   :  { %7920 = vmatpush3.msra.mxu0 %v9111_v56 }
0x3be6   :  { %7939 = vmatprep.subr.mxu0 %v10013_v10 }
0x3c46   :  { %v4322_v29 = vpop.permute.xlu1 %4321 }
0x3c9a   :  { %v4240_v44 = vpop.f32.mrf.mxu1 }
0x3c9c   :  { %v7896_v7 = vpop.f32.mrf.mxu1  ;;  %v4312_v47 = vpop.f32.mrf.mxu0 }
0x3c9d   :  { %v4318_v18 = vrot.slane %v4312_v47, 7 }
0x3c9e   :  { %v7903_v27 = vpop.f32.mrf.mxu0 }
0x3c9f   :  { %v4319_v1 = vsel %vm2395_vm12, %v4318_v18, %v4240_v44 }
0x3ca0   :  { %7909 = vmatmul.mubr.msk.f32.vlgmr.msra.gmra.mxu1 %vm98_vm1, %v4319_v1 }
0x3ca1   :  { %7925 = vmatpush3.msra.mxu1 %v9222_v57  ;;  %7936 = vmatprep.mubr.msk.f32.mxu1 %vm8577_vm0, %v10013_v10 }
0x3ca2   :  { %7926 = vmatprep.subr.mxu1 %v10013_v10 }
0x3ca3   :  { %7927 = vmatpush3.msra.mxu1 %v9228_v58 }
0x3ca4   :  { %7928 = vmatprep.subr.mxu1 %v10013_v10 }
0x3ca5   :  { %7929 = vmatpush3.msra.mxu1 %v9232_v19 }
0x3ca6   :  { %7930 = vmatprep.subr.mxu1 %v10013_v10 }
0x3ca7   :  { %7931 = vmatpush3.msra.mxu1 %v9236_v22 }
0x3ca8   :  { %7932 = vmatprep.subr.mxu1 %v10013_v10 }
0x3ca9   :  { %7933 = vmatpush3.msra.mxu1 %v9240_v0 }
0x3caa   :  { %7934 = vmatprep.subr.mxu1 %v10013_v10 }
0x3cab   :  { %7935 = vmatpush3.msra.mxu1 %v9244_v4 }
0x3cac   :  { %7950 = vmatprep.subr.mxu1 %v10013_v10 }
0x3d60   :  { %v4392_v50 = vpop.f32.mrf.mxu1 }
0x3d61   :  { %v4393_v56 = vadd.f32 %v4392_v50, %v4322_v29 }
0x3d62   :  { %v7910_v41 = vpop.f32.mrf.mxu1 }
0x3d63   :  { %v4396_v8 = vadd.f32 %v4393_v56, %v9118_v30 }
0x3d65   :  { %7922 = vmatmul.mubr.msk.f32.vlgmr.msra.gmra.mxu0 %vm2478_vm13, %v4396_v8 }
0x3d66   :  { %7940 = vmatpush3.msra.mxu0 %v9368_v36  ;;  %7947 = vmatprep.mubr.msk.f32.mxu0 %vm8577_vm0, %v10013_v10 }
0x3d67   :  { %7941 = vmatprep.subr.mxu0 %v10013_v10 }
0x3d68   :  { %7942 = vmatpush3.msra.mxu0 %v9374_v35 }
0x3d69   :  { %7943 = vmatprep.subr.mxu0 %v10013_v10 }
0x3d6a   :  { %7944 = vmatpush3.msra.mxu0 %v9378_v51 }
0x3d6b   :  { %7945 = vmatprep.subr.mxu0 %v10013_v10 }
0x3d6c   :  { %7946 = vmatpush3.msra.mxu0 %v9382_v48 }
0x3d6d   :  { %7957 = vmatprep.subr.mxu0 %v10013_v10 }
0x3e25   :  { %v4466_v39 = vpop.f32.mrf.mxu0 }
0x3e26   :  { %v9505_v63 = vadd.f32 %v9132_v40, %v4466_v39 }
0x3e27   :  { %v7923_v2 = vpop.f32.mrf.mxu0 }
0x3e28   :  { %v4483_v60 = vsel %vm2553_vm14, %v9505_v63, -inf }
0x3e29   :  { %4484 = vmax.xlane.f32.xlu0 %v4483_v60 }
0x3eb2   :  { %v4485_v49 = vpop.xlane.xlu0 %4484 }
0x3eb3   :  { %vm4486_vm4 = vcmp.eq.f32.partialorder %v9505_v63, %v4485_v49 }
0x3eb4   :  { %v4487_v14 = vsel %vm4486_vm4, %v8808_v28, 32 }
0x3eb5   :  { %v4488_v53 = vsel %vm2553_vm14, %v4487_v14, 2147483647 }
0x3eb6   :  { %v4490_v23 = vshra.s32 %v4488_v53, 16  ;;  %v4489_v21 = vand.u32 65535, %v4488_v53 }
0x3eb8   :  { %v4492_v52 = vcvt.s32.f32 %v4490_v23  ;;  %v4491_v38 = vcvt.s32.f32 %v4489_v21 }
0x3eba   :  { %4493 = vmin.xlane.f32.xlu1 %v4492_v52 }
0x3f43   :  { %v4494_v32 = vpop.xlane.xlu1 %4493 }
0x3f44   :  { %vm4495_vm5 = vcmp.eq.f32.partialorder %v4492_v52, %v4494_v32  ;;  %v4500_v26 = vcvt.f32.s32 %v4494_v32 }
0x3f45   :  { %v4496_v40 = vsel %vm4495_vm5, %v4491_v38, inf }
0x3f46   :  { %4497 = vmin.xlane.f32.xlu0 %v4496_v40  ;;  %v4501_v59 = vshll.u32 %v4500_v26, 16 }
0x3f5c   :  { %4506 = vrot.lane.b32.xlu0 %v9420_v61, %s8583_s4 }
0x3fcf   :  { %v4498_v43 = vpop.xlane.xlu0 %4497 }
0x3fd0   :  { %v4499_v20 = vcvt.f32.s32 %v4498_v43 }
0x3fd2   :  { %v4502_v37 = vadd.s32 %v4501_v59, %v4499_v20 }
0x3fd3   :  { %v4507_v5 = vpop.permute.xlu0 %4506 }
0x3fd4   :  { %vm4503_vm6 = vcmp.eq.s32.totalorder %v8808_v28, %v4502_v37 }
0x3fd5   :  { %v7186_v15 = vsel %vm4503_vm6, 1.0, %v10013_v10 }
0x3fd6   :  { %v4509_v24 = vsel %vm277_vm2, %v7186_v15, %v4507_v5 }
0x3fd7   :  { %7937 = vmatmul.mubr.msk.f32.vlgmr.msra.gmra.mxu1 %vm1941_vm10, %v4509_v24 }
0x3fd8   :  { %7951 = vmatpush3.msra.mxu1 %v9400_v54  ;;  %7954 = vmatprep.mubr.msk.f32.mxu1 %vm8577_vm0, %v10013_v10 }
0x3fd9   :  { %7952 = vmatprep.subr.mxu1 %v10013_v10 }
0x3fda   :  { %7953 = vmatpush3.msra.mxu1 %v9406_v11 }
0x3fdb   :  { %7964 = vmatprep.subr.mxu1 %v10013_v10 }
0x4097   :  { %v4579_v61 = vpop.f32.mrf.mxu1 }
0x4098   :  { %v4580_v45 = vadd.f32 %v9280_v16, %v4579_v61 }
0x4099   :  { %v7938_v62 = vpop.f32.mrf.mxu1 }
0x409a   :  { %8336 = vtanh.f32 %v4580_v45  ;;  %v7188_v7 = vmul.f32 -1.442695, %v4580_v45 }
0x409c   :  { %8338 = vpow2.f32 %v7188_v7 }
0x40a7   :  { %v8337_v44 = vpop.eup %8336 }
0x40a8   :  { %4592 = vrot.lane.b32.xlu1 %v8337_v44, %s8581_s29 }
0x40a9   :  { %v8339_v47 = vpop.eup %8338 }
0x40aa   :  { %v4586_v18 = vadd.f32 1.0, %v8339_v47 }
0x40ac   :  { %8340 = vrcp.f32 %v4586_v18  ;;  %v9571_v18 = vld [vmem:[#allocation7 + $0xa8] sm:$0xff] }
0x40b9   :  { %v8341_v27 = vpop.eup %8340 }
0x40ba   :  { %v4590_v50 = vmul.f32 %v8341_v27, %v9414_v55 }
0x411a   :  { %v4593_v1 = vpop.permute.xlu1 %4592 }
0x411b   :  { %v4595_v29 = vmul.f32 %v8341_v27, %v4593_v1  ;;  %v9581_v1 = vld [vmem:[#allocation7 + $0xd8] sm:$0xff] }
0x411d   :  { %4597 = vrot.lane.b32.xlu1 %v4595_v29, %s8580_s28  ;;  %v9587_v29 = vld [vmem:[#allocation7 + $0xd0] sm:$0xff] }
0x418f   :  { %v4598_v56 = vpop.permute.xlu1 %4597 }
0x4190   :  { %v9528_v41 = vadd.f32 %v4598_v56, %v4590_v50  ;;  %v9592_v50 = vld [vmem:[#allocation7 + $0xc8] sm:$0xff]  ;;  %v9596_v56 = vld [vmem:[#allocation7 + $0xc0] sm:$0xff] }
0x4192   :  { %8342 = vtanh.f32 %v9528_v41 }
0x419f   :  { %v8343_v8 = vpop.eup %8342 }
0x41a0   :  { %4603 = vrot.lane.b32.xlu0 %v8343_v8, %s8579_s2  ;;  %v9600_v8 = vld [vmem:[#allocation7 + $0xb8] sm:$0xff] }
0x41a4   :  { %4611 = vrot.lane.b32.xlu0 %v9440_v25, %s8581_s29 }
0x4212   :  { %v4604_v39 = vpop.permute.xlu0 %4603 }
0x4213   :  { %v9534_v2 = vmul.f32 %v8341_v27, %v4604_v39  ;;  %v9578_v27 = vld [vmem:[#allocation7 + $0xa0] sm:$0xff] }
0x4215   :  { %4608 = vrot.lane.b32.xlu1 %v9534_v2, %s8582_s30 }
0x4216   :  { %v4612_v60 = vpop.permute.xlu0 %4611 }
0x4287   :  { %v4609_v49 = vpop.permute.xlu1 %4608 }
0x4288   :  { %v4614_v55 = vsel %vm98_vm1, %v4609_v49, %v4612_v60 }
0x4289   :  { %7948 = vmatmul.mubr.msk.f32.vlgmr.msra.gmra.mxu0 %vm277_vm2, %v4614_v55 }
0x428a   :  { %7958 = vmatpush3.msra.mxu0 %v9045_v13  ;;  %7961 = vmatprep.mubr.msk.f32.mxu0 %vm8577_vm0, %v10013_v10 }
0x428b   :  { %7959 = vmatprep.subr.mxu0 %v10013_v10 }
0x428c   :  { %7960 = vmatpush3.msra.mxu0 %v9054_v42 }
0x428d   :  { %7971 = vmatprep.subr.mxu0 %v10013_v10 }
0x4349   :  { %v4684_v25 = vpop.f32.mrf.mxu0 }
0x434a   :  { %v4685_v14 = vadd.f32 %v9304_v34, %v4684_v25 }
0x434b   :  { %v7949_v53 = vpop.f32.mrf.mxu0 }
0x434c   :  { %8344 = vtanh.f32 %v4685_v14  ;;  %v7190_v52 = vmul.f32 -1.442695, %v4685_v14 }
0x434e   :  { %8346 = vpow2.f32 %v7190_v52 }
0x4359   :  { %v8345_v23 = vpop.eup %8344 }
0x435a   :  { %4697 = vrot.lane.b32.xlu1 %v8345_v23, %s8581_s29 }
0x435b   :  { %v8347_v21 = vpop.eup %8346 }
0x435c   :  { %v4691_v32 = vadd.f32 1.0, %v8347_v21 }
0x435e   :  { %8348 = vrcp.f32 %v4691_v32 }
0x436b   :  { %v8349_v38 = vpop.eup %8348 }
0x436c   :  { %v4695_v43 = vmul.f32 %v8349_v38, %v9436_v3 }
0x43cc   :  { %v4698_v40 = vpop.permute.xlu1 %4697 }
0x43cd   :  { %v4700_v26 = vmul.f32 %v8349_v38, %v4698_v40 }
0x43cf   :  { %4702 = vrot.lane.b32.xlu0 %v4700_v26, %s8580_s28 }
0x4441   :  { %v4703_v59 = vpop.permute.xlu0 %4702 }
0x4442   :  { %v9550_v20 = vadd.f32 %v4703_v59, %v4695_v43 }
0x4444   :  { %8350 = vtanh.f32 %v9550_v20 }
0x4451   :  { %v8351_v37 = vpop.eup %8350 }
0x4452   :  { %4708 = vrot.lane.b32.xlu1 %v8351_v37, %s8579_s2 }
0x44c4   :  { %v4709_v15 = vpop.permute.xlu1 %4708 }
0x44c5   :  { %v9554_v5 = vmul.f32 %v8349_v38, %v4709_v15 }
0x44c7   :  { %4713 = vrot.lane.b32.xlu0 %v9554_v5, %s8582_s30 }
0x4539   :  { %v4714_v24 = vpop.permute.xlu0 %4713 }
0x453a   :  { %7955 = vmatmul.mubr.msk.f32.vlgmr.msra.gmra.mxu1 %vm98_vm1, %v4714_v24 }
0x453b   :  { %7965 = vmatpush3.msra.mxu1 %v9047_v12  ;;  %7968 = vmatprep.mubr.msk.f32.mxu1 %vm8577_vm0, %v10013_v10 }
0x453c   :  { %7966 = vmatprep.subr.mxu1 %v10013_v10 }
0x453d   :  { %7967 = vmatpush3.msra.mxu1 %v9056_v6 }
0x453e   :  { %7978 = vmatprep.subr.mxu1 %v10013_v10 }
0x45fa   :  { %v4783_v3 = vpop.f32.mrf.mxu1 }
0x45fb   :  { %v4787_v61 = vadd.f32 %v4783_v3, %v9032_v9  ;;  %4960 = vrot.lane.b32.xlu1 %v4783_v3, %s8583_s4 }
0x45fc   :  { %v7956_v45 = vpop.f32.mrf.mxu1 }
0x45fd   :  { %v4795_v62 = vrot.slane %v4787_v61, %v8998_v17 }
0x45ff   :  { %v4796_v44 = vcombine.high %v4795_v62, %v4795_v62  ;;  %v4803_v7 = vrot.slane %v4795_v62, %v8998_v17 }
0x4601   :  { %v4810_v47 = vrot.slane %v4796_v44, %v8998_v17  ;;  %7962 = vmatmul.mubr.msk.f32.vlgmr.msra.gmra.mxu0 %vm98_vm1, %v4803_v7 }
0x4602   :  { %7972 = vmatpush3.msra.mxu0 %v9571_v18  ;;  %7975 = vmatprep.mubr.msk.f32.mxu0 %vm8577_vm0, %v10013_v10 }
0x4603   :  { %7969 = vmatmul.mubr.msk.f32.vlgmr.msra.gmra.mxu1 %vm98_vm1, %v4810_v47  ;;  %7973 = vmatprep.subr.mxu0 %v10013_v10 }
0x4604   :  { %7974 = vmatpush3.msra.mxu0 %v9578_v27  ;;  %7979 = vmatpush3.msra.mxu1 %v9581_v1 }
0x4605   :  { %7980 = vmatprep.subr.mxu1 %v10013_v10  ;;  %7988 = vmatprep.mubr.msk.f32.mxu1 %vm8577_vm0, %v10013_v10 }
0x4606   :  { %7981 = vmatpush3.msra.mxu1 %v9587_v29  ;;  %7991 = vmatprep.subr.mxu0 %v10013_v10 }
0x4607   :  { %7982 = vmatprep.subr.mxu1 %v10013_v10 }
0x4608   :  { %7983 = vmatpush3.msra.mxu1 %v9592_v50 }
0x4609   :  { %7984 = vmatprep.subr.mxu1 %v10013_v10 }
0x460a   :  { %7985 = vmatpush3.msra.mxu1 %v9596_v56 }
0x460b   :  { %7986 = vmatprep.subr.mxu1 %v10013_v10 }
0x460c   :  { %7987 = vmatpush3.msra.mxu1 %v9600_v8 }
0x460d   :  { %8006 = vmatprep.subr.mxu1 %v10013_v10 }
0x46c1   :  { %v4879_v39 = vpop.f32.mrf.mxu0 }
0x46c3   :  { %v7963_v60 = vpop.f32.mrf.mxu0  ;;  %v4951_v49 = vpop.f32.mrf.mxu1 }
0x46c4   :  { %v4957_v55 = vrot.slane %v4951_v49, 7 }
0x46c5   :  { %v7970_v25 = vpop.f32.mrf.mxu1 }
0x46c6   :  { %v4958_v14 = vsel %vm2395_vm12, %v4957_v55, %v4879_v39 }
0x46c7   :  { %7976 = vmatmul.mubr.msk.f32.vlgmr.msra.gmra.mxu0 %vm98_vm1, %v4958_v14 }
0x46c8   :  { %7992 = vmatpush3.msra.mxu0 %v9222_v57  ;;  %8003 = vmatprep.mubr.msk.f32.mxu0 %vm8577_vm0, %v10013_v10  ;;  %v4961_v57 = vpop.permute.xlu1 %4960 }
0x46c9   :  { %7993 = vmatprep.subr.mxu0 %v10013_v10 }
0x46ca   :  { %7994 = vmatpush3.msra.mxu0 %v9228_v58 }
0x46cb   :  { %7995 = vmatprep.subr.mxu0 %v10013_v10 }
0x46cc   :  { %7996 = vmatpush3.msra.mxu0 %v9232_v19 }
0x46cd   :  { %7997 = vmatprep.subr.mxu0 %v10013_v10 }
0x46ce   :  { %7998 = vmatpush3.msra.mxu0 %v9236_v22 }
0x46cf   :  { %7999 = vmatprep.subr.mxu0 %v10013_v10 }
0x46d0   :  { %8000 = vmatpush3.msra.mxu0 %v9240_v0  ;;  %v9632_v0 = vld [vmem:[#allocation7 + $0x116] ss:$0 sm:$0xff] }
0x46d1   :  { %8001 = vmatprep.subr.mxu0 %v10013_v10 }
0x46d2   :  { %8002 = vmatpush3.msra.mxu0 %v9244_v4 }
0x46d3   :  { %8017 = vmatprep.subr.mxu0 %v10013_v10 }
0x4787   :  { %v5031_v58 = vpop.f32.mrf.mxu0 }
0x4788   :  { %v5032_v53 = vadd.f32 %v5031_v58, %v4961_v57 }
0x4789   :  { %v7977_v23 = vpop.f32.mrf.mxu0 }
0x478a   :  { %v5035_v19 = vadd.f32 %v5032_v53, %v9118_v30 }
0x478c   :  { %7989 = vmatmul.mubr.msk.f32.vlgmr.msra.gmra.mxu1 %vm2478_vm13, %v5035_v19 }
0x478d   :  { %8007 = vmatpush3.msra.mxu1 %v9368_v36  ;;  %8014 = vmatprep.mubr.msk.f32.mxu1 %vm8577_vm0, %v10013_v10 }
0x478e   :  { %8008 = vmatprep.subr.mxu1 %v10013_v10 }
0x478f   :  { %8009 = vmatpush3.msra.mxu1 %v9374_v35 }
0x4790   :  { %8010 = vmatprep.subr.mxu1 %v10013_v10 }
0x4791   :  { %8011 = vmatpush3.msra.mxu1 %v9378_v51 }
0x4792   :  { %8012 = vmatprep.subr.mxu1 %v10013_v10 }
0x4793   :  { %8013 = vmatpush3.msra.mxu1 %v9382_v48 }
0x4794   :  { %8024 = vmatprep.subr.mxu1 %v10013_v10 }
0x484c   :  { %v5105_v22 = vpop.f32.mrf.mxu1 }
0x484d   :  { %v9635_v4 = vadd.f32 %v9632_v0, %v5105_v22 }
0x484e   :  { %v7990_v52 = vpop.f32.mrf.mxu1 }
0x484f   :  { %v5122_v21 = vsel %vm2553_vm14, %v9635_v4, -inf }
0x4850   :  { %5123 = vmax.xlane.f32.xlu0 %v5122_v21 }
0x48d9   :  { %v5124_v32 = vpop.xlane.xlu0 %5123 }
0x48da   :  { %vm5125_vm7 = vcmp.eq.f32.partialorder %v9635_v4, %v5124_v32 }
0x48db   :  { %v5126_v38 = vsel %vm5125_vm7, %v8808_v28, 32 }
0x48dc   :  { %v5127_v40 = vsel %vm2553_vm14, %v5126_v38, 2147483647 }
0x48dd   :  { %v5129_v26 = vshra.s32 %v5127_v40, 16  ;;  %v5128_v59 = vand.u32 65535, %v5127_v40 }
0x48df   :  { %v5131_v43 = vcvt.s32.f32 %v5129_v26  ;;  %v5130_v15 = vcvt.s32.f32 %v5128_v59 }
0x48e1   :  { %5132 = vmin.xlane.f32.xlu1 %v5131_v43 }
0x496a   :  { %v5133_v37 = vpop.xlane.xlu1 %5132 }
0x496b   :  { %vm5134_vm8 = vcmp.eq.f32.partialorder %v5131_v43, %v5133_v37  ;;  %v5139_v3 = vcvt.f32.s32 %v5133_v37 }
0x496c   :  { %v5135_v24 = vsel %vm5134_vm8, %v5130_v15, inf }
0x496d   :  { %5136 = vmin.xlane.f32.xlu0 %v5135_v24  ;;  %v5140_v45 = vshll.u32 %v5139_v3, 16 }
0x4983   :  { %5145 = vrot.lane.b32.xlu0 %v9534_v2, %s8583_s4 }
0x49f6   :  { %v5137_v61 = vpop.xlane.xlu0 %5136 }
0x49f7   :  { %v5138_v62 = vcvt.f32.s32 %v5137_v61 }
0x49f9   :  { %v5141_v44 = vadd.s32 %v5140_v45, %v5138_v62 }
0x49fa   :  { %v5146_v47 = vpop.permute.xlu0 %5145 }
0x49fb   :  { %vm5142_vm9 = vcmp.eq.s32.totalorder %v8808_v28, %v5141_v44 }
0x49fc   :  { %v7196_v7 = vsel %vm5142_vm9, 1.0, %v10013_v10 }
0x49fd   :  { %v5148_v39 = vsel %vm277_vm2, %v7196_v7, %v5146_v47 }
0x49fe   :  { %8004 = vmatmul.mubr.msk.f32.vlgmr.msra.gmra.mxu0 %vm1941_vm10, %v5148_v39 }
0x49ff   :  { %8018 = vmatpush3.msra.mxu0 %v9400_v54  ;;  %8021 = vmatprep.mubr.msk.f32.mxu0 %vm8577_vm0, %v10013_v10 }
0x4a00   :  { %8019 = vmatprep.subr.mxu0 %v10013_v10 }
0x4a01   :  { %8020 = vmatpush3.msra.mxu0 %v9406_v11 }
0x4a02   :  { %8031 = vmatprep.subr.mxu0 %v10013_v10 }
0x4abe   :  { %v5218_v2 = vpop.f32.mrf.mxu0 }
0x4abf   :  { %v5219_v60 = vadd.f32 %v9280_v16, %v5218_v2 }
0x4ac0   :  { %v8005_v49 = vpop.f32.mrf.mxu0 }
0x4ac1   :  { %8352 = vtanh.f32 %v5219_v60  ;;  %v7198_v25 = vmul.f32 -1.442695, %v5219_v60 }
0x4ac3   :  { %8354 = vpow2.f32 %v7198_v25 }
0x4ace   :  { %v8353_v55 = vpop.eup %8352 }
0x4acf   :  { %5231 = vrot.lane.b32.xlu1 %v8353_v55, %s8581_s29 }
0x4ad0   :  { %v8355_v14 = vpop.eup %8354 }
0x4ad1   :  { %v5225_v57 = vadd.f32 1.0, %v8355_v14 }
0x4ad3   :  { %8356 = vrcp.f32 %v5225_v57 }
0x4ae0   :  { %v8357_v58 = vpop.eup %8356 }
0x4ae1   :  { %v5229_v19 = vmul.f32 %v8357_v58, %v9528_v41 }
0x4b41   :  { %v5232_v53 = vpop.permute.xlu1 %5231 }
0x4b42   :  { %v5234_v23 = vmul.f32 %v8357_v58, %v5232_v53 }
0x4b44   :  { %5236 = vrot.lane.b32.xlu1 %v5234_v23, %s8580_s28 }
0x4bb6   :  { %v5237_v22 = vpop.permute.xlu1 %5236 }
0x4bb7   :  { %v9658_v52 = vadd.f32 %v5237_v22, %v5229_v19 }
0x4bb9   :  { %8358 = vtanh.f32 %v9658_v52 }
0x4bc6   :  { %v8359_v16 = vpop.eup %8358 }
0x4bc7   :  { %5242 = vrot.lane.b32.xlu0 %v8359_v16, %s8579_s2 }
0x4bcb   :  { %5250 = vrot.lane.b32.xlu0 %v9554_v5, %s8581_s29 }
0x4c39   :  { %v5243_v21 = vpop.permute.xlu0 %5242 }
0x4c3a   :  { %v9664_v32 = vmul.f32 %v8357_v58, %v5243_v21  ;;  %v9722_v21 = vld [vmem:[#allocation7 + $0x68] sm:$0xff] }
0x4c3c   :  { %5247 = vrot.lane.b32.xlu1 %v9664_v32, %s8582_s30 }
0x4c3d   :  { %v5251_v38 = vpop.permute.xlu0 %5250 }
0x4cae   :  { %v5248_v40 = vpop.permute.xlu1 %5247 }
0x4caf   :  { %v5253_v41 = vsel %vm98_vm1, %v5248_v40, %v5251_v38  ;;  %v9728_v38 = vld [vmem:[#allocation7 + $0x60] sm:$0xff]  ;;  %v9732_v40 = vld [vmem:[#allocation7 + $0x58] sm:$0xff] }
0x4cb0   :  { %8015 = vmatmul.mubr.msk.f32.vlgmr.msra.gmra.mxu1 %vm277_vm2, %v5253_v41  ;;  %v9736_v41 = vld [vmem:[#allocation7 + $0x50] sm:$0xff] }
0x4cb1   :  { %8025 = vmatpush3.msra.mxu1 %v9045_v13  ;;  %8028 = vmatprep.mubr.msk.f32.mxu1 %vm8577_vm0, %v10013_v10 }
0x4cb2   :  { %8026 = vmatprep.subr.mxu1 %v10013_v10 }
0x4cb3   :  { %8027 = vmatpush3.msra.mxu1 %v9054_v42 }
0x4cb4   :  { %8038 = vmatprep.subr.mxu1 %v10013_v10 }
0x4d70   :  { %v5323_v5 = vpop.f32.mrf.mxu1 }
0x4d71   :  { %v5324_v26 = vadd.f32 %v9304_v34, %v5323_v5  ;;  %v9740_v5 = vld [vmem:[#allocation7 + $0x48] sm:$0xff] }
0x4d72   :  { %v8016_v43 = vpop.f32.mrf.mxu1 }
0x4d73   :  { %8360 = vtanh.f32 %v5324_v26  ;;  %v7200_v37 = vmul.f32 -1.442695, %v5324_v26  ;;  %v9744_v26 = vld [vmem:[#allocation7 + $0x40] sm:$0xff] }
0x4d75   :  { %8362 = vpow2.f32 %v7200_v37 }
0x4d80   :  { %v8361_v59 = vpop.eup %8360 }
0x4d81   :  { %5336 = vrot.lane.b32.xlu1 %v8361_v59, %s8581_s29 }
0x4d82   :  { %v8363_v15 = vpop.eup %8362 }
0x4d83   :  { %v5330_v24 = vadd.f32 1.0, %v8363_v15 }
0x4d85   :  { %8364 = vrcp.f32 %v5330_v24 }
0x4d92   :  { %v8365_v3 = vpop.eup %8364 }
0x4d93   :  { %v5334_v62 = vmul.f32 %v8365_v3, %v9550_v20 }
0x4df3   :  { %v5337_v61 = vpop.permute.xlu1 %5336 }
0x4df4   :  { %v5339_v45 = vmul.f32 %v8365_v3, %v5337_v61 }
0x4df6   :  { %5341 = vrot.lane.b32.xlu0 %v5339_v45, %s8580_s28 }
0x4e68   :  { %v5342_v44 = vpop.permute.xlu0 %5341 }
0x4e69   :  { %v9680_v7 = vadd.f32 %v5342_v44, %v5334_v62 }
0x4e6b   :  { %8366 = vtanh.f32 %v9680_v7 }
0x4e78   :  { %v8367_v34 = vpop.eup %8366 }
0x4e79   :  { %5347 = vrot.lane.b32.xlu1 %v8367_v34, %s8579_s2 }
0x4eeb   :  { %v5348_v47 = vpop.permute.xlu1 %5347 }
0x4eec   :  { %v9684_v39 = vmul.f32 %v8365_v3, %v5348_v47 }
0x4eee   :  { %5352 = vrot.lane.b32.xlu0 %v9684_v39, %s8582_s30 }
0x4f60   :  { %v5353_v2 = vpop.permute.xlu0 %5352 }
0x4f61   :  { %8022 = vmatmul.mubr.msk.f32.vlgmr.msra.gmra.mxu0 %vm98_vm1, %v5353_v2 }
0x4f62   :  { %8032 = vmatpush3.msra.mxu0 %v9047_v12  ;;  %8035 = vmatprep.mubr.msk.f32.mxu0 %vm8577_vm0, %v10013_v10 }
0x4f63   :  { %8033 = vmatprep.subr.mxu0 %v10013_v10 }
0x4f64   :  { %8034 = vmatpush3.msra.mxu0 %v9056_v6 }
0x4f65   :  { %8045 = vmatprep.subr.mxu0 %v10013_v10 }
0x5021   :  { %v5422_v20 = vpop.f32.mrf.mxu0 }
0x5022   :  { %v5426_v60 = vadd.f32 %v5422_v20, %v9032_v9  ;;  %5599 = vrot.lane.b32.xlu1 %v5422_v20, %s8583_s4 }
0x5023   :  { %v8023_v49 = vpop.f32.mrf.mxu0 }
0x5024   :  { %v5434_v55 = vrot.slane %v5426_v60, %v8998_v17 }
0x5026   :  { %v5435_v25 = vcombine.high %v5434_v55, %v5434_v55  ;;  %v5442_v14 = vrot.slane %v5434_v55, %v8998_v17 }
0x5028   :  { %v5449_v57 = vrot.slane %v5435_v25, %v8998_v17  ;;  %8029 = vmatmul.mubr.msk.f32.vlgmr.msra.gmra.mxu1 %vm98_vm1, %v5442_v14 }
0x5029   :  { %8039 = vmatpush3.msra.mxu1 %v9571_v18  ;;  %8042 = vmatprep.mubr.msk.f32.mxu1 %vm8577_vm0, %v10013_v10 }
0x502a   :  { %8036 = vmatmul.mubr.msk.f32.vlgmr.msra.gmra.mxu0 %vm98_vm1, %v5449_v57  ;;  %8040 = vmatprep.subr.mxu1 %v10013_v10 }
0x502b   :  { %8041 = vmatpush3.msra.mxu1 %v9578_v27  ;;  %8046 = vmatpush3.msra.mxu0 %v9581_v1 }
0x502c   :  { %8047 = vmatprep.subr.mxu0 %v10013_v10  ;;  %8055 = vmatprep.mubr.msk.f32.mxu0 %vm8577_vm0, %v10013_v10 }
0x502d   :  { %8048 = vmatpush3.msra.mxu0 %v9587_v29  ;;  %8058 = vmatprep.subr.mxu1 %v10013_v10 }
0x502e   :  { %8049 = vmatprep.subr.mxu0 %v10013_v10 }
0x502f   :  { %8050 = vmatpush3.msra.mxu0 %v9592_v50 }
0x5030   :  { %8051 = vmatprep.subr.mxu0 %v10013_v10 }
0x5031   :  { %8052 = vmatpush3.msra.mxu0 %v9596_v56 }
0x5032   :  { %8053 = vmatprep.subr.mxu0 %v10013_v10 }
0x5033   :  { %8054 = vmatpush3.msra.mxu0 %v9600_v8 }
0x5034   :  { %8073 = vmatprep.subr.mxu0 %v10013_v10 }
0x5094   :  { %v5600_v43 = vpop.permute.xlu1 %5599 }
0x50e8   :  { %v5518_v58 = vpop.f32.mrf.mxu1 }
0x50ea   :  { %v8030_v53 = vpop.f32.mrf.mxu1  ;;  %v5590_v23 = vpop.f32.mrf.mxu0 }
0x50eb   :  { %v5596_v19 = vrot.slane %v5590_v23, 7  ;;  %v9780_v23 = vld [vmem:[#allocation7 + $0x112] ss:$0 sm:$0xff] }
0x50ec   :  { %v8037_v22 = vpop.f32.mrf.mxu0 }
0x50ed   :  { %v5597_v16 = vsel %vm2395_vm12, %v5596_v19, %v5518_v58 }
0x50ee   :  { %8043 = vmatmul.mubr.msk.f32.vlgmr.msra.gmra.mxu1 %vm98_vm1, %v5597_v16 }
0x50ef   :  { %8059 = vmatpush3.msra.mxu1 %v9722_v21  ;;  %8070 = vmatprep.mubr.msk.f32.mxu1 %vm8577_vm0, %v10013_v10 }
0x50f0   :  { %8060 = vmatprep.subr.mxu1 %v10013_v10 }
0x50f1   :  { %8061 = vmatpush3.msra.mxu1 %v9728_v38 }
0x50f2   :  { %8062 = vmatprep.subr.mxu1 %v10013_v10 }
0x50f3   :  { %8063 = vmatpush3.msra.mxu1 %v9732_v40 }
0x50f4   :  { %8064 = vmatprep.subr.mxu1 %v10013_v10 }
0x50f5   :  { %8065 = vmatpush3.msra.mxu1 %v9736_v41 }
0x50f6   :  { %8066 = vmatprep.subr.mxu1 %v10013_v10 }
0x50f7   :  { %8067 = vmatpush3.msra.mxu1 %v9740_v5 }
0x50f8   :  { %8068 = vmatprep.subr.mxu1 %v10013_v10 }
0x50f9   :  { %8069 = vmatpush3.msra.mxu1 %v9744_v26 }
0x50fa   :  { %8084 = vmatprep.subr.mxu1 %v10013_v10 }
0x51ae   :  { %v5670_v59 = vpop.f32.mrf.mxu1 }
0x51af   :  { %v5671_v37 = vadd.f32 %v5670_v59, %v5600_v43 }
0x51b0   :  { %v8044_v15 = vpop.f32.mrf.mxu1 }
0x51b1   :  { %v5674_v24 = vadd.f32 %v5671_v37, %v9118_v30 }
0x51b3   :  { %8056 = vmatmul.mubr.msk.f32.vlgmr.msra.gmra.mxu0 %vm2478_vm13, %v5674_v24 }
0x51b4   :  { %8074 = vmatpush3.msra.mxu0 %v9368_v36  ;;  %8081 = vmatprep.mubr.msk.f32.mxu0 %vm8577_vm0, %v10013_v10 }
0x51b5   :  { %8075 = vmatprep.subr.mxu0 %v10013_v10 }
0x51b6   :  { %8076 = vmatpush3.msra.mxu0 %v9374_v35 }
0x51b7   :  { %8077 = vmatprep.subr.mxu0 %v10013_v10 }
0x51b8   :  { %8078 = vmatpush3.msra.mxu0 %v9378_v51 }
0x51b9   :  { %8079 = vmatprep.subr.mxu0 %v10013_v10 }
0x51ba   :  { %8080 = vmatpush3.msra.mxu0 %v9382_v48 }
0x51bb   :  { %8091 = vmatprep.subr.mxu0 %v10013_v10 }
0x5273   :  { %v5744_v3 = vpop.f32.mrf.mxu0 }
0x5274   :  { %v9761_v36 = vadd.f32 %v9632_v0, %v5744_v3 }
0x5275   :  { %v8057_v61 = vpop.f32.mrf.mxu0 }
0x5276   :  { %v5761_v45 = vsel %vm2553_vm14, %v9761_v36, -inf }
0x5277   :  { %5762 = vmax.xlane.f32.xlu0 %v5761_v45 }
0x5300   :  { %v5763_v35 = vpop.xlane.xlu0 %5762 }
0x5301   :  { %vm5764_vm11 = vcmp.eq.f32.partialorder %v9761_v36, %v5763_v35 }
0x5302   :  { %v5765_v51 = vsel %vm5764_vm11, %v8808_v28, 32 }
0x5303   :  { %v5766_v62 = vsel %vm2553_vm14, %v5765_v51, 2147483647 }
0x5304   :  { %v5768_v44 = vshra.s32 %v5766_v62, 16  ;;  %v5767_v34 = vand.u32 65535, %v5766_v62 }
0x5306   :  { %v5770_v48 = vcvt.s32.f32 %v5768_v44  ;;  %v5769_v2 = vcvt.s32.f32 %v5767_v34 }
0x5308   :  { %5771 = vmin.xlane.f32.xlu1 %v5770_v48 }
0x5391   :  { %v5772_v47 = vpop.xlane.xlu1 %5771 }
0x5392   :  { %vm5773_vm15 = vcmp.eq.f32.partialorder %v5770_v48, %v5772_v47  ;;  %v5778_v60 = vcvt.f32.s32 %v5772_v47  ;;  %v9804_v48 = vld [vmem:[#allocation7 + $0x113] ss:$0 sm:$0xff] }
0x5393   :  { %v5774_v20 = vsel %vm5773_vm15, %v5769_v2, inf }
0x5394   :  { %5775 = vmin.xlane.f32.xlu0 %v5774_v20  ;;  %v5779_v55 = vshll.u32 %v5778_v60, 16 }
0x53aa   :  { %5784 = vrot.lane.b32.xlu0 %v9664_v32, %s8583_s4 }
0x541d   :  { %v5776_v49 = vpop.xlane.xlu0 %5775 }
0x541e   :  { %v5777_v25 = vcvt.f32.s32 %v5776_v49 }
0x5420   :  { %v5780_v14 = vadd.s32 %v5779_v55, %v5777_v25 }
0x5421   :  { %v5785_v58 = vpop.permute.xlu0 %5784 }
0x5422   :  { %vm5781_vm4 = vcmp.eq.s32.totalorder %v8808_v28, %v5780_v14 }
0x5423   :  { %v7206_v57 = vsel %vm5781_vm4, 1.0, %v10013_v10 }
0x5424   :  { %v5787_v53 = vsel %vm277_vm2, %v7206_v57, %v5785_v58 }
0x5425   :  { %8071 = vmatmul.mubr.msk.f32.vlgmr.msra.gmra.mxu1 %vm1941_vm10, %v5787_v53 }
0x5426   :  { %8085 = vmatpush3.msra.mxu1 %v9400_v54  ;;  %8088 = vmatprep.mubr.msk.f32.mxu1 %vm8577_vm0, %v10013_v10 }
0x5427   :  { %8086 = vmatprep.subr.mxu1 %v10013_v10 }
0x5428   :  { %8087 = vmatpush3.msra.mxu1 %v9406_v11 }
0x5429   :  { %8098 = vmatprep.subr.mxu1 %v10013_v10 }
0x54e5   :  { %v5857_v32 = vpop.f32.mrf.mxu1 }
0x54e6   :  { %v5858_v19 = vadd.f32 %v9780_v23, %v5857_v32 }
0x54e7   :  { %v8072_v22 = vpop.f32.mrf.mxu1 }
0x54e8   :  { %8368 = vtanh.f32 %v5858_v19  ;;  %v7208_v54 = vmul.f32 -1.442695, %v5858_v19 }
0x54ea   :  { %8370 = vpow2.f32 %v7208_v54 }
0x54f5   :  { %v8369_v16 = vpop.eup %8368 }
0x54f6   :  { %5870 = vrot.lane.b32.xlu1 %v8369_v16, %s8581_s29 }
0x54f7   :  { %v8371_v43 = vpop.eup %8370 }
0x54f8   :  { %v5864_v59 = vadd.f32 1.0, %v8371_v43 }
0x54fa   :  { %8372 = vrcp.f32 %v5864_v59 }
0x5507   :  { %v8373_v37 = vpop.eup %8372 }
0x5508   :  { %v5868_v24 = vmul.f32 %v8373_v37, %v9658_v52 }
0x5568   :  { %v5871_v15 = vpop.permute.xlu1 %5870 }
0x5569   :  { %v5873_v11 = vmul.f32 %v8373_v37, %v5871_v15 }
0x556b   :  { %5875 = vrot.lane.b32.xlu1 %v5873_v11, %s8580_s28 }
0x55dd   :  { %v5876_v3 = vpop.permute.xlu1 %5875 }
0x55de   :  { %v9786_v61 = vadd.f32 %v5876_v3, %v5868_v24 }
0x55e0   :  { %8374 = vtanh.f32 %v9786_v61 }
0x55ed   :  { %v8375_v45 = vpop.eup %8374 }
0x55ee   :  { %5881 = vrot.lane.b32.xlu0 %v8375_v45, %s8579_s2 }
0x55f2   :  { %5889 = vrot.lane.b32.xlu0 %v9684_v39, %s8581_s29 }
0x5660   :  { %v5882_v35 = vpop.permute.xlu0 %5881 }
0x5661   :  { %v9792_v51 = vmul.f32 %v8373_v37, %v5882_v35 }
0x5663   :  { %5886 = vrot.lane.b32.xlu1 %v9792_v51, %s8582_s30 }
0x5664   :  { %v5890_v62 = vpop.permute.xlu0 %5889 }
0x56d5   :  { %v5887_v44 = vpop.permute.xlu1 %5886 }
0x56d6   :  { %v5892_v52 = vsel %vm98_vm1, %v5887_v44, %v5890_v62 }
0x56d7   :  { %8082 = vmatmul.mubr.msk.f32.vlgmr.msra.gmra.mxu0 %vm277_vm2, %v5892_v52 }
0x56d8   :  { %8092 = vmatpush3.msra.mxu0 %v9045_v13  ;;  %8095 = vmatprep.mubr.msk.f32.mxu0 %vm8577_vm0, %v10013_v10 }
0x56d9   :  { %8093 = vmatprep.subr.mxu0 %v10013_v10 }
0x56da   :  { %8094 = vmatpush3.msra.mxu0 %v9054_v42 }
0x56db   :  { %8105 = vmatprep.subr.mxu0 %v10013_v10 }
0x5797   :  { %v5962_v39 = vpop.f32.mrf.mxu0 }
0x5798   :  { %v5963_v34 = vadd.f32 %v9804_v48, %v5962_v39 }
0x5799   :  { %v8083_v47 = vpop.f32.mrf.mxu0 }
0x579a   :  { %8376 = vtanh.f32 %v5963_v34  ;;  %v7210_v20 = vmul.f32 -1.442695, %v5963_v34  ;;  %v8478_v34 = vld [vmem:[#allocation7 + $0x88] sm:$0xff] }
0x579c   :  { %8378 = vpow2.f32 %v7210_v20 }
0x57a7   :  { %v8377_v2 = vpop.eup %8376 }
0x57a8   :  { %5975 = vrot.lane.b32.xlu1 %v8377_v2, %s8581_s29 }
0x57a9   :  { %v8379_v60 = vpop.eup %8378 }
0x57aa   :  { %v5969_v49 = vadd.f32 1.0, %v8379_v60 }
0x57ac   :  { %8380 = vrcp.f32 %v5969_v49 }
0x57b9   :  { %v8381_v55 = vpop.eup %8380 }
0x57ba   :  { %v5973_v57 = vmul.f32 %v8381_v55, %v9680_v7 }
0x581a   :  { %v5976_v25 = vpop.permute.xlu1 %5975 }
0x581b   :  { %v5978_v14 = vmul.f32 %v8381_v55, %v5976_v25 }
0x581d   :  { %5980 = vrot.lane.b32.xlu0 %v5978_v14, %s8580_s28 }
0x588f   :  { %v5981_v58 = vpop.permute.xlu0 %5980 }
0x5890   :  { %v9810_v53 = vadd.f32 %v5981_v58, %v5973_v57 }
0x5892   :  { %8382 = vtanh.f32 %v9810_v53 }
0x589f   :  { %v8383_v32 = vpop.eup %8382 }
0x58a0   :  { %5986 = vrot.lane.b32.xlu1 %v8383_v32, %s8579_s2 }
0x5912   :  { %v5987_v19 = vpop.permute.xlu1 %5986 }
0x5913   :  { %v9814_v22 = vmul.f32 %v8381_v55, %v5987_v19 }
0x5915   :  { %5991 = vrot.lane.b32.xlu0 %v9814_v22, %s8582_s30 }
0x5987   :  { %v5992_v16 = vpop.permute.xlu0 %5991 }
0x5988   :  { %8089 = vmatmul.mubr.msk.f32.vlgmr.msra.gmra.mxu1 %vm98_vm1, %v5992_v16 }
0x5989   :  { %8099 = vmatpush3.msra.mxu1 %v9047_v12  ;;  %8102 = vmatprep.mubr.msk.f32.mxu1 %vm8577_vm0, %v10013_v10 }
0x598a   :  { %8100 = vmatprep.subr.mxu1 %v10013_v10 }
0x598b   :  { %8101 = vmatpush3.msra.mxu1 %v9056_v6 }
0x598c   :  { %8112 = vmatprep.subr.mxu1 %v10013_v10 }
0x5a48   :  { %v6061_v7 = vpop.f32.mrf.mxu1 }
0x5a49   :  { %v6065_v54 = vadd.f32 %v6061_v7, %v9032_v9  ;;  %6238 = vrot.lane.b32.xlu1 %v6061_v7, %s8583_s4 }
0x5a4a   :  { %v8090_v43 = vpop.f32.mrf.mxu1 }
0x5a4b   :  { %v6073_v59 = vrot.slane %v6065_v54, %v8998_v17 }
0x5a4d   :  { %v6074_v37 = vcombine.high %v6073_v59, %v6073_v59  ;;  %v6081_v15 = vrot.slane %v6073_v59, %v8998_v17 }
0x5a4f   :  { %v6088_v11 = vrot.slane %v6074_v37, %v8998_v17  ;;  %8096 = vmatmul.mubr.msk.f32.vlgmr.msra.gmra.mxu0 %vm98_vm1, %v6081_v15 }
0x5a50   :  { %8106 = vmatpush3.msra.mxu0 %v9571_v18  ;;  %8109 = vmatprep.mubr.msk.f32.mxu0 %vm8577_vm0, %v10013_v10 }
0x5a51   :  { %8103 = vmatmul.mubr.msk.f32.vlgmr.msra.gmra.mxu1 %vm98_vm1, %v6088_v11  ;;  %8107 = vmatprep.subr.mxu0 %v10013_v10 }
0x5a52   :  { %8108 = vmatpush3.msra.mxu0 %v9578_v27  ;;  %8113 = vmatpush3.msra.mxu1 %v9581_v1 }
0x5a53   :  { %8114 = vmatprep.subr.mxu1 %v10013_v10  ;;  %8122 = vmatprep.mubr.msk.f32.mxu1 %vm8577_vm0, %v10013_v10 }
0x5a54   :  { %8115 = vmatpush3.msra.mxu1 %v9587_v29  ;;  %8125 = vmatprep.subr.mxu0 %v10013_v10 }
0x5a55   :  { %8116 = vmatprep.subr.mxu1 %v10013_v10 }
0x5a56   :  { %8117 = vmatpush3.msra.mxu1 %v9592_v50 }
0x5a57   :  { %8118 = vmatprep.subr.mxu1 %v10013_v10 }
0x5a58   :  { %8119 = vmatpush3.msra.mxu1 %v9596_v56 }
0x5a59   :  { %8120 = vmatprep.subr.mxu1 %v10013_v10 }
0x5a5a   :  { %8121 = vmatpush3.msra.mxu1 %v9600_v8 }
0x5a5b   :  { %8140 = vmatprep.subr.mxu1 %v10013_v10 }
0x5b0f   :  { %v6157_v24 = vpop.f32.mrf.mxu0 }
0x5b11   :  { %v8097_v3 = vpop.f32.mrf.mxu0  ;;  %v6229_v45 = vpop.f32.mrf.mxu1 }
0x5b12   :  { %v6235_v35 = vrot.slane %v6229_v45, 7 }
0x5b13   :  { %v8104_v62 = vpop.f32.mrf.mxu1 }
0x5b14   :  { %v6236_v44 = vsel %vm2395_vm12, %v6235_v35, %v6157_v24  ;;  %v8482_v24 = vld [vmem:[#allocation7 + $0x98] sm:$0xff] }
0x5b15   :  { %8110 = vmatmul.mubr.msk.f32.vlgmr.msra.gmra.mxu0 %vm98_vm1, %v6236_v44 }
0x5b16   :  { %8126 = vmatpush3.msra.mxu0 %v9722_v21  ;;  %8137 = vmatprep.mubr.msk.f32.mxu0 %vm8577_vm0, %v10013_v10  ;;  %v6239_v21 = vpop.permute.xlu1 %6238 }
0x5b17   :  { %8127 = vmatprep.subr.mxu0 %v10013_v10 }
0x5b18   :  { %8128 = vmatpush3.msra.mxu0 %v9728_v38 }
0x5b19   :  { %8129 = vmatprep.subr.mxu0 %v10013_v10 }
0x5b1a   :  { %8130 = vmatpush3.msra.mxu0 %v9732_v40 }
0x5b1b   :  { %8131 = vmatprep.subr.mxu0 %v10013_v10 }
0x5b1c   :  { %8132 = vmatpush3.msra.mxu0 %v9736_v41  ;;  %v8479_v41 = vld [vmem:[#allocation7 + $0x80] sm:$0xff] }
0x5b1d   :  { %8133 = vmatprep.subr.mxu0 %v10013_v10 }
0x5b1e   :  { %8134 = vmatpush3.msra.mxu0 %v9740_v5  ;;  %v8480_v5 = vld [vmem:[#allocation7 + $0x78] sm:$0xff] }
0x5b1f   :  { %8135 = vmatprep.subr.mxu0 %v10013_v10 }
0x5b20   :  { %8136 = vmatpush3.msra.mxu0 %v9744_v26  ;;  %v8481_v26 = vld [vmem:[#allocation7 + $0x70] sm:$0xff] }
0x5b21   :  { %8151 = vmatprep.subr.mxu0 %v10013_v10 }
0x5bd5   :  { %v6309_v38 = vpop.f32.mrf.mxu0 }
0x5bd6   :  { %v6310_v52 = vadd.f32 %v6309_v38, %v6239_v21 }
0x5bd7   :  { %v8111_v39 = vpop.f32.mrf.mxu0 }
0x5bd8   :  { %v6313_v40 = vadd.f32 %v6310_v52, %v9118_v30 }
0x5bda   :  { %8123 = vmatmul.mubr.msk.f32.vlgmr.msra.gmra.mxu1 %vm2478_vm13, %v6313_v40 }
0x5bdb   :  { %8141 = vmatpush3.msra.mxu1 %v8478_v34  ;;  %8148 = vmatprep.mubr.msk.f32.mxu1 %vm8577_vm0, %v10013_v10 }
0x5bdc   :  { %8142 = vmatprep.subr.mxu1 %v10013_v10 }
0x5bdd   :  { %8143 = vmatpush3.msra.mxu1 %v8479_v41 }
0x5bde   :  { %8144 = vmatprep.subr.mxu1 %v10013_v10 }
0x5bdf   :  { %8145 = vmatpush3.msra.mxu1 %v8480_v5 }
0x5be0   :  { %8146 = vmatprep.subr.mxu1 %v10013_v10 }
0x5be1   :  { %8147 = vmatpush3.msra.mxu1 %v8481_v26 }
0x5be2   :  { %8158 = vmatprep.subr.mxu1 %v10013_v10 }
0x5c9a   :  { %v6383_v47 = vpop.f32.mrf.mxu1 }
0x5c9b   :  { %v9875_v2 = vadd.f32 %v9632_v0, %v6383_v47 }
0x5c9c   :  { %v8124_v20 = vpop.f32.mrf.mxu1 }
0x5c9d   :  { %v6400_v60 = vsel %vm2553_vm14, %v9875_v2, -inf }
0x5c9e   :  { %6401 = vmax.xlane.f32.xlu0 %v6400_v60 }
0x5d27   :  { %v6402_v49 = vpop.xlane.xlu0 %6401 }
0x5d28   :  { %vm6403_vm5 = vcmp.eq.f32.partialorder %v9875_v2, %v6402_v49 }
0x5d29   :  { %v6404_v55 = vsel %vm6403_vm5, %v8808_v28, 32 }
0x5d2a   :  { %v6405_v25 = vsel %vm2553_vm14, %v6404_v55, 2147483647 }
0x5d2b   :  { %v6407_v14 = vshra.s32 %v6405_v25, 16  ;;  %v6406_v58 = vand.u32 65535, %v6405_v25 }
0x5d2d   :  { %v6409_v57 = vcvt.s32.f32 %v6407_v14  ;;  %v6408_v19 = vcvt.s32.f32 %v6406_v58 }
0x5d2f   :  { %6410 = vmin.xlane.f32.xlu1 %v6409_v57 }
0x5db8   :  { %v6411_v32 = vpop.xlane.xlu1 %6410 }
0x5db9   :  { %vm6412_vm6 = vcmp.eq.f32.partialorder %v6409_v57, %v6411_v32  ;;  %v6417_v16 = vcvt.f32.s32 %v6411_v32 }
0x5dba   :  { %v6413_v0 = vsel %vm6412_vm6, %v6408_v19, inf }
0x5dbb   :  { %6414 = vmin.xlane.f32.xlu0 %v6413_v0  ;;  %v6418_v54 = vshll.u32 %v6417_v16, 16 }
0x5dd1   :  { %6423 = vrot.lane.b32.xlu0 %v9792_v51, %s8583_s4  ;;  %v8483_v51 = vld [vmem:[#allocation7 + $0x90] sm:$0xff] }
0x5e44   :  { %v6415_v7 = vpop.xlane.xlu0 %6414 }
0x5e45   :  { %v6416_v43 = vcvt.f32.s32 %v6415_v7 }
0x5e47   :  { %v6419_v59 = vadd.s32 %v6418_v54, %v6416_v43 }
0x5e48   :  { %v6424_v15 = vpop.permute.xlu0 %6423 }
0x5e49   :  { %vm6420_vm7 = vcmp.eq.s32.totalorder %v8808_v28, %v6419_v59 }
0x5e4a   :  { %v7216_v37 = vsel %vm6420_vm7, 1.0, %v10013_v10 }
0x5e4b   :  { %v6426_v11 = vsel %vm277_vm2, %v7216_v37, %v6424_v15 }
0x5e4c   :  { %8138 = vmatmul.mubr.msk.f32.vlgmr.msra.gmra.mxu0 %vm1941_vm10, %v6426_v11  ;;  %vm7091_vm10 = vcmask 1043458  }
0x5e4d   :  { %8152 = vmatpush3.msra.mxu0 %v8482_v24  ;;  %8155 = vmatprep.mubr.msk.f32.mxu0 %vm8577_vm0, %v10013_v10 }
0x5e4e   :  { %8153 = vmatprep.subr.mxu0 %v10013_v10 }
0x5e4f   :  { %8154 = vmatpush3.msra.mxu0 %v8483_v51 }
0x5e50   :  { %8165 = vmatprep.subr.mxu0 %v10013_v10 }
0x5f0c   :  { %v6496_v3 = vpop.f32.mrf.mxu0 }
0x5f0d   :  { %v6497_v28 = vadd.f32 %v9780_v23, %v6496_v3 }
0x5f0e   :  { %v8139_v45 = vpop.f32.mrf.mxu0 }
0x5f0f   :  { %8384 = vtanh.f32 %v6497_v28  ;;  %v7218_v62 = vmul.f32 -1.442695, %v6497_v28 }
0x5f11   :  { %8386 = vpow2.f32 %v7218_v62 }
0x5f1c   :  { %v8385_v35 = vpop.eup %8384 }
0x5f1d   :  { %6509 = vrot.lane.b32.xlu1 %v8385_v35, %s8581_s29 }
0x5f1e   :  { %v8387_v44 = vpop.eup %8386 }
0x5f1f   :  { %v6503_v21 = vadd.f32 1.0, %v8387_v44 }
0x5f21   :  { %8388 = vrcp.f32 %v6503_v21 }
0x5f2e   :  { %v8389_v38 = vpop.eup %8388 }
0x5f2f   :  { %v6507_v40 = vmul.f32 %v8389_v38, %v9786_v61 }
0x5f8f   :  { %v6510_v52 = vpop.permute.xlu1 %6509 }
0x5f90   :  { %v6512_v39 = vmul.f32 %v8389_v38, %v6510_v52 }
0x5f92   :  { %6514 = vrot.lane.b32.xlu1 %v6512_v39, %s8580_s28 }
0x6004   :  { %v6515_v34 = vpop.permute.xlu1 %6514 }
0x6005   :  { %v6517_v41 = vadd.f32 %v6515_v34, %v6507_v40 }
0x6007   :  { %8390 = vtanh.f32 %v6517_v41 }
0x6014   :  { %v8391_v23 = vpop.eup %8390 }
0x6015   :  { %6520 = vrot.lane.b32.xlu0 %v8391_v23, %s8579_s2 }
0x6019   :  { %6528 = vrot.lane.b32.xlu0 %v9814_v22, %s8581_s29 }
0x6087   :  { %v6521_v5 = vpop.permute.xlu0 %6520 }
0x6088   :  { %v6523_v26 = vmul.f32 %v8389_v38, %v6521_v5 }
0x608a   :  { %6525 = vrot.lane.b32.xlu1 %v6523_v26, %s8582_s30 }
0x608b   :  { %v6529_v47 = vpop.permute.xlu0 %6528 }
0x60fc   :  { %v6526_v20 = vpop.permute.xlu1 %6525 }
0x60fd   :  { %v6531_v60 = vsel %vm98_vm1, %v6526_v20, %v6529_v47 }
0x60fe   :  { %8149 = vmatmul.mubr.msk.f32.vlgmr.msra.gmra.mxu1 %vm277_vm2, %v6531_v60 }
0x60ff   :  { %8159 = vmatpush3.msra.mxu1 %v9045_v13  ;;  %8162 = vmatprep.mubr.msk.f32.mxu1 %vm8577_vm0, %v10013_v10 }
0x6100   :  { %8160 = vmatprep.subr.mxu1 %v10013_v10 }
0x6101   :  { %8161 = vmatpush3.msra.mxu1 %v9054_v42 }
0x6102   :  { %8172 = vmatprep.subr.mxu1 %v10013_v10 }
0x61be   :  { %v6601_v61 = vpop.f32.mrf.mxu1 }
0x61bf   :  { %v6602_v22 = vadd.f32 %v9804_v48, %v6601_v61 }
0x61c0   :  { %v8150_v49 = vpop.f32.mrf.mxu1 }
0x61c1   :  { %8392 = vtanh.f32 %v6602_v22  ;;  %v7220_v25 = vmul.f32 -1.442695, %v6602_v22 }
0x61c3   :  { %8394 = vpow2.f32 %v7220_v25 }
0x61ce   :  { %v8393_v55 = vpop.eup %8392 }
0x61cf   :  { %6614 = vrot.lane.b32.xlu1 %v8393_v55, %s8581_s29 }
0x61d0   :  { %v8395_v13 = vpop.eup %8394 }
0x61d1   :  { %v6608_v14 = vadd.f32 1.0, %v8395_v13 }
0x61d3   :  { %8396 = vrcp.f32 %v6608_v14 }
0x61e0   :  { %v8397_v57 = vpop.eup %8396 }
0x61e1   :  { %v6612_v42 = vmul.f32 %v8397_v57, %v9810_v53 }
0x6241   :  { %v6615_v58 = vpop.permute.xlu1 %6614 }
0x6242   :  { %v6617_v32 = vmul.f32 %v8397_v57, %v6615_v58 }
0x6244   :  { %6619 = vrot.lane.b32.xlu0 %v6617_v32, %s8580_s28 }
0x62b6   :  { %v6620_v19 = vpop.permute.xlu0 %6619 }
0x62b7   :  { %v6622_v0 = vadd.f32 %v6620_v19, %v6612_v42 }
0x62b9   :  { %8398 = vtanh.f32 %v6622_v0 }
0x62ba   :  { %8400 = vtanh.f32 %v9135_v31 }
0x62bb   :  { %8402 = vtanh.f32 %v9261_v33 }
0x62bc   :  { %8404 = vtanh.f32 %v9761_v36 }
0x62bd   :  { %8406 = vtanh.f32 %v9875_v2 }
0x62be   :  { %8408 = vtanh.f32 %v9635_v4 }
0x62bf   :  { %8410 = vtanh.f32 %v9387_v46 }
0x62c0   :  { %8412 = vtanh.f32 %v9505_v63 }
0x62c6   :  { %v8399_v48 = vpop.eup %8398 }
0x62c7   :  { %6625 = vrot.lane.b32.xlu1 %v8399_v48, %s8579_s2  ;;  %v8401_v54 = vpop.eup %8400 }
0x62c8   :  { %v2554_v53 = vsel %vm2553_vm14, %v8401_v54, -inf  ;;  %v8403_v43 = vpop.eup %8402 }
0x62c9   :  { %v3193_v59 = vsel %vm2553_vm14, %v8403_v43, -inf  ;;  %v9920_v37 = vpop.eup %8404 }
0x62ca   :  { %v5749_v15 = vsel %vm2553_vm14, %v9920_v37, -inf  ;;  %v9924_v31 = vpop.eup %8406 }
0x62cb   :  { %v6388_v33 = vsel %vm2553_vm14, %v9924_v31, -inf }
0x6339   :  { %v6626_v16 = vpop.permute.xlu1 %6625 }
0x633a   :  { %v6628_v7 = vmul.f32 %v8397_v57, %v6626_v16 }
0x633c   :  { %6630 = vrot.lane.b32.xlu0 %v6628_v7, %s8582_s30 }
0x635b   :  { %2555 = vmax.xlane.f32.xlu0 %v2554_v53 }
0x635f   :  { %3194 = vmax.xlane.f32.xlu0 %v3193_v59 }
0x6363   :  { %5750 = vmax.xlane.f32.xlu0 %v5749_v15  ;;  %v8484_v15 = vld [vmem:[#allocation7 + $0x116] ss:$0 sm:$0xff] }
0x6367   :  { %6389 = vmax.xlane.f32.xlu0 %v6388_v33 }
0x63ae   :  { %v6631_v36 = vpop.permute.xlu0 %6630 }
0x63af   :  { %8156 = vmatmul.mubr.msk.f32.vlgmr.msra.gmra.mxu0 %vm98_vm1, %v6631_v36 }
0x63b0   :  { %8166 = vmatpush3.msra.mxu0 %v9047_v12  ;;  %8169 = vmatprep.mubr.msk.f32.mxu0 %vm8577_vm0, %v10013_v10 }
0x63b1   :  { %8167 = vmatprep.subr.mxu0 %v10013_v10 }
0x63b2   :  { %8168 = vmatpush3.msra.mxu0 %v9056_v6 }
0x63b3   :  { %8179 = vmatprep.subr.mxu0 %v10013_v10 }
0x646f   :  { %v6700_v2 = vpop.f32.mrf.mxu0 }
0x6470   :  { %v6704_v11 = vadd.f32 %v6700_v2, %v9032_v9  ;;  %6877 = vrot.lane.b32.xlu1 %v6700_v2, %s8583_s4 }
0x6471   :  { %v8157_v24 = vpop.f32.mrf.mxu0 }
0x6472   :  { %v6712_v51 = vrot.slane %v6704_v11, %v8998_v17 }
0x6474   :  { %v6713_v3 = vcombine.high %v6712_v51, %v6712_v51  ;;  %v6720_v12 = vrot.slane %v6712_v51, %v8998_v17 }
0x6476   :  { %v6727_v28 = vrot.slane %v6713_v3, %v8998_v17  ;;  %8163 = vmatmul.mubr.msk.f32.vlgmr.msra.gmra.mxu1 %vm98_vm1, %v6720_v12  ;;  %v2556_v17 = vpop.xlane.xlu0 %2555 }
0x6477   :  { %8173 = vmatpush3.msra.mxu1 %v9571_v18  ;;  %8176 = vmatprep.mubr.msk.f32.mxu1 %vm8577_vm0, %v10013_v10  ;;  %v2557_v9 = vsub.f32 %v8401_v54, %v2556_v17 }
0x6478   :  { %8170 = vmatmul.mubr.msk.f32.vlgmr.msra.gmra.mxu0 %vm98_vm1, %v6727_v28  ;;  %8174 = vmatprep.subr.mxu1 %v10013_v10 }
0x6479   :  { %8175 = vmatpush3.msra.mxu1 %v9578_v27  ;;  %8180 = vmatpush3.msra.mxu0 %v9581_v1  ;;  %v2558_v18 = vmul.f32 1.442695, %v2557_v9 }
0x647a   :  { %8181 = vmatprep.subr.mxu0 %v10013_v10  ;;  %8189 = vmatprep.mubr.msk.f32.mxu0 %vm8577_vm0, %v10013_v10  ;;  %v3195_v6 = vpop.xlane.xlu0 %3194  ;;  %vm7064_vm0 = vcmask 523264  }
0x647b   :  { %8182 = vmatpush3.msra.mxu0 %v9587_v29  ;;  %v3196_v27 = vsub.f32 %v8403_v43, %v3195_v6  ;;  %8414 = vpow2.f32 %v2558_v18  ;;  %v8409_v29 = vpop.eup %8408 }
0x647c   :  { %8183 = vmatprep.subr.mxu0 %v10013_v10 }
0x647d   :  { %8184 = vmatpush3.msra.mxu0 %v9592_v50  ;;  %v3197_v1 = vmul.f32 1.442695, %v3196_v27  ;;  %v5110_v50 = vsel %vm2553_vm14, %v8409_v29, -inf }
0x647e   :  { %8185 = vmatprep.subr.mxu0 %v10013_v10  ;;  %v5751_v7 = vpop.xlane.xlu0 %5750 }
0x647f   :  { %8186 = vmatpush3.msra.mxu0 %v9596_v56  ;;  %8416 = vpow2.f32 %v3197_v1  ;;  %v5752_v43 = vsub.f32 %v9920_v37, %v5751_v7 }
0x6480   :  { %8187 = vmatprep.subr.mxu0 %v10013_v10  ;;  %v8411_v10 = vpop.eup %8410 }
0x6481   :  { %8188 = vmatpush3.msra.mxu0 %v9600_v8  ;;  %v3832_v56 = vsel %vm2553_vm14, %v8411_v10, -inf  ;;  %v8413_v8 = vpop.eup %8412  ;;  %v5753_v11 = vmul.f32 1.442695, %v5752_v43 }
0x6482   :  { %v4471_v46 = vsel %vm2553_vm14, %v8413_v8, -inf  ;;  %v6390_v36 = vpop.xlane.xlu0 %6389 }
0x6483   :  { %v6391_v24 = vsub.f32 %v9924_v31, %v6390_v36 }
0x6485   :  { %v6392_v51 = vmul.f32 1.442695, %v6391_v24 }
0x6488   :  { %v8415_v4 = vpop.eup %8414 }
0x6489   :  { %v2560_v63 = vsel %vm2553_vm14, %v8415_v4, 0.0 }
0x648c   :  { %v8417_v45 = vpop.eup %8416 }
0x648d   :  { %v3199_v35 = vsel %vm2553_vm14, %v8417_v45, 0.0 }
0x6494   :  { %5111 = vmax.xlane.f32.xlu1 %v5110_v50 }
0x6498   :  { %3833 = vmax.xlane.f32.xlu1 %v3832_v56 }
0x649c   :  { %4472 = vmax.xlane.f32.xlu1 %v4471_v46 }
0x64a0   :  { %2561 = vadd.xlane.f32.xlu1 %v2560_v63 }
0x64a4   :  { %3200 = vadd.xlane.f32.xlu1 %v3199_v35 }
0x64e2   :  { %v6878_v62 = vpop.permute.xlu1 %6877 }
0x651d   :  { %v5112_v44 = vpop.xlane.xlu1 %5111 }
0x651e   :  { %v5113_v54 = vsub.f32 %v8409_v29, %v5112_v44 }
0x6520   :  { %v5114_v59 = vmul.f32 1.442695, %v5113_v54 }
0x6521   :  { %v3834_v21 = vpop.xlane.xlu1 %3833 }
0x6522   :  { %v9966_v38 = vsub.f32 %v8411_v10, %v3834_v21 }
0x6524   :  { %v3836_v52 = vmul.f32 1.442695, %v9966_v38 }
0x6525   :  { %v4473_v39 = vpop.xlane.xlu1 %4472 }
0x6526   :  { %8418 = vpow2.f32 %v3836_v52  ;;  %v9969_v40 = vsub.f32 %v8413_v8, %v4473_v39 }
0x6528   :  { %v4475_v34 = vmul.f32 1.442695, %v9969_v40 }
0x6529   :  { %v2562_v41 = vpop.xlane.xlu1 %2561 }
0x652a   :  { %8420 = vpow2.f32 %v4475_v34 }
0x652b   :  { %8422 = vlog2.f32 %v2562_v41 }
0x652d   :  { %v3201_v26 = vpop.xlane.xlu1 %3200 }
0x652e   :  { %8424 = vlog2.f32 %v3201_v26 }
0x6533   :  { %v8419_v23 = vpop.eup %8418 }
0x6534   :  { %v3838_v5 = vsel %vm2553_vm14, %v8419_v23, 0.0 }
0x6535   :  { %3839 = vadd.xlane.f32.xlu1 %v3838_v5 }
0x6536   :  { %v6796_v47 = vpop.f32.mrf.mxu1 }
0x6537   :  { %v8421_v20 = vpop.eup %8420 }
0x6538   :  { %v8164_v60 = vpop.f32.mrf.mxu1  ;;  %v6868_v61 = vpop.f32.mrf.mxu0  ;;  %v4477_v22 = vsel %vm2553_vm14, %v8421_v20, 0.0 }
0x6539   :  { %v6874_v49 = vrot.slane %v6868_v61, 7  ;;  %4478 = vadd.xlane.f32.xlu1 %v4477_v22  ;;  %v8423_v13 = vpop.eup %8422 }
0x653a   :  { %v8171_v55 = vpop.f32.mrf.mxu0  ;;  %v2564_v14 = vmul.f32 0.6931472, %v8423_v13 }
0x653b   :  { %v6875_v25 = vsel %vm2395_vm12, %v6874_v49, %v6796_v47  ;;  %v8425_v57 = vpop.eup %8424  ;;  %v8585_v49 = vmov 1983009808   ;;  %vm7092_vm12 = vmor %vm7091_vm10, %vm1120_vm3 }
0x653c   :  { %8177 = vmatmul.mubr.msk.f32.vlgmr.msra.gmra.mxu1 %vm98_vm1, %v6875_v25  ;;  %v2565_v58 = vsub.f32 %v2557_v9, %v2564_v14  ;;  %v3203_v32 = vmul.f32 0.6931472, %v8425_v57  ;;  %v7076_v55 = vunpack.c.l.s4 %v8585_v49  ;;  %v10015_v14 = vld [vmem:[#allocation12_spill] sm:$0xff]  ;;  %vm7066_vm1 = vcmask 785408  }
0x653e   :  { %v3204_v42 = vsub.f32 %v3196_v27, %v3203_v32  ;;  %v7077_v32 = vunpack.c.0.s8 %v7076_v55 }
0x654a   :  { %7040 = vrot.lane.b32.xlu1 %v2565_v58, %s8579_s2 }
0x654e   :  { %7044 = vrot.lane.b32.xlu1 %v3204_v42, %s8578_s0 }
0x65be   :  { %v3840_v21 = vpop.xlane.xlu1 %3839 }
0x65c2   :  { %v4479_v23 = vpop.xlane.xlu1 %4478 }
0x65c6   :  { %v7041_v5 = vpop.permute.xlu1 %7040 }
0x65ca   :  { %v7045_v20 = vpop.permute.xlu1 %7044 }
0x65fc   :  { %v6948_v19 = vpop.f32.mrf.mxu1 }
0x65fd   :  { %v6949_v0 = vadd.f32 %v6948_v19, %v6878_v62 }
0x65fe   :  { %v8178_v48 = vpop.f32.mrf.mxu1 }
0x65ff   :  { %v6952_v16 = vadd.f32 %v6949_v0, %v9118_v30 }
0x6601   :  { %8190 = vmatmul.mubr.msk.f32.vlgmr.msra.gmra.mxu0 %vm2478_vm13, %v6952_v16  ;;  %vm7093_vm13 = vcmask 259076  }
0x66c1   :  { %v7022_v53 = vpop.f32.mrf.mxu0 }
0x66c2   :  { %v7023_v33 = vadd.f32 %v8484_v15, %v7022_v53 }
0x66c3   :  { %v8191_v2 = vpop.f32.mrf.mxu0 }
0x66c4   :  { %8426 = vtanh.f32 %v7023_v33 }
0x66c5   :  { %8428 = vpow2.f32 %v5114_v59 }
0x66c6   :  { %8430 = vpow2.f32 %v5753_v11 }
0x66c7   :  { %8432 = vpow2.f32 %v6392_v51 }
0x66d1   :  { %v8427_v30 = vpop.eup %8426 }
0x66d2   :  { %v7027_v3 = vsel %vm2553_vm14, %v8427_v30, -inf  ;;  %v8429_v12 = vpop.eup %8428 }
0x66d3   :  { %7028 = vmax.xlane.f32.xlu0 %v7027_v3  ;;  %v5116_v37 = vsel %vm2553_vm14, %v8429_v12, 0.0  ;;  %v8431_v28 = vpop.eup %8430 }
0x66d4   :  { %v5755_v17 = vsel %vm2553_vm14, %v8431_v28, 0.0  ;;  %v8433_v9 = vpop.eup %8432 }
0x66d5   :  { %v6394_v6 = vsel %vm2553_vm14, %v8433_v9, 0.0 }
0x66d7   :  { %5117 = vadd.xlane.f32.xlu0 %v5116_v37 }
0x66db   :  { %5756 = vadd.xlane.f32.xlu0 %v5755_v17 }
0x66df   :  { %6395 = vadd.xlane.f32.xlu0 %v6394_v6 }
0x675c   :  { %v7029_v31 = vpop.xlane.xlu0 %7028 }
0x675d   :  { %v7030_v35 = vsub.f32 %v8427_v30, %v7029_v31 }
0x675f   :  { %v7031_v62 = vmul.f32 1.442695, %v7030_v35 }
0x6760   :  { %v5118_v18 = vpop.xlane.xlu0 %5117 }
0x6761   :  { %8434 = vlog2.f32 %v5118_v18 }
0x6764   :  { %v5757_v27 = vpop.xlane.xlu0 %5756 }
0x6765   :  { %8436 = vlog2.f32 %v5757_v27 }
0x6768   :  { %v6396_v1 = vpop.xlane.xlu0 %6395 }
0x6769   :  { %8438 = vlog2.f32 %v6396_v1 }
0x676a   :  { %8440 = vpow2.f32 %v7031_v62 }
0x676b   :  { %8442 = vlog2.f32 %v3840_v21 }
0x676c   :  { %8444 = vlog2.f32 %v4479_v23 }
0x676e   :  { %v8435_v29 = vpop.eup %8434 }
0x676f   :  { %v5120_v50 = vmul.f32 0.6931472, %v8435_v29 }
0x6771   :  { %v5121_v56 = vsub.f32 %v5113_v54, %v5120_v50  ;;  %v10016_v54 = vld [vmem:[#allocation13_spill] sm:$0xff] }
0x6772   :  { %v8437_v10 = vpop.eup %8436  ;;  %v7080_v53 = vsub.s32 %v7077_v32, %v10016_v54 }
0x6773   :  { %v5759_v8 = vmul.f32 0.6931472, %v8437_v10  ;;  %7052 = vrot.lane.b32.xlu0 %v5121_v56, %s8579_s2 }
0x6775   :  { %v5760_v46 = vsub.f32 %v5752_v43, %v5759_v8 }
0x6776   :  { %v8439_v4 = vpop.eup %8438 }
0x6777   :  { %v6398_v63 = vmul.f32 0.6931472, %v8439_v4  ;;  %7056 = vrot.lane.b32.xlu1 %v5760_v46, %s8578_s0  ;;  %v8441_v44 = vpop.eup %8440 }
0x6778   :  { %v7033_v52 = vsel %vm2553_vm14, %v8441_v44, 0.0  ;;  %v8443_v39 = vpop.eup %8442  ;;  %vm7094_vm14 = vmor %vm7093_vm13, %vm7092_vm12 }
0x6779   :  { %v6399_v45 = vsub.f32 %v6391_v24, %v6398_v63  ;;  %v3842_v34 = vmul.f32 0.6931472, %v8443_v39  ;;  %v8445_v60 = vpop.eup %8444 }
0x677a   :  { %v4481_v22 = vmul.f32 0.6931472, %v8445_v60 }
0x677b   :  { %7060 = vrot.lane.b32.xlu1 %v6399_v45, %s8581_s29  ;;  %v3843_v41 = vsub.f32 %v9966_v38, %v3842_v34  ;;  %v7063_v38 = vsel %vm277_vm2, %v10015_v14, %v7041_v5 }
0x677c   :  { %v4482_v13 = vsub.f32 %v9969_v40, %v4481_v22  ;;  %v7065_v57 = vsel %vm7064_vm0, %v7063_v38, %v7045_v20 }
0x6792   :  { %7034 = vadd.xlane.f32.xlu0 %v7033_v52 }
0x67a8   :  { %7048 = vrot.lane.b32.xlu0 %v3843_v41, %s8581_s29 }
0x67e5   :  { %v7053_v26 = vpop.permute.xlu0 %7052 }
0x67e6   :  { %v7068_v42 = vsel %vm277_vm2, %v4482_v13, %v7053_v26 }
0x67e9   :  { %v7057_v61 = vpop.permute.xlu1 %7056 }
0x67ea   :  { %v7069_v0 = vsel %vm7064_vm0, %v7068_v42, %v7057_v61 }
0x67ed   :  { %v7061_v58 = vpop.permute.xlu1 %7060 }
0x67ee   :  { %v7070_v16 = vsel %vm7066_vm1, %v7069_v0, %v7061_v58 }
0x681b   :  { %v7035_v47 = vpop.xlane.xlu0 %7034 }
0x681c   :  { %8446 = vlog2.f32 %v7035_v47 }
0x681f   :  { %v7049_v25 = vpop.permute.xlu0 %7048 }
0x6820   :  { %v7067_v19 = vsel %vm7066_vm1, %v7065_v57, %v7049_v25 }
0x6821   :  { %v7074_v43 = vcombine.low %v7067_v19, %v7070_v16 }
0x6823   :  { %v7081_v40 = vrot.slane %v7074_v43, %v7080_v53 }
0x6829   :  { %v8447_v48 = vpop.eup %8446 }
0x682a   :  { %v7037_v7 = vmul.f32 0.6931472, %v8447_v48 }
0x682c   :  { %v7038_v59 = vsub.f32 %v7030_v35, %v7037_v7 }
0x682e   :  { %v7088_v15 = vrot.slane %v7038_v59, %v7080_v53 }
0x6830   :  { %v7089_v33 = vcombine.low %v7081_v40, %v7088_v15 }
0x6832   :  { %7095 = vst.msk [vmem:[#allocation8] sm:$0x3f] %vm7094_vm14, %v7089_v33 }
0x6833   :  { %8556 = shalt.err (!%p8553_p5)
}
0x6834   :  { %7105 = dma.vmem_to_hbm [thread:$0]  %s7103_s6, 96, %s10004_s3, [#allocation4]  }
0x6835   :  { %8569 = dma.done.wait [#allocation4], 96  }
0x6836   :  { %8570 = vsyncadd [#allocation4], 4294967200 }
0x6837   :  { %7109 = vsyncpa [#allocation3], 1 }
0x6838   :  { %7110 = vsyncpa [#allocation6], 1 }
0x6839   :  { %7111 = vsyncpa [#allocation4], 1 }

</bundles_post_ra>
